<compile_context>
chip_gen: v7x
topology: tpu7x:2x2x1
jax: 0.10.0
libtpu: 0.0.40
codegen_flags: <defaults>
</compile_context>

<pallas_src>
import functools
import math

import numpy as np
import jax
import jax.numpy as jnp
from jax.experimental import pallas as pl
from jax.experimental.pallas import tpu as pltpu


# ---------------------------------------------------------------------------
# Gaussian location prior (computed once in __init__ in PyTorch).
# ---------------------------------------------------------------------------
def generate_grid(h, w):
    x = np.linspace(0, w - 1, w)
    y = np.linspace(0, h - 1, h)
    xv, yv = np.meshgrid(x, y)
    return xv.flatten(), yv.flatten()


def generate_gaussian(height, width, alpha_x, alpha_y):
    dis = np.zeros((height * width, height * width), dtype=np.float64)
    xv, yv = generate_grid(height, width)
    for i in range(width):
        for j in range(height):
            d = np.square(xv - i) / (2 * alpha_x ** 2) + \
                np.square(yv - j) / (2 * alpha_y ** 2)
            dis[i + j * width] = -1.0 * d
    dis = jnp.asarray(dis, dtype=jnp.float32)
    return jax.nn.softmax(dis, axis=-1)


# ---------------------------------------------------------------------------
# In-kernel helpers.
# ---------------------------------------------------------------------------
def _softmax_last(a):
    m = jnp.max(a, axis=-1, keepdims=True)
    e = jnp.exp(a - m)
    s = jnp.sum(e, axis=-1, keepdims=True)
    # divide -> EUP approximate reciprocal (frees the VALU slot)
    return e * pl.reciprocal(s, approx=True)


def _batchnorm_train(y, gamma, beta, eps=1e-5):
    # Training-mode BatchNorm2d: biased stats over (batch, spatial) per channel.
    cnt = y.shape[0] * y.shape[2]
    mean = jnp.sum(jnp.sum(y, axis=2, keepdims=True), axis=0, keepdims=True) / cnt
    diff = y - mean
    var = jnp.sum(jnp.sum(diff * diff, axis=2, keepdims=True), axis=0,
                  keepdims=True) / cnt
    return gamma * diff * jax.lax.rsqrt(var + eps) + beta


# ---------------------------------------------------------------------------
# Pallas kernel: full IA block forward for the whole (small) batch.
# ---------------------------------------------------------------------------
def ia_block_kernel(x_ref, dis_ref, bn_ref, out_ref, *, matmul_dtype):
    x = x_ref[...].astype(jnp.float32)            # (B, C, N), N lane-dense
    dis = dis_ref[...].astype(jnp.float32)        # (N, N)
    p = bn_ref[...].astype(jnp.float32)           # (4, C, 1): g1, b1, g2, b2
    g1, b1, g2, b2 = p[0:1], p[1:2], p[2:3], p[3:4]
    B, C, N = x.shape
    md = matmul_dtype

    # ---------------- stage 1: spatial attention (N x N) ----------------
    xs = (x * (1.0 / math.sqrt(C))).astype(md)    # 1/sqrt(C) folded into B*C*N elems
    # Only transpose in the kernel: tiny (B, N, C) LHS so the score matmul is a
    # canonical NN dot_general; all large intermediates keep N in the lane dim.
    xt = jnp.transpose(x, (0, 2, 1)).astype(md)   # (B, N, C)
    f = jnp.einsum('bnc,bcm->bnm', xt, xs,
                   preferred_element_type=jnp.float32)        # (B, N, N)
    f = _softmax_last(f)
    f = f * dis[None, :, :]                       # gate with the Gaussian prior
    f = _softmax_last(f)
    # y[b,c,n] = sum_m x[b,c,m] * f[b,n,m]  -> lands directly in (B, C, N)
    y = jnp.einsum('bcm,bnm->bcn', x.astype(md), f.astype(md),
                   preferred_element_type=jnp.float32)

    y = _batchnorm_train(y, g1, b1)               # W1
    z = y + x                                     # residual

    # ---------------- stage 2: channel attention (C x C) ----------------
    zm = z.astype(md)
    f2 = jnp.einsum('bcn,bdn->bcd', zm, zm,
                    preferred_element_type=jnp.float32)       # (B, C, C)
    f2 = _softmax_last(f2)
    y2 = jnp.einsum('bcd,bdn->bcn', f2.astype(md), zm,
                    preferred_element_type=jnp.float32)       # (B, C, N)

    y2 = _batchnorm_train(y2, g2, b2)             # W2
    out_ref[...] = (y2 + z).astype(out_ref.dtype)  # residual, lane-dense store


def ia_block_forward(x, dis, gamma1, beta1, gamma2, beta2,
                     matmul_dtype=jnp.float32):
    """x: (B, C, H, W) float32. Returns (B, C, H, W)."""
    B, C, H, W = x.shape
    N = H * W
    x_flat = x.reshape(B, C, N)
    # Pack the four BN affine vectors into one small VMEM operand.
    bn_params = jnp.stack(
        [gamma1, beta1, gamma2, beta2]).astype(jnp.float32).reshape(4, C, 1)

    # Advisory cost estimate so XLA can overlap this call with its neighbours.
    mm_flops = 2 * (2 * B * N * N * C) + 2 * (2 * B * C * C * N)
    ew_flops = 10 * B * N * N + 12 * B * C * N
    transcendentals = B * (2 * N * N + C * C)            # softmax exps
    bytes_accessed = 4 * (2 * B * C * N + N * N + 4 * C)
    cost = pl.CostEstimate(flops=mm_flops + ew_flops,
                           transcendentals=transcendentals,
                           bytes_accessed=bytes_accessed)

    vmem = pl.BlockSpec(memory_space=pltpu.MemorySpace.VMEM)
    out = pl.pallas_call(
        functools.partial(ia_block_kernel, matmul_dtype=matmul_dtype),
        out_shape=jax.ShapeDtypeStruct((B, C, N), x.dtype),
        in_specs=[vmem, vmem, vmem],
        out_specs=vmem,
        compiler_params=pltpu.CompilerParams(vmem_limit_bytes=32 * 1024 * 1024),
        cost_estimate=cost,
    )(x_flat, dis, bn_params)
    return out.reshape(B, C, H, W)


# ---------------------------------------------------------------------------
# Pure-JAX reference (mirrors the PyTorch forward) for correctness checking.
# ---------------------------------------------------------------------------
def ia_block_reference(x, dis, g1, b1, g2, b2, eps=1e-5):
    B, C, H, W = x.shape
    N = H * W
    xf = x.reshape(B, C, N)
    theta = jnp.transpose(xf, (0, 2, 1))
    f = jnp.einsum('bnc,bcm->bnm', theta, xf) / np.sqrt(C)
    f = jax.nn.softmax(f, axis=-1)
    f = jax.nn.softmax(dis[None] * f, axis=-1)
    y = jnp.transpose(jnp.einsum('bnm,bmc->bnc', f, theta), (0, 2, 1))
    mean = y.mean(axis=(0, 2), keepdims=True)
    var = ((y - mean) ** 2).mean(axis=(0, 2), keepdims=True)
    y = g1.reshape(1, C, 1) * (y - mean) / jnp.sqrt(var + eps) + b1.reshape(1, C, 1)
    z = y + xf
    f2 = jax.nn.softmax(jnp.einsum('bcn,bnd->bcd', z, jnp.transpose(z, (0, 2, 1))),
                        axis=-1)
    y2 = jnp.einsum('bcd,bdn->bcn', f2, z)
    mean2 = y2.mean(axis=(0, 2), keepdims=True)
    var2 = ((y2 - mean2) ** 2).mean(axis=(0, 2), keepdims=True)
    y2 = g2.reshape(1, C, 1) * (y2 - mean2) / jnp.sqrt(var2 + eps) + b2.reshape(1, C, 1)
    return (y2 + z).reshape(B, C, H, W)


if __name__ == "__main__":
    # H*W = 256 -> lane-dense (multiple of 128) last dim for all intermediates.
    B, C, H, W = 2, 4, 16, 16
    alpha_x = alpha_y = 2.0

    key = jax.random.PRNGKey(0)
    x = jax.random.normal(key, (B, C, H, W), dtype=jnp.float32)

    dis = generate_gaussian(H, W, alpha_x, alpha_y)          # (N, N), N = 256

    # Module __init__ zero-inits the BN affine params -> the block is identity.
    zeros = jnp.zeros((C,), jnp.float32)
    out = jax.block_until_ready(
        ia_block_forward(x, dis, zeros, zeros, zeros, zeros))
    ref = ia_block_reference(x, dis, zeros, zeros, zeros, zeros)
    assert np.allclose(np.asarray(out), np.asarray(ref), atol=1e-5, rtol=1e-5)
    assert np.allclose(np.asarray(out), np.asarray(x), atol=1e-5, rtol=1e-5)

    # Non-degenerate BN params (gamma=1) exercise the attention + BN path.
    ones = jnp.ones((C,), jnp.float32)
    out2 = jax.block_until_ready(
        ia_block_forward(x, dis, ones, zeros, ones, zeros))
    ref2 = ia_block_reference(x, dis, ones, zeros, ones, zeros)
    # Tolerance accounts for the EUP approximate-reciprocal softmax normalisation.
    assert np.allclose(np.asarray(out2), np.asarray(ref2), atol=5e-3, rtol=5e-3)

    # bf16 matmul-operand path (MXU-native on v6e/v7x); coarse sanity bound only,
    # elementwise softmax/BN math stays f32 inside the kernel.
    out3 = jax.block_until_ready(
        ia_block_forward(x, dis, ones, zeros, ones, zeros,
                         matmul_dtype=jnp.bfloat16))
    out3 = np.asarray(out3)
    assert np.all(np.isfinite(out3))
    assert np.max(np.abs(out3 - np.asarray(ref2))) < 0.5

    print("KERNEL_OK")
</pallas_src>

<mosaic_0001>
module attributes {stable_mosaic.version = 11 : i64} {
  func.func @ia_block_kernel(%arg0: memref<2x4x256xf32, #tpu.memory_space<vmem>>, %arg1: memref<256x256xf32, #tpu.memory_space<vmem>>, %arg2: memref<4x4x1xf32, #tpu.memory_space<vmem>>, %arg3: memref<2x4x256xf32, #tpu.memory_space<vmem>>) attributes {dimension_semantics = [], scalar_prefetch = 0 : i64, scratch_operands = 0 : i64, tpu.core_type = #tpu.core_type<tc>} {
    %c0 = arith.constant 0 : index
    %c0_0 = arith.constant 0 : index
    %c0_1 = arith.constant 0 : index
    %0 = vector.load %arg0[%c0, %c0_0, %c0_1] : memref<2x4x256xf32, #tpu.memory_space<vmem>>, vector<2x4x256xf32>
    %c0_2 = arith.constant 0 : index
    %c0_3 = arith.constant 0 : index
    %1 = vector.load %arg1[%c0_2, %c0_3] : memref<256x256xf32, #tpu.memory_space<vmem>>, vector<256x256xf32>
    %c0_4 = arith.constant 0 : index
    %c0_5 = arith.constant 0 : index
    %c0_6 = arith.constant 0 : index
    %2 = vector.load %arg2[%c0_4, %c0_5, %c0_6] : memref<4x4x1xf32, #tpu.memory_space<vmem>>, vector<4x4x1xf32>
    %3 = vector.extract_strided_slice %2 {offsets = [0, 0, 0], sizes = [1, 4, 1], strides = [1, 1, 1]} : vector<4x4x1xf32> to vector<1x4x1xf32>
    %4 = vector.extract_strided_slice %2 {offsets = [1, 0, 0], sizes = [1, 4, 1], strides = [1, 1, 1]} : vector<4x4x1xf32> to vector<1x4x1xf32>
    %5 = vector.extract_strided_slice %2 {offsets = [2, 0, 0], sizes = [1, 4, 1], strides = [1, 1, 1]} : vector<4x4x1xf32> to vector<1x4x1xf32>
    %6 = vector.extract_strided_slice %2 {offsets = [3, 0, 0], sizes = [1, 4, 1], strides = [1, 1, 1]} : vector<4x4x1xf32> to vector<1x4x1xf32>
    %cst = arith.constant 5.000000e-01 : f32
    %7 = vector.broadcast %cst : f32 to vector<2x4x256xf32>
    %8 = arith.mulf %0, %7 : vector<2x4x256xf32>
    %9 = tpu.transpose %0, [0, 2, 1] : vector<2x4x256xf32> -> vector<2x256x4xf32>
    "tpu.trace_start"() <{level = 10 : i32, message = "bnc,bcm->bnm"}> : () -> ()
    %cst_7 = arith.constant dense<0.000000e+00> : vector<2x256x256xf32>
    %10 = tpu.matmul %9, %8, %cst_7 {dimension_numbers = #tpu.dot_dimension_numbers<[2], [1], [1], [2], [0, 0, 0, 1, 1, 2], [0], [0]>} : vector<2x256x4xf32>, vector<2x4x256xf32>, vector<2x256x256xf32> -> vector<2x256x256xf32>
    "tpu.trace_stop"() : () -> ()
    %cst_8 = arith.constant dense<0xFF800000> : vector<2x256xf32>
    %11 = vector.multi_reduction <maximumf>, %10, %cst_8 [2] : vector<2x256x256xf32> to vector<2x256xf32>
    %12 = vector.shape_cast %11 : vector<2x256xf32> to vector<2x256x1xf32>
    %13 = vector.broadcast %12 : vector<2x256x1xf32> to vector<2x256x256xf32>
    %14 = arith.subf %10, %13 : vector<2x256x256xf32>
    %15 = math.exp %14 : vector<2x256x256xf32>
    %cst_9 = arith.constant dense<0.000000e+00> : vector<2x256xf32>
    %16 = vector.multi_reduction <add>, %15, %cst_9 [2] : vector<2x256x256xf32> to vector<2x256xf32>
    %17 = vector.shape_cast %16 : vector<2x256xf32> to vector<2x256x1xf32>
    %18 = tpu.reciprocal %17 {approx = true} : vector<2x256x1xf32> -> vector<2x256x1xf32>
    %19 = vector.broadcast %18 : vector<2x256x1xf32> to vector<2x256x256xf32>
    %20 = arith.mulf %15, %19 : vector<2x256x256xf32>
    %21 = vector.shape_cast %1 : vector<256x256xf32> to vector<1x256x256xf32>
    %22 = vector.broadcast %21 : vector<1x256x256xf32> to vector<2x256x256xf32>
    %23 = arith.mulf %20, %22 : vector<2x256x256xf32>
    %cst_10 = arith.constant dense<0xFF800000> : vector<2x256xf32>
    %24 = vector.multi_reduction <maximumf>, %23, %cst_10 [2] : vector<2x256x256xf32> to vector<2x256xf32>
    %25 = vector.shape_cast %24 : vector<2x256xf32> to vector<2x256x1xf32>
    %26 = vector.broadcast %25 : vector<2x256x1xf32> to vector<2x256x256xf32>
    %27 = arith.subf %23, %26 : vector<2x256x256xf32>
    %28 = math.exp %27 : vector<2x256x256xf32>
    %cst_11 = arith.constant dense<0.000000e+00> : vector<2x256xf32>
    %29 = vector.multi_reduction <add>, %28, %cst_11 [2] : vector<2x256x256xf32> to vector<2x256xf32>
    %30 = vector.shape_cast %29 : vector<2x256xf32> to vector<2x256x1xf32>
    %31 = tpu.reciprocal %30 {approx = true} : vector<2x256x1xf32> -> vector<2x256x1xf32>
    %32 = vector.broadcast %31 : vector<2x256x1xf32> to vector<2x256x256xf32>
    %33 = arith.mulf %28, %32 : vector<2x256x256xf32>
    "tpu.trace_start"() <{level = 10 : i32, message = "bcm,bnm->bcn"}> : () -> ()
    %cst_12 = arith.constant dense<0.000000e+00> : vector<2x4x256xf32>
    %34 = tpu.matmul %0, %33, %cst_12 {dimension_numbers = #tpu.dot_dimension_numbers<[2], [2], [1], [1], [0, 0, 0, 1, 1, 1], [0], [0]>} : vector<2x4x256xf32>, vector<2x256x256xf32>, vector<2x4x256xf32> -> vector<2x4x256xf32>
    "tpu.trace_stop"() : () -> ()
    %cst_13 = arith.constant dense<0.000000e+00> : vector<2x4xf32>
    %35 = vector.multi_reduction <add>, %34, %cst_13 [2] : vector<2x4x256xf32> to vector<2x4xf32>
    %36 = vector.shape_cast %35 : vector<2x4xf32> to vector<2x4x1xf32>
    %cst_14 = arith.constant dense<0.000000e+00> : vector<4x1xf32>
    %37 = vector.multi_reduction <add>, %36, %cst_14 [0] : vector<2x4x1xf32> to vector<4x1xf32>
    %38 = vector.shape_cast %37 : vector<4x1xf32> to vector<1x4x1xf32>
    %cst_15 = arith.constant 5.120000e+02 : f32
    %39 = vector.broadcast %cst_15 : f32 to vector<1x4x1xf32>
    %40 = arith.divf %38, %39 : vector<1x4x1xf32>
    %41 = vector.broadcast %40 : vector<1x4x1xf32> to vector<2x4x256xf32>
    %42 = arith.subf %34, %41 : vector<2x4x256xf32>
    %43 = arith.mulf %42, %42 : vector<2x4x256xf32>
    %cst_16 = arith.constant dense<0.000000e+00> : vector<2x4xf32>
    %44 = vector.multi_reduction <add>, %43, %cst_16 [2] : vector<2x4x256xf32> to vector<2x4xf32>
    %45 = vector.shape_cast %44 : vector<2x4xf32> to vector<2x4x1xf32>
    %cst_17 = arith.constant dense<0.000000e+00> : vector<4x1xf32>
    %46 = vector.multi_reduction <add>, %45, %cst_17 [0] : vector<2x4x1xf32> to vector<4x1xf32>
    %47 = vector.shape_cast %46 : vector<4x1xf32> to vector<1x4x1xf32>
    %cst_18 = arith.constant 5.120000e+02 : f32
    %48 = vector.broadcast %cst_18 : f32 to vector<1x4x1xf32>
    %49 = arith.divf %47, %48 : vector<1x4x1xf32>
    %50 = vector.broadcast %3 : vector<1x4x1xf32> to vector<2x4x256xf32>
    %51 = arith.mulf %50, %42 : vector<2x4x256xf32>
    %cst_19 = arith.constant 9.99999974E-6 : f32
    %52 = vector.broadcast %cst_19 : f32 to vector<1x4x1xf32>
    %53 = arith.addf %49, %52 : vector<1x4x1xf32>
    %54 = math.rsqrt %53 : vector<1x4x1xf32>
    %55 = vector.broadcast %54 : vector<1x4x1xf32> to vector<2x4x256xf32>
    %56 = arith.mulf %51, %55 : vector<2x4x256xf32>
    %57 = vector.broadcast %4 : vector<1x4x1xf32> to vector<2x4x256xf32>
    %58 = arith.addf %56, %57 : vector<2x4x256xf32>
    %59 = arith.addf %58, %0 : vector<2x4x256xf32>
    "tpu.trace_start"() <{level = 10 : i32, message = "bcn,bdn->bcd"}> : () -> ()
    %cst_20 = arith.constant dense<0.000000e+00> : vector<2x4x4xf32>
    %60 = tpu.matmul %59, %59, %cst_20 {dimension_numbers = #tpu.dot_dimension_numbers<[2], [2], [1], [1], [0, 0, 0, 1, 1, 1], [0], [0]>} : vector<2x4x256xf32>, vector<2x4x256xf32>, vector<2x4x4xf32> -> vector<2x4x4xf32>
    "tpu.trace_stop"() : () -> ()
    %cst_21 = arith.constant dense<0xFF800000> : vector<2x4xf32>
    %61 = vector.multi_reduction <maximumf>, %60, %cst_21 [2] : vector<2x4x4xf32> to vector<2x4xf32>
    %62 = vector.shape_cast %61 : vector<2x4xf32> to vector<2x4x1xf32>
    %63 = vector.broadcast %62 : vector<2x4x1xf32> to vector<2x4x4xf32>
    %64 = arith.subf %60, %63 : vector<2x4x4xf32>
    %65 = math.exp %64 : vector<2x4x4xf32>
    %cst_22 = arith.constant dense<0.000000e+00> : vector<2x4xf32>
    %66 = vector.multi_reduction <add>, %65, %cst_22 [2] : vector<2x4x4xf32> to vector<2x4xf32>
    %67 = vector.shape_cast %66 : vector<2x4xf32> to vector<2x4x1xf32>
    %68 = tpu.reciprocal %67 {approx = true} : vector<2x4x1xf32> -> vector<2x4x1xf32>
    %69 = vector.broadcast %68 : vector<2x4x1xf32> to vector<2x4x4xf32>
    %70 = arith.mulf %65, %69 : vector<2x4x4xf32>
    "tpu.trace_start"() <{level = 10 : i32, message = "bcd,bdn->bcn"}> : () -> ()
    %cst_23 = arith.constant dense<0.000000e+00> : vector<2x4x256xf32>
    %71 = tpu.matmul %70, %59, %cst_23 {dimension_numbers = #tpu.dot_dimension_numbers<[2], [1], [1], [2], [0, 0, 0, 1, 1, 2], [0], [0]>} : vector<2x4x4xf32>, vector<2x4x256xf32>, vector<2x4x256xf32> -> vector<2x4x256xf32>
    "tpu.trace_stop"() : () -> ()
    %cst_24 = arith.constant dense<0.000000e+00> : vector<2x4xf32>
    %72 = vector.multi_reduction <add>, %71, %cst_24 [2] : vector<2x4x256xf32> to vector<2x4xf32>
    %73 = vector.shape_cast %72 : vector<2x4xf32> to vector<2x4x1xf32>
    %cst_25 = arith.constant dense<0.000000e+00> : vector<4x1xf32>
    %74 = vector.multi_reduction <add>, %73, %cst_25 [0] : vector<2x4x1xf32> to vector<4x1xf32>
    %75 = vector.shape_cast %74 : vector<4x1xf32> to vector<1x4x1xf32>
    %cst_26 = arith.constant 5.120000e+02 : f32
    %76 = vector.broadcast %cst_26 : f32 to vector<1x4x1xf32>
    %77 = arith.divf %75, %76 : vector<1x4x1xf32>
    %78 = vector.broadcast %77 : vector<1x4x1xf32> to vector<2x4x256xf32>
    %79 = arith.subf %71, %78 : vector<2x4x256xf32>
    %80 = arith.mulf %79, %79 : vector<2x4x256xf32>
    %cst_27 = arith.constant dense<0.000000e+00> : vector<2x4xf32>
    %81 = vector.multi_reduction <add>, %80, %cst_27 [2] : vector<2x4x256xf32> to vector<2x4xf32>
    %82 = vector.shape_cast %81 : vector<2x4xf32> to vector<2x4x1xf32>
    %cst_28 = arith.constant dense<0.000000e+00> : vector<4x1xf32>
    %83 = vector.multi_reduction <add>, %82, %cst_28 [0] : vector<2x4x1xf32> to vector<4x1xf32>
    %84 = vector.shape_cast %83 : vector<4x1xf32> to vector<1x4x1xf32>
    %cst_29 = arith.constant 5.120000e+02 : f32
    %85 = vector.broadcast %cst_29 : f32 to vector<1x4x1xf32>
    %86 = arith.divf %84, %85 : vector<1x4x1xf32>
    %87 = vector.broadcast %5 : vector<1x4x1xf32> to vector<2x4x256xf32>
    %88 = arith.mulf %87, %79 : vector<2x4x256xf32>
    %cst_30 = arith.constant 9.99999974E-6 : f32
    %89 = vector.broadcast %cst_30 : f32 to vector<1x4x1xf32>
    %90 = arith.addf %86, %89 : vector<1x4x1xf32>
    %91 = math.rsqrt %90 : vector<1x4x1xf32>
    %92 = vector.broadcast %91 : vector<1x4x1xf32> to vector<2x4x256xf32>
    %93 = arith.mulf %88, %92 : vector<2x4x256xf32>
    %94 = vector.broadcast %6 : vector<1x4x1xf32> to vector<2x4x256xf32>
    %95 = arith.addf %93, %94 : vector<2x4x256xf32>
    %96 = arith.addf %95, %59 : vector<2x4x256xf32>
    %c0_31 = arith.constant 0 : index
    %c0_32 = arith.constant 0 : index
    %c0_33 = arith.constant 0 : index
    %97 = vector.load %arg3[%c0_31, %c0_32, %c0_33] : memref<2x4x256xf32, #tpu.memory_space<vmem>>, vector<2x4x256xf32>
    tpu.vector_store %arg3[%c0_31, %c0_32, %c0_33], %96 {strides = array<i32>} : memref<2x4x256xf32, #tpu.memory_space<vmem>>, vector<2x4x256xf32>,
    return
  }
}

</mosaic_0001>

<bundles_post_ra>
// kernel: tpu_custom_call.1
= control target key start
LH: loop header
LB: loop body
LE: loop exit
PB: predicated region body
PF: predicated region fallthrough
CT: control target
= control target key end

     0   :  { %8 = vsyncpa [#allocation3], 0  ;;  %s7089_s0 = inlined_call_operand.vmem [shape: f32[2,4,256], index: 0, kind: input, shape index: {}]   ;;  %s7090_s1 = inlined_call_operand.hbm [shape: f32[256,256], index: 1, kind: input, shape index: {}]   ;;  %s7091_s2 = inlined_call_operand.vmem [shape: f32[4,4,1], index: 2, kind: input, shape index: {}]   ;;  %s7092_s3 = inlined_call_operand.hbm [shape: f32[2,4,256], index: 3, kind: output, shape index: {}]  }
   0x1   :  { %9 = vsyncpa [#allocation4], 0  ;;  %s4668_s12 = smov [#allocation2]   ;;  %s4620_s16 = scalar_lea.hbm %s7090_s1, 8192 }
   0x2   :  { %s17_s13 = sshll.u32 %s4668_s12, 4  ;;  %p4621_p0 = scmp.ne.s32.totalorder %s7090_s1, %s4620_s16  ;;  %s18_s13 = int_to_ptr.vmem [resolvable:$true] %s17_s13 }
   0x3   :  { %p4624_p1 = scmp.lt.u32.totalorder %s4620_s16, %s7090_s1 }
   0x5   :  { %p4626_p2 = pnand %p4624_p1, %p4621_p0 }
   0x7   :  { %4629 = shalt.err (!%p4626_p2)
}
   0x8   :  { %s4630_s21 = scalar_lea.vmem %s18_s13, 8192  ;;  %p4635_p4 = scmp.lt.s32.totalorder %s18_s13, %s18_s13 }
   0x9   :  { %p4631_p3 = scmp.ne.s32.totalorder %s18_s13, %s4630_s21  ;;  %p4636_p5 = scmp.lt.s32.totalorder %s4630_s21, %s4630_s21 }
   0xb   :  { %p4637_p6 = por %p4636_p5, %p4635_p4 }
   0xd   :  { %p4638_p7 = pnand %p4637_p6, %p4631_p3 }
   0xf   :  { %4641 = shalt.err (!%p4638_p7)
}
  0x10   :  { %s4669_s22 = smov 256   ;;  %s4670_s23 = smov 16  }
  0x11   :  { %23 = dma.hbm_to_vmem [thread:$0]  %s7090_s1, 8192, %s18_s13, [#allocation3], %s4669_s22, %s4669_s22, %s4670_s23  }
  0x12   :  { %4664 = dma.done.wait [#allocation3], 8192  }
  0x13   :  { %4665 = vsyncadd [#allocation3], 4294959104  ;;  %v7093_v0 = vmov 0.0   ;;  %v29_v1 = vld [vmem:[%s7089_s0] sm:$0xff]  ;;  %vm334_vm0 = vcmask 1043456   ;;  %v30_v5 = vld [vmem:[%s7089_s0 + $0x8] sm:$0xff] }
  0x14   :  { %403 = vmatprep.mubr.f32.mxu0 %v7093_v0  ;;  %762 = vmatprep.mubr.f32.mxu1 %v7093_v0  ;;  %v4713_v2 = vcombine.high %v29_v1, %v29_v1  ;;  %v99_v3 = vmul.f32 0.5, %v29_v1  ;;  %v4721_v6 = vcombine.high %v30_v5, %v30_v5  ;;  %v100_v7 = vmul.f32 0.5, %v30_v5 }
  0x15   :  { %107 = vxpose.xlu0.b32.start.end [1/1] (short) %v29_v1, 128  ;;  %vm237_vm1 = vcmask 31744   ;;  %vm3350_vm2 = vcmask 27648  }
  0x16   :  { %7425 = vst [vmem:[#allocation8_spill] sm:$0xff] %v4713_v2  ;;  %139 = vxpose.xlu1.b32.start.end [1/1] (short) %v4713_v2, 128  ;;  %v236_v4 = vcombine.high %v99_v3, %v99_v3  ;;  %7426 = vst [vmem:[#allocation9_spill] sm:$0xff] %v4721_v6  ;;  %v597_v8 = vcombine.high %v100_v7, %v100_v7 }
  0x18   :  { %3624 = vmatprep.subr.msk.mxu0 %vm334_vm0, %v236_v4  ;;  %3658 = vmatprep.subr.msk.mxu1 %vm334_vm0, %v597_v8 }
  0x19   :  { %3625 = vmatpush1.msk.msra.mxu0 %vm334_vm0, %v99_v3  ;;  %3659 = vmatpush1.msk.msra.mxu1 %vm334_vm0, %v100_v7 }
  0x52   :  { %171 = vxpose.xlu0.b32.start.end [1/1] (short) %v30_v5, 128 }
  0x53   :  { %203 = vxpose.xlu1.b32.start.end [1/1] (short) %v4721_v6, 128 }
  0x95   :  { %v123_v9 = vpop.trf.xlu0 }
  0x96   :  { %3626 = vmatmul.mubr.msk.f32.vlgmr.msra.gmra.mrb[0].mxu0 %vm237_vm1, %v123_v9  ;;  %v155_v10 = vpop.trf.xlu1 }
  0x97   :  { %409 = vmatprep.mubr.f32.mxu0 %v7093_v0 }
  0x99   :  { %v124_v11 = vpop.trf.xlu0 }
  0x9a   :  { %3627 = vmatmul.mubr.msk.f32.gmra.mrb[2].mxu0 %vm237_vm1, %v124_v11  ;;  %v156_v13 = vpop.trf.xlu1 }
  0x9b   :  { %415 = vmatprep.mubr.f32.mxu0 %v7093_v0 }
  0x9d   :  { %v125_v12 = vpop.trf.xlu0 }
  0x9e   :  { %3628 = vmatmul.mubr.msk.f32.gmra.mrb[4].mxu0 %vm237_vm1, %v125_v12  ;;  %v157_v15 = vpop.trf.xlu1 }
  0x9f   :  { %421 = vmatprep.mubr.f32.mxu0 %v7093_v0 }
  0xa1   :  { %v126_v14 = vpop.trf.xlu0 }
  0xa2   :  { %3629 = vmatmul.mubr.msk.f32.gmra.mrb[6].mxu0 %vm237_vm1, %v126_v14  ;;  %v158_v18 = vpop.trf.xlu1 }
  0xa3   :  { %427 = vmatprep.mubr.f32.mxu0 %v7093_v0 }
  0xa5   :  { %v127_v16 = vpop.trf.xlu0 }
  0xa6   :  { %3630 = vmatmul.mubr.msk.f32.gmra.mrb[8].mxu0 %vm237_vm1, %v127_v16  ;;  %v159_v20 = vpop.trf.xlu1 }
  0xa7   :  { %433 = vmatprep.mubr.f32.mxu0 %v7093_v0 }
  0xa9   :  { %v128_v17 = vpop.trf.xlu0 }
  0xaa   :  { %3631 = vmatmul.mubr.msk.f32.gmra.mrb[10].mxu0 %vm237_vm1, %v128_v17  ;;  %v160_v23 = vpop.trf.xlu1 }
  0xab   :  { %439 = vmatprep.mubr.f32.mxu0 %v7093_v0 }
  0xad   :  { %v129_v19 = vpop.trf.xlu0 }
  0xae   :  { %3632 = vmatmul.mubr.msk.f32.gmra.mrb[12].mxu0 %vm237_vm1, %v129_v19  ;;  %v161_v25 = vpop.trf.xlu1 }
  0xaf   :  { %445 = vmatprep.mubr.f32.mxu0 %v7093_v0 }
  0xb1   :  { %v130_v21 = vpop.trf.xlu0 }
  0xb2   :  { %3633 = vmatmul.mubr.msk.f32.gmra.mrb[14].mxu0 %vm237_vm1, %v130_v21  ;;  %v162_v28 = vpop.trf.xlu1 }
  0xb3   :  { %451 = vmatprep.mubr.f32.mxu0 %v7093_v0 }
  0xb5   :  { %v131_v22 = vpop.trf.xlu0 }
  0xb6   :  { %3634 = vmatmul.mubr.msk.f32.gmra.mrb[16].mxu0 %vm237_vm1, %v131_v22  ;;  %v163_v30 = vpop.trf.xlu1 }
  0xb7   :  { %457 = vmatprep.mubr.f32.mxu0 %v7093_v0 }
  0xb9   :  { %v132_v24 = vpop.trf.xlu0 }
  0xba   :  { %3635 = vmatmul.mubr.msk.f32.gmra.mrb[18].mxu0 %vm237_vm1, %v132_v24  ;;  %v164_v33 = vpop.trf.xlu1 }
  0xbb   :  { %463 = vmatprep.mubr.f32.mxu0 %v7093_v0 }
  0xbd   :  { %v133_v26 = vpop.trf.xlu0 }
  0xbe   :  { %3636 = vmatmul.mubr.msk.f32.gmra.mrb[20].mxu0 %vm237_vm1, %v133_v26  ;;  %v165_v35 = vpop.trf.xlu1 }
  0xbf   :  { %469 = vmatprep.mubr.f32.mxu0 %v7093_v0 }
  0xc1   :  { %v134_v27 = vpop.trf.xlu0 }
  0xc2   :  { %3637 = vmatmul.mubr.msk.f32.gmra.mrb[22].mxu0 %vm237_vm1, %v134_v27  ;;  %v166_v38 = vpop.trf.xlu1 }
  0xc3   :  { %475 = vmatprep.mubr.f32.mxu0 %v7093_v0 }
  0xc5   :  { %v135_v29 = vpop.trf.xlu0 }
  0xc6   :  { %3638 = vmatmul.mubr.msk.f32.gmra.mrb[24].mxu0 %vm237_vm1, %v135_v29  ;;  %v167_v40 = vpop.trf.xlu1 }
  0xc7   :  { %481 = vmatprep.mubr.f32.mxu0 %v7093_v0 }
  0xc9   :  { %v136_v31 = vpop.trf.xlu0 }
  0xca   :  { %3639 = vmatmul.mubr.msk.f32.gmra.mrb[26].mxu0 %vm237_vm1, %v136_v31  ;;  %v168_v43 = vpop.trf.xlu1 }
  0xcb   :  { %487 = vmatprep.mubr.f32.mxu0 %v7093_v0 }
  0xcd   :  { %v137_v32 = vpop.trf.xlu0 }
  0xce   :  { %3640 = vmatmul.mubr.msk.f32.gmra.mrb[28].mxu0 %vm237_vm1, %v137_v32  ;;  %v169_v45 = vpop.trf.xlu1 }
  0xcf   :  { %493 = vmatprep.mubr.f32.mxu0 %v7093_v0 }
  0xd1   :  { %v138_v34 = vpop.trf.xlu0 }
  0xd2   :  { %3641 = vmatmul.mubr.msk.f32.gmra.mrb[30].mxu0 %vm237_vm1, %v138_v34  ;;  %v170_v48 = vpop.trf.xlu1 }
  0xd3   :  { %499 = vmatprep.mubr.f32.mxu0 %v7093_v0 }
  0xd5   :  { %v187_v36 = vpop.trf.xlu0 }
  0xd6   :  { %3660 = vmatmul.mubr.msk.f32.vlgmr.msra.gmra.mrb[0].mxu1 %vm237_vm1, %v187_v36  ;;  %3642 = vmatmul.mubr.msk.f32.gmra.mrb[32].mxu0 %vm237_vm1, %v155_v10  ;;  %v219_v50 = vpop.trf.xlu1 }
  0xd7   :  { %768 = vmatprep.mubr.f32.mxu1 %v7093_v0  ;;  %505 = vmatprep.mubr.f32.mxu0 %v7093_v0 }
  0xd9   :  { %v188_v37 = vpop.trf.xlu0 }
  0xda   :  { %3661 = vmatmul.mubr.msk.f32.gmra.mrb[2].mxu1 %vm237_vm1, %v188_v37  ;;  %3643 = vmatmul.mubr.msk.f32.gmra.mrb[34].mxu0 %vm237_vm1, %v156_v13  ;;  %v220_v53 = vpop.trf.xlu1 }
  0xdb   :  { %774 = vmatprep.mubr.f32.mxu1 %v7093_v0  ;;  %511 = vmatprep.mubr.f32.mxu0 %v7093_v0 }
  0xdd   :  { %v189_v39 = vpop.trf.xlu0 }
  0xde   :  { %3662 = vmatmul.mubr.msk.f32.gmra.mrb[4].mxu1 %vm237_vm1, %v189_v39  ;;  %3644 = vmatmul.mubr.msk.f32.gmra.mrb[36].mxu0 %vm237_vm1, %v157_v15  ;;  %v221_v55 = vpop.trf.xlu1 }
  0xdf   :  { %780 = vmatprep.mubr.f32.mxu1 %v7093_v0  ;;  %517 = vmatprep.mubr.f32.mxu0 %v7093_v0 }
  0xe1   :  { %v190_v41 = vpop.trf.xlu0 }
  0xe2   :  { %3663 = vmatmul.mubr.msk.f32.gmra.mrb[6].mxu1 %vm237_vm1, %v190_v41  ;;  %3645 = vmatmul.mubr.msk.f32.gmra.mrb[38].mxu0 %vm237_vm1, %v158_v18  ;;  %v222_v58 = vpop.trf.xlu1 }
  0xe3   :  { %786 = vmatprep.mubr.f32.mxu1 %v7093_v0  ;;  %523 = vmatprep.mubr.f32.mxu0 %v7093_v0 }
  0xe5   :  { %v191_v42 = vpop.trf.xlu0 }
  0xe6   :  { %3664 = vmatmul.mubr.msk.f32.gmra.mrb[8].mxu1 %vm237_vm1, %v191_v42  ;;  %3646 = vmatmul.mubr.msk.f32.gmra.mrb[40].mxu0 %vm237_vm1, %v159_v20  ;;  %v223_v60 = vpop.trf.xlu1 }
  0xe7   :  { %792 = vmatprep.mubr.f32.mxu1 %v7093_v0  ;;  %529 = vmatprep.mubr.f32.mxu0 %v7093_v0 }
  0xe9   :  { %v192_v44 = vpop.trf.xlu0 }
  0xea   :  { %3665 = vmatmul.mubr.msk.f32.gmra.mrb[10].mxu1 %vm237_vm1, %v192_v44  ;;  %3647 = vmatmul.mubr.msk.f32.gmra.mrb[42].mxu0 %vm237_vm1, %v160_v23  ;;  %v224_v62 = vpop.trf.xlu1 }
  0xeb   :  { %798 = vmatprep.mubr.f32.mxu1 %v7093_v0  ;;  %535 = vmatprep.mubr.f32.mxu0 %v7093_v0 }
  0xed   :  { %v193_v46 = vpop.trf.xlu0 }
  0xee   :  { %3666 = vmatmul.mubr.msk.f32.gmra.mrb[12].mxu1 %vm237_vm1, %v193_v46  ;;  %3648 = vmatmul.mubr.msk.f32.gmra.mrb[44].mxu0 %vm237_vm1, %v161_v25  ;;  %v225_v63 = vpop.trf.xlu1 }
  0xef   :  { %804 = vmatprep.mubr.f32.mxu1 %v7093_v0  ;;  %541 = vmatprep.mubr.f32.mxu0 %v7093_v0 }
  0xf1   :  { %v194_v47 = vpop.trf.xlu0 }
  0xf2   :  { %3667 = vmatmul.mubr.msk.f32.gmra.mrb[14].mxu1 %vm237_vm1, %v194_v47  ;;  %3649 = vmatmul.mubr.msk.f32.gmra.mrb[46].mxu0 %vm237_vm1, %v162_v28  ;;  %v226_v1 = vpop.trf.xlu1 }
  0xf3   :  { %810 = vmatprep.mubr.f32.mxu1 %v7093_v0  ;;  %547 = vmatprep.mubr.f32.mxu0 %v7093_v0 }
  0xf5   :  { %v195_v49 = vpop.trf.xlu0 }
  0xf6   :  { %3668 = vmatmul.mubr.msk.f32.gmra.mrb[16].mxu1 %vm237_vm1, %v195_v49  ;;  %3650 = vmatmul.mubr.msk.f32.gmra.mrb[48].mxu0 %vm237_vm1, %v163_v30  ;;  %v227_v3 = vpop.trf.xlu1 }
  0xf7   :  { %816 = vmatprep.mubr.f32.mxu1 %v7093_v0  ;;  %553 = vmatprep.mubr.f32.mxu0 %v7093_v0 }
  0xf9   :  { %v196_v51 = vpop.trf.xlu0 }
  0xfa   :  { %3669 = vmatmul.mubr.msk.f32.gmra.mrb[18].mxu1 %vm237_vm1, %v196_v51  ;;  %3651 = vmatmul.mubr.msk.f32.gmra.mrb[50].mxu0 %vm237_vm1, %v164_v33  ;;  %v228_v4 = vpop.trf.xlu1 }
  0xfb   :  { %822 = vmatprep.mubr.f32.mxu1 %v7093_v0  ;;  %559 = vmatprep.mubr.f32.mxu0 %v7093_v0 }
  0xfd   :  { %v197_v52 = vpop.trf.xlu0 }
  0xfe   :  { %3670 = vmatmul.mubr.msk.f32.gmra.mrb[20].mxu1 %vm237_vm1, %v197_v52  ;;  %3652 = vmatmul.mubr.msk.f32.gmra.mrb[52].mxu0 %vm237_vm1, %v165_v35  ;;  %v229_v5 = vpop.trf.xlu1 }
  0xff   :  { %828 = vmatprep.mubr.f32.mxu1 %v7093_v0  ;;  %565 = vmatprep.mubr.f32.mxu0 %v7093_v0 }
 0x101   :  { %v198_v54 = vpop.trf.xlu0 }
 0x102   :  { %3671 = vmatmul.mubr.msk.f32.gmra.mrb[22].mxu1 %vm237_vm1, %v198_v54  ;;  %3653 = vmatmul.mubr.msk.f32.gmra.mrb[54].mxu0 %vm237_vm1, %v166_v38  ;;  %v230_v7 = vpop.trf.xlu1 }
 0x103   :  { %834 = vmatprep.mubr.f32.mxu1 %v7093_v0  ;;  %571 = vmatprep.mubr.f32.mxu0 %v7093_v0 }
 0x105   :  { %v199_v56 = vpop.trf.xlu0 }
 0x106   :  { %3672 = vmatmul.mubr.msk.f32.gmra.mrb[24].mxu1 %vm237_vm1, %v199_v56  ;;  %3654 = vmatmul.mubr.msk.f32.gmra.mrb[56].mxu0 %vm237_vm1, %v167_v40  ;;  %v231_v8 = vpop.trf.xlu1 }
 0x107   :  { %840 = vmatprep.mubr.f32.mxu1 %v7093_v0  ;;  %577 = vmatprep.mubr.f32.mxu0 %v7093_v0 }
 0x109   :  { %v200_v57 = vpop.trf.xlu0 }
 0x10a   :  { %3673 = vmatmul.mubr.msk.f32.gmra.mrb[26].mxu1 %vm237_vm1, %v200_v57  ;;  %3655 = vmatmul.mubr.msk.f32.gmra.mrb[58].mxu0 %vm237_vm1, %v168_v43  ;;  %v232_v9 = vpop.trf.xlu1 }
 0x10b   :  { %846 = vmatprep.mubr.f32.mxu1 %v7093_v0  ;;  %583 = vmatprep.mubr.f32.mxu0 %v7093_v0 }
 0x10d   :  { %v201_v59 = vpop.trf.xlu0 }
 0x10e   :  { %3674 = vmatmul.mubr.msk.f32.gmra.mrb[28].mxu1 %vm237_vm1, %v201_v59  ;;  %3656 = vmatmul.mubr.msk.f32.gmra.mrb[60].mxu0 %vm237_vm1, %v169_v45  ;;  %v233_v10 = vpop.trf.xlu1 }
 0x10f   :  { %852 = vmatprep.mubr.f32.mxu1 %v7093_v0  ;;  %589 = vmatprep.mubr.f32.mxu0 %v7093_v0 }
 0x111   :  { %v202_v61 = vpop.trf.xlu0 }
 0x112   :  { %3675 = vmatmul.mubr.msk.f32.gmra.mrb[30].mxu1 %vm237_vm1, %v202_v61  ;;  %3657 = vmatmul.mubr.msk.f32.gmra.mrb[62].mxu0 %vm237_vm1, %v170_v48  ;;  %v234_v11 = vpop.trf.xlu1 }
 0x113   :  { %858 = vmatprep.mubr.f32.mxu1 %v7093_v0  ;;  %3067 = vmatprep.mubr.f32.mxu0 %v4713_v2 }
 0x116   :  { %3676 = vmatmul.mubr.msk.f32.gmra.mrb[32].mxu1 %vm237_vm1, %v219_v50 }
 0x117   :  { %864 = vmatprep.mubr.f32.mxu1 %v7093_v0 }
 0x11a   :  { %3677 = vmatmul.mubr.msk.f32.gmra.mrb[34].mxu1 %vm237_vm1, %v220_v53 }
 0x11b   :  { %870 = vmatprep.mubr.f32.mxu1 %v7093_v0 }
 0x11e   :  { %3678 = vmatmul.mubr.msk.f32.gmra.mrb[36].mxu1 %vm237_vm1, %v221_v55 }
 0x11f   :  { %876 = vmatprep.mubr.f32.mxu1 %v7093_v0 }
 0x122   :  { %3679 = vmatmul.mubr.msk.f32.gmra.mrb[38].mxu1 %vm237_vm1, %v222_v58 }
 0x123   :  { %882 = vmatprep.mubr.f32.mxu1 %v7093_v0 }
 0x126   :  { %3680 = vmatmul.mubr.msk.f32.gmra.mrb[40].mxu1 %vm237_vm1, %v223_v60 }
 0x127   :  { %888 = vmatprep.mubr.f32.mxu1 %v7093_v0 }
 0x12a   :  { %3681 = vmatmul.mubr.msk.f32.gmra.mrb[42].mxu1 %vm237_vm1, %v224_v62 }
 0x12b   :  { %894 = vmatprep.mubr.f32.mxu1 %v7093_v0 }
 0x12e   :  { %3682 = vmatmul.mubr.msk.f32.gmra.mrb[44].mxu1 %vm237_vm1, %v225_v63 }
 0x12f   :  { %900 = vmatprep.mubr.f32.mxu1 %v7093_v0 }
 0x132   :  { %3683 = vmatmul.mubr.msk.f32.gmra.mrb[46].mxu1 %vm237_vm1, %v226_v1 }
 0x133   :  { %906 = vmatprep.mubr.f32.mxu1 %v7093_v0 }
 0x136   :  { %3684 = vmatmul.mubr.msk.f32.gmra.mrb[48].mxu1 %vm237_vm1, %v227_v3 }
 0x137   :  { %912 = vmatprep.mubr.f32.mxu1 %v7093_v0 }
 0x13a   :  { %3685 = vmatmul.mubr.msk.f32.gmra.mrb[50].mxu1 %vm237_vm1, %v228_v4 }
 0x13b   :  { %918 = vmatprep.mubr.f32.mxu1 %v7093_v0 }
 0x13e   :  { %3686 = vmatmul.mubr.msk.f32.gmra.mrb[52].mxu1 %vm237_vm1, %v229_v5 }
 0x13f   :  { %924 = vmatprep.mubr.f32.mxu1 %v7093_v0 }
 0x142   :  { %3687 = vmatmul.mubr.msk.f32.gmra.mrb[54].mxu1 %vm237_vm1, %v230_v7 }
 0x143   :  { %930 = vmatprep.mubr.f32.mxu1 %v7093_v0 }
 0x146   :  { %3688 = vmatmul.mubr.msk.f32.gmra.mrb[56].mxu1 %vm237_vm1, %v231_v8 }
 0x147   :  { %936 = vmatprep.mubr.f32.mxu1 %v7093_v0 }
 0x14a   :  { %3689 = vmatmul.mubr.msk.f32.gmra.mrb[58].mxu1 %vm237_vm1, %v232_v9 }
 0x14b   :  { %942 = vmatprep.mubr.f32.mxu1 %v7093_v0 }
 0x14e   :  { %3690 = vmatmul.mubr.msk.f32.gmra.mrb[60].mxu1 %vm237_vm1, %v233_v10 }
 0x14f   :  { %948 = vmatprep.mubr.f32.mxu1 %v7093_v0 }
 0x152   :  { %3691 = vmatmul.mubr.msk.f32.gmra.mrb[62].mxu1 %vm237_vm1, %v234_v11 }
 0x153   :  { %3138 = vmatprep.mubr.f32.mxu1 %v4721_v6 }
 0x169   :  { %v4854_v12 = vpop.f32.mrb[0].mxu0 }
 0x16a   :  { %v4856_v13 = vpop.f32.mrb[1].mxu0 }
 0x16b   :  { %v955_v14 = vmax.f32 %v4854_v12, %v4856_v13 }
 0x16d   :  { %956 = vmax.xlane.f32.xlu0 %v955_v14  ;;  %v4860_v15 = vpop.f32.mrb[2].mxu0 }
 0x16e   :  { %v4862_v16 = vpop.f32.mrb[3].mxu0 }
 0x16f   :  { %v958_v17 = vmax.f32 %v4860_v15, %v4862_v16 }
 0x171   :  { %v4866_v18 = vpop.f32.mrb[4].mxu0 }
 0x172   :  { %v4868_v19 = vpop.f32.mrb[5].mxu0 }
 0x173   :  { %v961_v20 = vmax.f32 %v4866_v18, %v4868_v19 }
 0x175   :  { %962 = vmax.xlane.f32.xlu0 %v961_v20  ;;  %v4872_v21 = vpop.f32.mrb[6].mxu0 }
 0x176   :  { %v4874_v22 = vpop.f32.mrb[7].mxu0 }
 0x177   :  { %v964_v23 = vmax.f32 %v4872_v21, %v4874_v22 }
 0x179   :  { %v4878_v24 = vpop.f32.mrb[8].mxu0 }
 0x17a   :  { %v4880_v25 = vpop.f32.mrb[9].mxu0 }
 0x17b   :  { %v967_v26 = vmax.f32 %v4878_v24, %v4880_v25 }
 0x17d   :  { %v4884_v27 = vpop.f32.mrb[10].mxu0 }
 0x17e   :  { %7427 = vst [vmem:[#allocation10_spill] sm:$0xff] %v4884_v27  ;;  %v4886_v28 = vpop.f32.mrb[11].mxu0 }
 0x17f   :  { %7428 = vst [vmem:[#allocation11_spill] sm:$0xff] %v4886_v28 }
 0x181   :  { %v4890_v30 = vpop.f32.mrb[12].mxu0 }
 0x182   :  { %7429 = vst [vmem:[#allocation12_spill] sm:$0xff] %v4890_v30  ;;  %v4892_v31 = vpop.f32.mrb[13].mxu0 }
 0x183   :  { %7430 = vst [vmem:[#allocation13_spill] sm:$0xff] %v4892_v31 }
 0x185   :  { %v4896_v33 = vpop.f32.mrb[14].mxu0 }
 0x186   :  { %7431 = vst [vmem:[#allocation14_spill] sm:$0xff] %v4896_v33  ;;  %v4898_v34 = vpop.f32.mrb[15].mxu0 }
 0x187   :  { %7432 = vst [vmem:[#allocation15_spill] sm:$0xff] %v4898_v34 }
 0x189   :  { %v4902_v36 = vpop.f32.mrb[16].mxu0 }
 0x18a   :  { %7433 = vst [vmem:[#allocation16_spill] sm:$0xff] %v4902_v36  ;;  %v4904_v37 = vpop.f32.mrb[17].mxu0 }
 0x18b   :  { %7434 = vst [vmem:[#allocation17_spill] sm:$0xff] %v4904_v37 }
 0x18d   :  { %v4908_v39 = vpop.f32.mrb[18].mxu0 }
 0x18e   :  { %7435 = vst [vmem:[#allocation18_spill] sm:$0xff] %v4908_v39  ;;  %v4910_v40 = vpop.f32.mrb[19].mxu0 }
 0x18f   :  { %7436 = vst [vmem:[#allocation19_spill] sm:$0xff] %v4910_v40 }
 0x191   :  { %v4914_v42 = vpop.f32.mrb[20].mxu0 }
 0x192   :  { %7437 = vst [vmem:[#allocation20_spill] sm:$0xff] %v4914_v42  ;;  %v4916_v43 = vpop.f32.mrb[21].mxu0 }
 0x193   :  { %7438 = vst [vmem:[#allocation21_spill] sm:$0xff] %v4916_v43 }
 0x195   :  { %v4920_v45 = vpop.f32.mrb[22].mxu0 }
 0x196   :  { %7439 = vst [vmem:[#allocation22_spill] sm:$0xff] %v4920_v45  ;;  %v4922_v46 = vpop.f32.mrb[23].mxu0 }
 0x197   :  { %7440 = vst [vmem:[#allocation23_spill] sm:$0xff] %v4922_v46 }
 0x199   :  { %v4926_v48 = vpop.f32.mrb[24].mxu0 }
 0x19a   :  { %7441 = vst [vmem:[#allocation24_spill] sm:$0xff] %v4926_v48  ;;  %v4928_v49 = vpop.f32.mrb[25].mxu0 }
 0x19b   :  { %7442 = vst [vmem:[#allocation25_spill] sm:$0xff] %v4928_v49 }
 0x19d   :  { %v4932_v51 = vpop.f32.mrb[26].mxu0 }
 0x19e   :  { %v4934_v52 = vpop.f32.mrb[27].mxu0 }
 0x19f   :  { %7443 = vst [vmem:[#allocation26_spill] sm:$0xff] %v4934_v52 }
 0x1a1   :  { %v4938_v54 = vpop.f32.mrb[28].mxu0 }
 0x1a2   :  { %7444 = vst [vmem:[#allocation27_spill] sm:$0xff] %v4938_v54  ;;  %v4940_v55 = vpop.f32.mrb[29].mxu0 }
 0x1a3   :  { %7445 = vst [vmem:[#allocation28_spill] sm:$0xff] %v4940_v55 }
 0x1a5   :  { %v4944_v57 = vpop.f32.mrb[30].mxu0 }
 0x1a6   :  { %v4946_v58 = vpop.f32.mrb[31].mxu0 }
 0x1a7   :  { %7446 = vst [vmem:[#allocation29_spill] sm:$0xff] %v4946_v58 }
 0x1a9   :  { %v4950_v60 = vpop.f32.mrb[0].mxu1  ;;  %v4952_v61 = vpop.f32.mrb[32].mxu0 }
 0x1aa   :  { %v4954_v62 = vpop.f32.mrb[1].mxu1  ;;  %v4956_v63 = vpop.f32.mrb[33].mxu0 }
 0x1ab   :  { %v1051_v1 = vmax.f32 %v4950_v60, %v4954_v62 }
 0x1ad   :  { %1052 = vmax.xlane.f32.xlu1 %v1051_v1  ;;  %v4962_v4 = vpop.f32.mrb[2].mxu1  ;;  %v4964_v5 = vpop.f32.mrb[34].mxu0 }
 0x1ae   :  { %v4966_v7 = vpop.f32.mrb[3].mxu1  ;;  %v4968_v8 = vpop.f32.mrb[35].mxu0 }
 0x1af   :  { %7447 = vst [vmem:[#allocation30_spill] sm:$0xff] %v4968_v8  ;;  %v1054_v10 = vmax.f32 %v4962_v4, %v4966_v7 }
 0x1b1   :  { %v4974_v11 = vpop.f32.mrb[4].mxu1  ;;  %959 = vmax.xlane.f32.xlu1 %v958_v17  ;;  %v4976_v14 = vpop.f32.mrb[36].mxu0 }
 0x1b2   :  { %v4978_v20 = vpop.f32.mrb[5].mxu1  ;;  %v4980_v1 = vpop.f32.mrb[37].mxu0 }
 0x1b3   :  { %v1057_v0 = vmax.f32 %v4974_v11, %v4978_v20 }
 0x1b5   :  { %1055 = vmax.xlane.f32.xlu1 %v1054_v10  ;;  %1058 = vmax.xlane.f32.xlu0 %v1057_v0  ;;  %v4986_v9 = vpop.f32.mrb[6].mxu1  ;;  %v4988_v59 = vpop.f32.mrb[38].mxu0 }
 0x1b6   :  { %v4990_v56 = vpop.f32.mrb[7].mxu1  ;;  %v4992_v17 = vpop.f32.mrb[39].mxu0 }
 0x1b7   :  { %7448 = vst [vmem:[#allocation31_spill] sm:$0xff] %v4992_v17  ;;  %v1060_v50 = vmax.f32 %v4986_v9, %v4990_v56 }
 0x1b9   :  { %v4998_v47 = vpop.f32.mrb[8].mxu1  ;;  %965 = vmax.xlane.f32.xlu1 %v964_v23  ;;  %968 = vmax.xlane.f32.xlu0 %v967_v26  ;;  %v5006_v0 = vpop.f32.mrb[40].mxu0 }
 0x1ba   :  { %v5008_v10 = vpop.f32.mrb[9].mxu1  ;;  %v5010_v3 = vpop.f32.mrb[41].mxu0 }
 0x1bb   :  { %v1063_v53 = vmax.f32 %v4998_v47, %v5008_v10 }
 0x1bd   :  { %1061 = vmax.xlane.f32.xlu1 %v1060_v50  ;;  %1064 = vmax.xlane.f32.xlu0 %v1063_v53  ;;  %v5016_v41 = vpop.f32.mrb[10].mxu1  ;;  %v5018_v23 = vpop.f32.mrb[42].mxu0  ;;  %v7453_v50 = vmax.f32 %v4884_v27, %v4886_v28  ;;  %v7454_v53 = vmax.f32 %v4890_v30, %v4892_v31 }
 0x1be   :  { %7449 = vst [vmem:[#allocation32_spill] sm:$0xff] %v5016_v41  ;;  %v5020_v38 = vpop.f32.mrb[11].mxu1  ;;  %v5022_v26 = vpop.f32.mrb[43].mxu0 }
 0x1bf   :  { %7450 = vst [vmem:[#allocation33_spill] sm:$0xff] %v5020_v38  ;;  %7451 = vst [vmem:[#allocation34_spill] sm:$0xff] %v5022_v26  ;;  %v1066_v32 = vmax.f32 %v5016_v41, %v5020_v38 }
 0x1c1   :  { %v5028_v29 = vpop.f32.mrb[12].mxu1  ;;  %971 = vmax.xlane.f32.xlu1 %v7453_v50  ;;  %974 = vmax.xlane.f32.xlu0 %v7454_v53  ;;  %v5036_v44 = vpop.f32.mrb[44].mxu0 }
 0x1c2   :  { %7452 = vst [vmem:[#allocation35_spill] sm:$0xff] %v5028_v29  ;;  %v5038_v6 = vpop.f32.mrb[13].mxu1  ;;  %v5040_v2 = vpop.f32.mrb[45].mxu0 }
 0x1c3   :  { %7455 = vst [vmem:[#allocation36_spill] sm:$0xff] %v5038_v6  ;;  %v1069_v35 = vmax.f32 %v5028_v29, %v5038_v6 }
 0x1c5   :  { %1067 = vmax.xlane.f32.xlu1 %v1066_v32  ;;  %1070 = vmax.xlane.f32.xlu0 %v1069_v35  ;;  %v5046_v41 = vpop.f32.mrb[14].mxu1  ;;  %v5048_v50 = vpop.f32.mrb[46].mxu0  ;;  %v7461_v32 = vmax.f32 %v4896_v33, %v4898_v34  ;;  %v7462_v35 = vmax.f32 %v4902_v36, %v4904_v37 }
 0x1c6   :  { %7456 = vst [vmem:[#allocation37_spill] sm:$0xff] %v5046_v41  ;;  %7457 = vst [vmem:[#allocation38_spill] sm:$0xff] %v5048_v50  ;;  %v5050_v31 = vpop.f32.mrb[15].mxu1  ;;  %v5052_v53 = vpop.f32.mrb[47].mxu0 }
 0x1c7   :  { %7458 = vst [vmem:[#allocation39_spill] sm:$0xff] %v5050_v31  ;;  %7459 = vst [vmem:[#allocation40_spill] sm:$0xff] %v5052_v53  ;;  %v1072_v28 = vmax.f32 %v5046_v41, %v5050_v31 }
 0x1c9   :  { %v5058_v6 = vpop.f32.mrb[16].mxu1  ;;  %977 = vmax.xlane.f32.xlu1 %v7461_v32  ;;  %980 = vmax.xlane.f32.xlu0 %v7462_v35  ;;  %v5066_v38 = vpop.f32.mrb[48].mxu0 }
 0x1ca   :  { %7460 = vst [vmem:[#allocation41_spill] sm:$0xff] %v5058_v6  ;;  %v5068_v29 = vpop.f32.mrb[17].mxu1  ;;  %v5070_v27 = vpop.f32.mrb[49].mxu0 }
 0x1cb   :  { %7463 = vst [vmem:[#allocation42_spill] sm:$0xff] %v5068_v29  ;;  %7464 = vst [vmem:[#allocation43_spill] sm:$0xff] %v5070_v27  ;;  %v1075_v30 = vmax.f32 %v5058_v6, %v5068_v29 }
 0x1cd   :  { %1073 = vmax.xlane.f32.xlu1 %v1072_v28  ;;  %1076 = vmax.xlane.f32.xlu0 %v1075_v30  ;;  %v5076_v41 = vpop.f32.mrb[18].mxu1  ;;  %v5078_v32 = vpop.f32.mrb[50].mxu0  ;;  %v7468_v28 = vmax.f32 %v4908_v39, %v4910_v40  ;;  %v7469_v30 = vmax.f32 %v4914_v42, %v4916_v43 }
 0x1ce   :  { %7465 = vst [vmem:[#allocation44_spill] sm:$0xff] %v5076_v41  ;;  %v5080_v37 = vpop.f32.mrb[19].mxu1  ;;  %v5082_v35 = vpop.f32.mrb[51].mxu0 }
 0x1cf   :  { %7466 = vst [vmem:[#allocation45_spill] sm:$0xff] %v5080_v37  ;;  %v1078_v34 = vmax.f32 %v5076_v41, %v5080_v37 }
 0x1d1   :  { %v5088_v29 = vpop.f32.mrb[20].mxu1  ;;  %983 = vmax.xlane.f32.xlu1 %v7468_v28  ;;  %986 = vmax.xlane.f32.xlu0 %v7469_v30  ;;  %v5096_v31 = vpop.f32.mrb[52].mxu0 }
 0x1d2   :  { %7467 = vst [vmem:[#allocation46_spill] sm:$0xff] %v5088_v29  ;;  %v5098_v6 = vpop.f32.mrb[21].mxu1  ;;  %v5100_v33 = vpop.f32.mrb[53].mxu0 }
 0x1d3   :  { %7470 = vst [vmem:[#allocation47_spill] sm:$0xff] %v5098_v6  ;;  %v1081_v36 = vmax.f32 %v5088_v29, %v5098_v6 }
 0x1d5   :  { %1079 = vmax.xlane.f32.xlu1 %v1078_v34  ;;  %1082 = vmax.xlane.f32.xlu0 %v1081_v36  ;;  %v5106_v41 = vpop.f32.mrb[22].mxu1  ;;  %v5108_v28 = vpop.f32.mrb[54].mxu0  ;;  %v7474_v34 = vmax.f32 %v4920_v45, %v4922_v46  ;;  %v7475_v36 = vmax.f32 %v4926_v48, %v4928_v49 }
 0x1d6   :  { %7471 = vst [vmem:[#allocation48_spill] sm:$0xff] %v5106_v41  ;;  %v5110_v43 = vpop.f32.mrb[23].mxu1  ;;  %v5112_v30 = vpop.f32.mrb[55].mxu0 }
 0x1d7   :  { %7472 = vst [vmem:[#allocation49_spill] sm:$0xff] %v5110_v43  ;;  %v1084_v40 = vmax.f32 %v5106_v41, %v5110_v43 }
 0x1d9   :  { %v5118_v6 = vpop.f32.mrb[24].mxu1  ;;  %989 = vmax.xlane.f32.xlu1 %v7474_v34  ;;  %992 = vmax.xlane.f32.xlu0 %v7475_v36  ;;  %v5126_v37 = vpop.f32.mrb[56].mxu0 }
 0x1da   :  { %7473 = vst [vmem:[#allocation50_spill] sm:$0xff] %v5118_v6  ;;  %v5128_v29 = vpop.f32.mrb[25].mxu1  ;;  %v5130_v39 = vpop.f32.mrb[57].mxu0 }
 0x1db   :  { %7476 = vst [vmem:[#allocation51_spill] sm:$0xff] %v5128_v29  ;;  %v1087_v42 = vmax.f32 %v5118_v6, %v5128_v29 }
 0x1dd   :  { %1085 = vmax.xlane.f32.xlu1 %v1084_v40  ;;  %1088 = vmax.xlane.f32.xlu0 %v1087_v42  ;;  %v5136_v41 = vpop.f32.mrb[26].mxu1  ;;  %v5138_v34 = vpop.f32.mrb[58].mxu0  ;;  %v7482_v40 = vmax.f32 %v4932_v51, %v4934_v52  ;;  %v7483_v42 = vmax.f32 %v4938_v54, %v4940_v55 }
 0x1de   :  { %7477 = vst [vmem:[#allocation52_spill] sm:$0xff] %v5136_v41  ;;  %7478 = vst [vmem:[#allocation53_spill] sm:$0xff] %v5138_v34  ;;  %v5140_v49 = vpop.f32.mrb[27].mxu1  ;;  %v5142_v36 = vpop.f32.mrb[59].mxu0 }
 0x1df   :  { %7479 = vst [vmem:[#allocation54_spill] sm:$0xff] %v5140_v49  ;;  %7480 = vst [vmem:[#allocation55_spill] sm:$0xff] %v5142_v36  ;;  %v1090_v46 = vmax.f32 %v5136_v41, %v5140_v49 }
 0x1e1   :  { %v5148_v29 = vpop.f32.mrb[28].mxu1  ;;  %995 = vmax.xlane.f32.xlu1 %v7482_v40  ;;  %998 = vmax.xlane.f32.xlu0 %v7483_v42  ;;  %v5156_v43 = vpop.f32.mrb[60].mxu0 }
 0x1e2   :  { %7481 = vst [vmem:[#allocation56_spill] sm:$0xff] %v5148_v29  ;;  %7484 = vst [vmem:[#allocation57_spill] sm:$0xff] %v5156_v43  ;;  %v5158_v6 = vpop.f32.mrb[29].mxu1  ;;  %v5160_v45 = vpop.f32.mrb[61].mxu0 }
 0x1e3   :  { %7485 = vst [vmem:[#allocation58_spill] sm:$0xff] %v5158_v6  ;;  %7486 = vst [vmem:[#allocation59_spill] sm:$0xff] %v5160_v45  ;;  %v1093_v48 = vmax.f32 %v5148_v29, %v5158_v6 }
 0x1e5   :  { %1091 = vmax.xlane.f32.xlu1 %v1090_v46  ;;  %1094 = vmax.xlane.f32.xlu0 %v1093_v48  ;;  %v5166_v41 = vpop.f32.mrb[30].mxu1  ;;  %v5168_v40 = vpop.f32.mrb[62].mxu0  ;;  %v7489_v46 = vmax.f32 %v4944_v57, %v4946_v58  ;;  %v7490_v48 = vmax.f32 %v4952_v61, %v4956_v63 }
 0x1e6   :  { %7487 = vst [vmem:[#allocation60_spill] sm:$0xff] %v5166_v41  ;;  %v5170_v55 = vpop.f32.mrb[31].mxu1  ;;  %v5172_v42 = vpop.f32.mrb[63].mxu0 }
 0x1e7   :  { %7488 = vst [vmem:[#allocation61_spill] sm:$0xff] %v5170_v55  ;;  %v1096_v52 = vmax.f32 %v5166_v41, %v5170_v55 }
 0x1e9   :  { %v5178_v6 = vpop.f32.mrb[32].mxu1  ;;  %1001 = vmax.xlane.f32.xlu1 %v7489_v46  ;;  %1004 = vmax.xlane.f32.xlu0 %v7490_v48  ;;  %v7494_v46 = vmax.f32 %v4964_v5, %v4968_v8  ;;  %v7495_v48 = vmax.f32 %v4976_v14, %v4980_v1 }
 0x1ea   :  { %v5186_v49 = vpop.f32.mrb[33].mxu1 }
 0x1eb   :  { %7491 = vst [vmem:[#allocation62_spill] sm:$0xff] %v5186_v49  ;;  %v1099_v29 = vmax.f32 %v5178_v6, %v5186_v49 }
 0x1ed   :  { %1097 = vmax.xlane.f32.xlu1 %v1096_v52  ;;  %1100 = vmax.xlane.f32.xlu0 %v1099_v29  ;;  %v5190_v54 = vpop.f32.mrb[34].mxu1 }
 0x1ee   :  { %7492 = vst [vmem:[#allocation63_spill] sm:$0xff] %v5190_v54  ;;  %v5192_v55 = vpop.f32.mrb[35].mxu1 }
 0x1ef   :  { %7493 = vst [vmem:[#allocation64_spill] sm:$0xff] %v5192_v55  ;;  %v1102_v41 = vmax.f32 %v5190_v54, %v5192_v55 }
 0x1f1   :  { %v5196_v58 = vpop.f32.mrb[36].mxu1  ;;  %1007 = vmax.xlane.f32.xlu1 %v7494_v46  ;;  %1010 = vmax.xlane.f32.xlu0 %v7495_v48  ;;  %v7499_v46 = vmax.f32 %v4988_v59, %v4992_v17  ;;  %v7500_v48 = vmax.f32 %v5006_v0, %v5010_v3 }
 0x1f2   :  { %v5204_v49 = vpop.f32.mrb[37].mxu1 }
 0x1f3   :  { %7496 = vst [vmem:[#allocation65_spill] sm:$0xff] %v5204_v49  ;;  %v1105_v29 = vmax.f32 %v5196_v58, %v5204_v49 }
 0x1f5   :  { %1103 = vmax.xlane.f32.xlu1 %v1102_v41  ;;  %1106 = vmax.xlane.f32.xlu0 %v1105_v29  ;;  %v5208_v52 = vpop.f32.mrb[38].mxu1 }
 0x1f6   :  { %7497 = vst [vmem:[#allocation66_spill] sm:$0xff] %v5208_v52  ;;  %v5210_v55 = vpop.f32.mrb[39].mxu1 }
 0x1f7   :  { %7498 = vst [vmem:[#allocation67_spill] sm:$0xff] %v5210_v55  ;;  %v1108_v54 = vmax.f32 %v5208_v52, %v5210_v55 }
 0x1f9   :  { %v5214_v8 = vpop.f32.mrb[40].mxu1  ;;  %1013 = vmax.xlane.f32.xlu1 %v7499_v46  ;;  %1016 = vmax.xlane.f32.xlu0 %v7500_v48  ;;  %v7504_v46 = vmax.f32 %v5018_v23, %v5022_v26  ;;  %v7505_v48 = vmax.f32 %v5036_v44, %v5040_v2 }
 0x1fa   :  { %v5222_v49 = vpop.f32.mrb[41].mxu1 }
 0x1fb   :  { %7501 = vst [vmem:[#allocation68_spill] sm:$0xff] %v5222_v49  ;;  %v1111_v41 = vmax.f32 %v5214_v8, %v5222_v49 }
 0x1fd   :  { %1109 = vmax.xlane.f32.xlu1 %v1108_v54  ;;  %1112 = vmax.xlane.f32.xlu0 %v1111_v41  ;;  %v5226_v29 = vpop.f32.mrb[42].mxu1 }
 0x1fe   :  { %7502 = vst [vmem:[#allocation69_spill] sm:$0xff] %v5226_v29  ;;  %v5228_v55 = vpop.f32.mrb[43].mxu1 }
 0x1ff   :  { %7503 = vst [vmem:[#allocation70_spill] sm:$0xff] %v5228_v55  ;;  %v1114_v52 = vmax.f32 %v5226_v29, %v5228_v55 }
 0x201   :  { %v5232_v17 = vpop.f32.mrb[44].mxu1  ;;  %1019 = vmax.xlane.f32.xlu1 %v7504_v46  ;;  %1022 = vmax.xlane.f32.xlu0 %v7505_v48  ;;  %v7510_v46 = vmax.f32 %v5048_v50, %v5052_v53  ;;  %v7511_v48 = vmax.f32 %v5066_v38, %v5070_v27 }
 0x202   :  { %v5240_v49 = vpop.f32.mrb[45].mxu1 }
 0x203   :  { %7506 = vst [vmem:[#allocation71_spill] sm:$0xff] %v5240_v49  ;;  %v1117_v54 = vmax.f32 %v5232_v17, %v5240_v49 }
 0x205   :  { %1115 = vmax.xlane.f32.xlu1 %v1114_v52  ;;  %1118 = vmax.xlane.f32.xlu0 %v1117_v54  ;;  %v5244_v41 = vpop.f32.mrb[46].mxu1 }
 0x206   :  { %7507 = vst [vmem:[#allocation72_spill] sm:$0xff] %v5244_v41  ;;  %v5246_v55 = vpop.f32.mrb[47].mxu1 }
 0x207   :  { %7508 = vst [vmem:[#allocation73_spill] sm:$0xff] %v5246_v55  ;;  %v1120_v29 = vmax.f32 %v5244_v41, %v5246_v55  ;;  %v957_v55 = vpop.xlane.xlu0 %956 }
 0x209   :  { %v5250_v26 = vpop.f32.mrb[48].mxu1  ;;  %1025 = vmax.xlane.f32.xlu1 %v7510_v46  ;;  %1028 = vmax.xlane.f32.xlu0 %v7511_v48  ;;  %v1147_v46 = vsub.f32 %v4854_v12, %v957_v55  ;;  %v7515_v48 = vmax.f32 %v5078_v32, %v5082_v35 }
 0x20a   :  { %7509 = vst [vmem:[#allocation74_spill] sm:$0xff] %v5250_v26  ;;  %v5258_v49 = vpop.f32.mrb[49].mxu1 }
 0x20b   :  { %7512 = vst [vmem:[#allocation75_spill] sm:$0xff] %v5258_v49  ;;  %v1123_v52 = vmax.f32 %v5250_v26, %v5258_v49 }
 0x20d   :  { %1121 = vmax.xlane.f32.xlu1 %v1120_v29  ;;  %1124 = vmax.xlane.f32.xlu0 %v1123_v52  ;;  %v5262_v54 = vpop.f32.mrb[50].mxu1  ;;  %v7516_v29 = vmax.f32 %v5096_v31, %v5100_v33  ;;  %v1148_v52 = vsub.f32 %v4856_v13, %v957_v55  ;;  %v7518_v13 = vmax.f32 %v5108_v28, %v5112_v30 }
 0x20e   :  { %7513 = vst [vmem:[#allocation76_spill] sm:$0xff] %v5262_v54  ;;  %v5264_v41 = vpop.f32.mrb[51].mxu1  ;;  %v7519_v55 = vmax.f32 %v5126_v37, %v5130_v39 }
 0x20f   :  { %7514 = vst [vmem:[#allocation77_spill] sm:$0xff] %v5264_v41  ;;  %v1126_v53 = vmax.f32 %v5262_v54, %v5264_v41  ;;  %v1275_v41 = vmul.f32 1.442695, %v1147_v46  ;;  %v1277_v54 = vmul.f32 1.442695, %v1148_v52 }
 0x211   :  { %v5269_v50 = vpop.f32.mrb[52].mxu1  ;;  %1031 = vmax.xlane.f32.xlu1 %v7515_v48  ;;  %1034 = vmax.xlane.f32.xlu0 %v7516_v29  ;;  %3838 = vpow2.f32 %v1275_v41 }
 0x212   :  { %v5278_v49 = vpop.f32.mrb[53].mxu1  ;;  %3840 = vpow2.f32 %v1277_v54  ;;  %v7525_v54 = vmax.f32 %v5156_v43, %v5160_v45  ;;  %v7531_v45 = vmax.f32 %v5168_v40, %v5172_v42 }
 0x213   :  { %v1129_v26 = vmax.f32 %v5269_v50, %v5278_v49 }
 0x215   :  { %1127 = vmax.xlane.f32.xlu1 %v1126_v53  ;;  %1130 = vmax.xlane.f32.xlu0 %v1129_v26  ;;  %v5282_v12 = vpop.f32.mrb[54].mxu1 }
 0x216   :  { %v5284_v27 = vpop.f32.mrb[55].mxu1 }
 0x217   :  { %v1132_v48 = vmax.f32 %v5282_v12, %v5284_v27 }
 0x219   :  { %v5288_v29 = vpop.f32.mrb[56].mxu1  ;;  %1037 = vmax.xlane.f32.xlu1 %v7518_v13  ;;  %1040 = vmax.xlane.f32.xlu0 %v7519_v55  ;;  %v7524_v55 = vmax.f32 %v5138_v34, %v5142_v36 }
 0x21a   :  { %7517 = vst [vmem:[#allocation78_spill] sm:$0xff] %v5288_v29  ;;  %v5296_v26 = vpop.f32.mrb[57].mxu1 }
 0x21b   :  { %7520 = vst [vmem:[#allocation79_spill] sm:$0xff] %v5296_v26  ;;  %v1135_v53 = vmax.f32 %v5288_v29, %v5296_v26 }
 0x21d   :  { %1133 = vmax.xlane.f32.xlu1 %v1132_v48  ;;  %1136 = vmax.xlane.f32.xlu0 %v1135_v53  ;;  %v5300_v46 = vpop.f32.mrb[58].mxu1  ;;  %v5316_v48 = vpop.eup %3838 }
 0x21e   :  { %7521 = vst [vmem:[#allocation80_spill] sm:$0xff] %v5300_v46  ;;  %v5302_v41 = vpop.f32.mrb[59].mxu1  ;;  %7527 = vst [vmem:[#allocation84_spill] sm:$0xff] %v5316_v48  ;;  %v5320_v29 = vpop.eup %3840 }
 0x21f   :  { %7522 = vst [vmem:[#allocation81_spill] sm:$0xff] %v5302_v41  ;;  %v1138_v52 = vmax.f32 %v5300_v46, %v5302_v41  ;;  %7528 = vst [vmem:[#allocation85_spill] sm:$0xff] %v5320_v29 }
 0x221   :  { %v5306_v13 = vpop.f32.mrb[60].mxu1  ;;  %1043 = vmax.xlane.f32.xlu1 %v7524_v55  ;;  %1046 = vmax.xlane.f32.xlu0 %v7525_v54  ;;  %v1531_v54 = vadd.f32 %v5320_v29, %v5316_v48 }
 0x222   :  { %7523 = vst [vmem:[#allocation82_spill] sm:$0xff] %v5306_v13  ;;  %v5314_v26 = vpop.f32.mrb[61].mxu1 }
 0x223   :  { %7526 = vst [vmem:[#allocation83_spill] sm:$0xff] %v5314_v26  ;;  %v1141_v53 = vmax.f32 %v5306_v13, %v5314_v26  ;;  %v963_v26 = vpop.xlane.xlu0 %962 }
 0x225   :  { %1139 = vmax.xlane.f32.xlu1 %v1138_v52  ;;  %1142 = vmax.xlane.f32.xlu0 %v1141_v53  ;;  %v5322_v41 = vpop.f32.mrb[62].mxu1  ;;  %v1151_v52 = vsub.f32 %v4866_v18, %v963_v26  ;;  %v1152_v53 = vsub.f32 %v4868_v19, %v963_v26 }
 0x226   :  { %7529 = vst [vmem:[#allocation86_spill] sm:$0xff] %v5322_v41  ;;  %v5324_v46 = vpop.f32.mrb[63].mxu1 }
 0x227   :  { %7530 = vst [vmem:[#allocation87_spill] sm:$0xff] %v5324_v46  ;;  %v1144_v55 = vmax.f32 %v5322_v41, %v5324_v46  ;;  %v1283_v46 = vmul.f32 1.442695, %v1151_v52  ;;  %v1285_v29 = vmul.f32 1.442695, %v1152_v53 }
 0x229   :  { %1532 = vadd.xlane.f32.xlu0 %v1531_v54  ;;  %1049 = vmax.xlane.f32.xlu1 %v7531_v45 }
 0x22d   :  { %1145 = vmax.xlane.f32.xlu1 %v1144_v55 }
 0x23a   :  { %v1053_v13 = vpop.xlane.xlu1 %1052 }
 0x23b   :  { %v1211_v43 = vsub.f32 %v4950_v60, %v1053_v13  ;;  %v1212_v36 = vsub.f32 %v4954_v62, %v1053_v13 }
 0x23d   :  { %v1403_v41 = vmul.f32 1.442695, %v1211_v43  ;;  %v1405_v34 = vmul.f32 1.442695, %v1212_v36 }
 0x23e   :  { %v960_v54 = vpop.xlane.xlu1 %959 }
 0x23f   :  { %3842 = vpow2.f32 %v1403_v41  ;;  %v1149_v48 = vsub.f32 %v4860_v15, %v960_v54  ;;  %v1150_v45 = vsub.f32 %v4862_v16, %v960_v54 }
 0x240   :  { %3844 = vpow2.f32 %v1405_v34 }
 0x241   :  { %3846 = vpow2.f32 %v1283_v46  ;;  %v1279_v18 = vmul.f32 1.442695, %v1149_v48  ;;  %v1281_v55 = vmul.f32 1.442695, %v1150_v45 }
 0x242   :  { %3848 = vpow2.f32 %v1285_v29  ;;  %v1056_v19 = vpop.xlane.xlu1 %1055  ;;  %v1059_v26 = vpop.xlane.xlu0 %1058 }
 0x243   :  { %3850 = vpow2.f32 %v1279_v18  ;;  %v1213_v60 = vsub.f32 %v4962_v4, %v1056_v19  ;;  %v1214_v43 = vsub.f32 %v4966_v7, %v1056_v19  ;;  %v1215_v62 = vsub.f32 %v4974_v11, %v1059_v26 }
 0x244   :  { %3852 = vpow2.f32 %v1281_v55  ;;  %v1216_v36 = vsub.f32 %v4978_v20, %v1059_v26 }
 0x245   :  { %v1407_v15 = vmul.f32 1.442695, %v1213_v60  ;;  %v1409_v41 = vmul.f32 1.442695, %v1214_v43  ;;  %v1411_v16 = vmul.f32 1.442695, %v1215_v62 }
 0x246   :  { %v1413_v34 = vmul.f32 1.442695, %v1216_v36  ;;  %v966_v46 = vpop.xlane.xlu1 %965  ;;  %v969_v13 = vpop.xlane.xlu0 %968 }
 0x247   :  { %3854 = vpow2.f32 %v1407_v15  ;;  %v1153_v29 = vsub.f32 %v4872_v21, %v966_v46  ;;  %v1154_v48 = vsub.f32 %v4874_v22, %v966_v46  ;;  %v1155_v4 = vsub.f32 %v4878_v24, %v969_v13 }
 0x248   :  { %3856 = vpow2.f32 %v1409_v41  ;;  %v1156_v7 = vsub.f32 %v4880_v25, %v969_v13  ;;  %v7534_v13 = vld [vmem:[#allocation12_spill] sm:$0xff] }
 0x249   :  { %v5347_v11 = vpop.eup %3842  ;;  %3858 = vpow2.f32 %v1411_v16  ;;  %v1287_v20 = vmul.f32 1.442695, %v1153_v29  ;;  %v1289_v52 = vmul.f32 1.442695, %v1154_v48  ;;  %v1291_v53 = vmul.f32 1.442695, %v1155_v4 }
 0x24a   :  { %v5349_v54 = vpop.eup %3844  ;;  %3860 = vpow2.f32 %v1413_v34  ;;  %v1293_v45 = vmul.f32 1.442695, %v1156_v7  ;;  %v1062_v18 = vpop.xlane.xlu1 %1061  ;;  %v7532_v16 = vld [vmem:[#allocation10_spill] sm:$0xff]  ;;  %v7535_v48 = vld [vmem:[#allocation13_spill] sm:$0xff] }
 0x24b   :  { %v1065_v55 = vpop.xlane.xlu0 %1064  ;;  %v5351_v21 = vpop.eup %3846  ;;  %3862 = vpow2.f32 %v1287_v20  ;;  %v1217_v22 = vsub.f32 %v4986_v9, %v1062_v18  ;;  %v1218_v24 = vsub.f32 %v4990_v56, %v1062_v18  ;;  %v1627_v60 = vadd.f32 %v5349_v54, %v5347_v11 }
 0x24c   :  { %v1219_v25 = vsub.f32 %v4998_v47, %v1065_v55  ;;  %v5356_v19 = vpop.eup %3848  ;;  %3864 = vpow2.f32 %v1289_v52  ;;  %v1220_v26 = vsub.f32 %v5008_v10, %v1065_v55  ;;  %v7533_v10 = vld [vmem:[#allocation11_spill] sm:$0xff] }
 0x24d   :  { %v5361_v43 = vpop.eup %3850  ;;  %3866 = vpow2.f32 %v1291_v53  ;;  %v1415_v62 = vmul.f32 1.442695, %v1217_v22  ;;  %v1417_v36 = vmul.f32 1.442695, %v1218_v24  ;;  %1628 = vadd.xlane.f32.xlu0 %v1627_v60  ;;  %v1537_v7 = vadd.f32 %v5356_v19, %v5351_v21  ;;  %v7536_v60 = vld [vmem:[#allocation32_spill] sm:$0xff] }
 0x24e   :  { %v1419_v15 = vmul.f32 1.442695, %v1219_v25  ;;  %v5363_v41 = vpop.eup %3852  ;;  %3868 = vpow2.f32 %v1293_v45  ;;  %v1421_v56 = vmul.f32 1.442695, %v1220_v26  ;;  %v972_v47 = vpop.xlane.xlu1 %971 }
 0x24f   :  { %v975_v9 = vpop.xlane.xlu0 %974  ;;  %3870 = vpow2.f32 %v1415_v62  ;;  %v1157_v34 = vsub.f32 %v7532_v16, %v972_v47  ;;  %v1158_v46 = vsub.f32 %v7533_v10, %v972_v47  ;;  %v1534_v20 = vadd.f32 %v5363_v41, %v5361_v43 }
 0x250   :  { %v1159_v29 = vsub.f32 %v7534_v13, %v975_v9  ;;  %3872 = vpow2.f32 %v1417_v36  ;;  %v1160_v4 = vsub.f32 %v7535_v48, %v975_v9  ;;  %v7537_v36 = vld [vmem:[#allocation33_spill] sm:$0xff]  ;;  %v7538_v9 = vld [vmem:[#allocation35_spill] sm:$0xff] }
 0x251   :  { %v5373_v52 = vpop.eup %3854  ;;  %3874 = vpow2.f32 %v1419_v15  ;;  %v1295_v53 = vmul.f32 1.442695, %v1157_v34  ;;  %v1297_v45 = vmul.f32 1.442695, %v1158_v46  ;;  %1538 = vadd.xlane.f32.xlu0 %v1537_v7  ;;  %1535 = vadd.xlane.f32.xlu1 %v1534_v20  ;;  %v7540_v34 = vld [vmem:[#allocation36_spill] sm:$0xff] }
 0x252   :  { %v1299_v18 = vmul.f32 1.442695, %v1159_v29  ;;  %v5375_v55 = vpop.eup %3856  ;;  %3876 = vpow2.f32 %v1421_v56  ;;  %v1301_v22 = vmul.f32 1.442695, %v1160_v4  ;;  %v1068_v24 = vpop.xlane.xlu1 %1067 }
 0x253   :  { %v1071_v25 = vpop.xlane.xlu0 %1070  ;;  %v5377_v26 = vpop.eup %3858  ;;  %3878 = vpow2.f32 %v1295_v53  ;;  %v1221_v62 = vsub.f32 %v7536_v60, %v1068_v24  ;;  %v1222_v47 = vsub.f32 %v7537_v36, %v1068_v24  ;;  %v1630_v56 = vadd.f32 %v5375_v55, %v5373_v52  ;;  %v7545_v36 = vld [vmem:[#allocation15_spill] sm:$0xff] }
 0x254   :  { %v1223_v15 = vsub.f32 %v7538_v9, %v1071_v25  ;;  %v5382_v16 = vpop.eup %3860  ;;  %3880 = vpow2.f32 %v1297_v45  ;;  %v1224_v10 = vsub.f32 %v7540_v34, %v1071_v25  ;;  %v7544_v25 = vld [vmem:[#allocation14_spill] sm:$0xff] }
 0x255   :  { %7539 = vst [vmem:[#allocation10_spill] sm:$0xff] %v5382_v16  ;;  %v5387_v46 = vpop.eup %3862  ;;  %3882 = vpow2.f32 %v1299_v18  ;;  %v1423_v13 = vmul.f32 1.442695, %v1221_v62  ;;  %v1425_v29 = vmul.f32 1.442695, %v1222_v47  ;;  %v1633_v20 = vadd.f32 %v5382_v16, %v5377_v26  ;;  %1631 = vadd.xlane.f32.xlu1 %v1630_v56  ;;  %v7546_v62 = vld [vmem:[#allocation16_spill] sm:$0xff] }
 0x256   :  { %7541 = vst [vmem:[#allocation11_spill] sm:$0xff] %v5387_v46  ;;  %v1427_v48 = vmul.f32 1.442695, %v1223_v15  ;;  %v5389_v4 = vpop.eup %3864  ;;  %3884 = vpow2.f32 %v1301_v22  ;;  %v1429_v7 = vmul.f32 1.442695, %v1224_v10  ;;  %v978_v53 = vpop.xlane.xlu1 %977  ;;  %v7548_v22 = vld [vmem:[#allocation17_spill] sm:$0xff] }
 0x257   :  { %7542 = vst [vmem:[#allocation12_spill] sm:$0xff] %v5389_v4  ;;  %v981_v45 = vpop.xlane.xlu0 %980  ;;  %v5393_v24 = vpop.eup %3866  ;;  %3886 = vpow2.f32 %v1423_v13  ;;  %v1161_v60 = vsub.f32 %v7544_v25, %v978_v53  ;;  %v1162_v18 = vsub.f32 %v7545_v36, %v978_v53  ;;  %1634 = vadd.xlane.f32.xlu0 %v1633_v20  ;;  %v1540_v34 = vadd.f32 %v5389_v4, %v5387_v46  ;;  %v7553_v4 = vld [vmem:[#allocation39_spill] sm:$0xff] }
 0x258   :  { %7543 = vst [vmem:[#allocation13_spill] sm:$0xff] %v5393_v24  ;;  %v1163_v47 = vsub.f32 %v7546_v62, %v981_v45  ;;  %v5398_v9 = vpop.eup %3868  ;;  %3888 = vpow2.f32 %v1425_v29  ;;  %v1164_v15 = vsub.f32 %v7548_v22, %v981_v45  ;;  %v7552_v62 = vld [vmem:[#allocation37_spill] sm:$0xff] }
 0x259   :  { %7547 = vst [vmem:[#allocation32_spill] sm:$0xff] %v5398_v9  ;;  %v5403_v10 = vpop.eup %3870  ;;  %3890 = vpow2.f32 %v1427_v48  ;;  %v1303_v56 = vmul.f32 1.442695, %v1161_v60  ;;  %v1305_v13 = vmul.f32 1.442695, %v1162_v18  ;;  %v1543_v36 = vadd.f32 %v5398_v9, %v5393_v24  ;;  %1541 = vadd.xlane.f32.xlu1 %v1540_v34  ;;  %v7554_v60 = vld [vmem:[#allocation41_spill] sm:$0xff] }
 0x25a   :  { %7549 = vst [vmem:[#allocation33_spill] sm:$0xff] %v5403_v10  ;;  %v1307_v16 = vmul.f32 1.442695, %v1163_v47  ;;  %v5405_v25 = vpop.eup %3872  ;;  %3892 = vpow2.f32 %v1429_v7  ;;  %v1309_v53 = vmul.f32 1.442695, %v1164_v15  ;;  %v1074_v29 = vpop.xlane.xlu1 %1073  ;;  %v7556_v7 = vld [vmem:[#allocation42_spill] sm:$0xff] }
 0x25b   :  { %7550 = vst [vmem:[#allocation35_spill] sm:$0xff] %v5405_v25  ;;  %v1077_v20 = vpop.xlane.xlu0 %1076  ;;  %v5409_v45 = vpop.eup %3874  ;;  %3894 = vpow2.f32 %v1303_v56  ;;  %v1225_v22 = vsub.f32 %v7552_v62, %v1074_v29  ;;  %v1226_v48 = vsub.f32 %v7553_v4, %v1074_v29  ;;  %1544 = vadd.xlane.f32.xlu0 %v1543_v36  ;;  %v1636_v34 = vadd.f32 %v5405_v25, %v5403_v10  ;;  %v7561_v25 = vld [vmem:[#allocation19_spill] sm:$0xff] }
 0x25c   :  { %7551 = vst [vmem:[#allocation36_spill] sm:$0xff] %v5409_v45  ;;  %v1227_v18 = vsub.f32 %v7554_v60, %v1077_v20  ;;  %v5414_v47 = vpop.eup %3876  ;;  %3896 = vpow2.f32 %v1305_v13  ;;  %v1228_v15 = vsub.f32 %v7556_v7, %v1077_v20  ;;  %v7560_v60 = vld [vmem:[#allocation18_spill] sm:$0xff] }
 0x25d   :  { %7555 = vst [vmem:[#allocation14_spill] sm:$0xff] %v5414_v47  ;;  %v5419_v9 = vpop.eup %3878  ;;  %3898 = vpow2.f32 %v1307_v16  ;;  %v1431_v24 = vmul.f32 1.442695, %v1225_v22  ;;  %v1433_v56 = vmul.f32 1.442695, %v1226_v48  ;;  %v1639_v29 = vadd.f32 %v5414_v47, %v5409_v45  ;;  %1637 = vadd.xlane.f32.xlu1 %v1636_v34  ;;  %v7562_v22 = vld [vmem:[#allocation20_spill] sm:$0xff] }
 0x25e   :  { %7557 = vst [vmem:[#allocation15_spill] sm:$0xff] %v5419_v9  ;;  %v1435_v46 = vmul.f32 1.442695, %v1227_v18  ;;  %v5421_v62 = vpop.eup %3880  ;;  %3900 = vpow2.f32 %v1309_v53  ;;  %v1437_v4 = vmul.f32 1.442695, %v1228_v15  ;;  %v984_v13 = vpop.xlane.xlu1 %983  ;;  %v7564_v53 = vld [vmem:[#allocation21_spill] sm:$0xff] }
 0x25f   :  { %7558 = vst [vmem:[#allocation16_spill] sm:$0xff] %v5421_v62  ;;  %v987_v36 = vpop.xlane.xlu0 %986  ;;  %v5425_v20 = vpop.eup %3882  ;;  %3902 = vpow2.f32 %v1431_v24  ;;  %v1165_v7 = vsub.f32 %v7560_v60, %v984_v13  ;;  %v1166_v16 = vsub.f32 %v7561_v25, %v984_v13  ;;  %1640 = vadd.xlane.f32.xlu0 %v1639_v29  ;;  %v1546_v34 = vadd.f32 %v5421_v62, %v5419_v9  ;;  %v7569_v62 = vld [vmem:[#allocation45_spill] sm:$0xff] }
 0x260   :  { %7559 = vst [vmem:[#allocation17_spill] sm:$0xff] %v5425_v20  ;;  %v1167_v48 = vsub.f32 %v7562_v22, %v987_v36  ;;  %v5430_v18 = vpop.eup %3884  ;;  %3904 = vpow2.f32 %v1433_v56  ;;  %v1168_v15 = vsub.f32 %v7564_v53, %v987_v36  ;;  %v7568_v22 = vld [vmem:[#allocation44_spill] sm:$0xff] }
 0x261   :  { %7563 = vst [vmem:[#allocation37_spill] sm:$0xff] %v5430_v18  ;;  %v5435_v47 = vpop.eup %3886  ;;  %3906 = vpow2.f32 %v1435_v46  ;;  %v1311_v45 = vmul.f32 1.442695, %v1165_v7  ;;  %v1313_v24 = vmul.f32 1.442695, %v1166_v16  ;;  %v1549_v13 = vadd.f32 %v5430_v18, %v5425_v20  ;;  %1547 = vadd.xlane.f32.xlu1 %v1546_v34  ;;  %v7570_v7 = vld [vmem:[#allocation46_spill] sm:$0xff] }
 0x262   :  { %7565 = vst [vmem:[#allocation39_spill] sm:$0xff] %v5435_v47  ;;  %v1315_v10 = vmul.f32 1.442695, %v1167_v48  ;;  %v5437_v60 = vpop.eup %3888  ;;  %3908 = vpow2.f32 %v1437_v4  ;;  %v1317_v25 = vmul.f32 1.442695, %v1168_v15  ;;  %v1080_v56 = vpop.xlane.xlu1 %1079  ;;  %v7572_v4 = vld [vmem:[#allocation47_spill] sm:$0xff] }
 0x263   :  { %7566 = vst [vmem:[#allocation41_spill] sm:$0xff] %v5437_v60  ;;  %v1083_v29 = vpop.xlane.xlu0 %1082  ;;  %v5441_v36 = vpop.eup %3890  ;;  %3910 = vpow2.f32 %v1311_v45  ;;  %v1229_v53 = vsub.f32 %v7568_v22, %v1080_v56  ;;  %v1230_v46 = vsub.f32 %v7569_v62, %v1080_v56  ;;  %1550 = vadd.xlane.f32.xlu0 %v1549_v13  ;;  %v1642_v34 = vadd.f32 %v5437_v60, %v5435_v47  ;;  %v7577_v60 = vld [vmem:[#allocation23_spill] sm:$0xff] }
 0x264   :  { %7567 = vst [vmem:[#allocation42_spill] sm:$0xff] %v5441_v36  ;;  %v1231_v16 = vsub.f32 %v7570_v7, %v1083_v29  ;;  %v5446_v48 = vpop.eup %3892  ;;  %3912 = vpow2.f32 %v1313_v24  ;;  %v1232_v15 = vsub.f32 %v7572_v4, %v1083_v29  ;;  %v7576_v7 = vld [vmem:[#allocation22_spill] sm:$0xff] }
 0x265   :  { %7571 = vst [vmem:[#allocation18_spill] sm:$0xff] %v5446_v48  ;;  %v5451_v18 = vpop.eup %3894  ;;  %3914 = vpow2.f32 %v1315_v10  ;;  %v1439_v20 = vmul.f32 1.442695, %v1229_v53  ;;  %v1441_v45 = vmul.f32 1.442695, %v1230_v46  ;;  %v1645_v56 = vadd.f32 %v5446_v48, %v5441_v36  ;;  %1643 = vadd.xlane.f32.xlu1 %v1642_v34  ;;  %v7578_v53 = vld [vmem:[#allocation24_spill] sm:$0xff] }
 0x266   :  { %7573 = vst [vmem:[#allocation19_spill] sm:$0xff] %v5451_v18  ;;  %v1443_v9 = vmul.f32 1.442695, %v1231_v16  ;;  %v5453_v22 = vpop.eup %3896  ;;  %3916 = vpow2.f32 %v1317_v25  ;;  %v1445_v62 = vmul.f32 1.442695, %v1232_v15  ;;  %v990_v24 = vpop.xlane.xlu1 %989  ;;  %v7580_v25 = vld [vmem:[#allocation25_spill] sm:$0xff] }
 0x267   :  { %7574 = vst [vmem:[#allocation20_spill] sm:$0xff] %v5453_v22  ;;  %v993_v13 = vpop.xlane.xlu0 %992  ;;  %v5457_v29 = vpop.eup %3898  ;;  %3918 = vpow2.f32 %v1439_v20  ;;  %v1169_v4 = vsub.f32 %v7576_v7, %v990_v24  ;;  %v1170_v10 = vsub.f32 %v7577_v60, %v990_v24  ;;  %1646 = vadd.xlane.f32.xlu0 %v1645_v56  ;;  %v1552_v34 = vadd.f32 %v5453_v22, %v5451_v18  ;;  %v7584_v22 = vld [vmem:[#allocation49_spill] sm:$0xff] }
 0x268   :  { %7575 = vst [vmem:[#allocation21_spill] sm:$0xff] %v5457_v29  ;;  %v1171_v46 = vsub.f32 %v7578_v53, %v993_v13  ;;  %v5462_v16 = vpop.eup %3900  ;;  %3920 = vpow2.f32 %v1441_v45  ;;  %v1172_v15 = vsub.f32 %v7580_v25, %v993_v13  ;;  %v7583_v53 = vld [vmem:[#allocation48_spill] sm:$0xff] }
 0x269   :  { %7579 = vst [vmem:[#allocation44_spill] sm:$0xff] %v5462_v16  ;;  %v5467_v48 = vpop.eup %3902  ;;  %3922 = vpow2.f32 %v1443_v9  ;;  %v1319_v36 = vmul.f32 1.442695, %v1169_v4  ;;  %v1321_v20 = vmul.f32 1.442695, %v1170_v10  ;;  %v1555_v24 = vadd.f32 %v5462_v16, %v5457_v29  ;;  %1553 = vadd.xlane.f32.xlu1 %v1552_v34  ;;  %v7585_v4 = vld [vmem:[#allocation50_spill] sm:$0xff] }
 0x26a   :  { %v1323_v47 = vmul.f32 1.442695, %v1171_v46  ;;  %v5469_v7 = vpop.eup %3904  ;;  %3924 = vpow2.f32 %v1445_v62  ;;  %v1325_v60 = vmul.f32 1.442695, %v1172_v15  ;;  %v1086_v45 = vpop.xlane.xlu1 %1085  ;;  %v7587_v62 = vld [vmem:[#allocation51_spill] sm:$0xff] }
 0x26b   :  { %7581 = vst [vmem:[#allocation45_spill] sm:$0xff] %v5469_v7  ;;  %v1089_v56 = vpop.xlane.xlu0 %1088  ;;  %v5473_v13 = vpop.eup %3906  ;;  %3926 = vpow2.f32 %v1319_v36  ;;  %v1233_v25 = vsub.f32 %v7583_v53, %v1086_v45  ;;  %v1234_v9 = vsub.f32 %v7584_v22, %v1086_v45  ;;  %1556 = vadd.xlane.f32.xlu0 %v1555_v24  ;;  %v1648_v34 = vadd.f32 %v5469_v7, %v5467_v48 }
 0x26c   :  { %7582 = vst [vmem:[#allocation46_spill] sm:$0xff] %v5473_v13  ;;  %v1235_v10 = vsub.f32 %v7585_v4, %v1089_v56  ;;  %v5478_v46 = vpop.eup %3908  ;;  %3928 = vpow2.f32 %v1321_v20  ;;  %v1236_v15 = vsub.f32 %v7587_v62, %v1089_v56  ;;  %v7591_v62 = vld [vmem:[#allocation26_spill] sm:$0xff] }
 0x26d   :  { %7586 = vst [vmem:[#allocation47_spill] sm:$0xff] %v5478_v46  ;;  %v5483_v16 = vpop.eup %3910  ;;  %3930 = vpow2.f32 %v1323_v47  ;;  %v1447_v29 = vmul.f32 1.442695, %v1233_v25  ;;  %v1449_v36 = vmul.f32 1.442695, %v1234_v9  ;;  %v1651_v45 = vadd.f32 %v5478_v46, %v5473_v13  ;;  %1649 = vadd.xlane.f32.xlu1 %v1648_v34  ;;  %v7592_v25 = vld [vmem:[#allocation27_spill] sm:$0xff] }
 0x26e   :  { %7588 = vst [vmem:[#allocation22_spill] sm:$0xff] %v5483_v16  ;;  %v1451_v18 = vmul.f32 1.442695, %v1235_v10  ;;  %v5485_v53 = vpop.eup %3912  ;;  %3932 = vpow2.f32 %v1325_v60  ;;  %v1453_v22 = vmul.f32 1.442695, %v1236_v15  ;;  %v996_v20 = vpop.xlane.xlu1 %995  ;;  %v7594_v60 = vld [vmem:[#allocation28_spill] sm:$0xff] }
 0x26f   :  { %7589 = vst [vmem:[#allocation23_spill] sm:$0xff] %v5485_v53  ;;  %v999_v24 = vpop.xlane.xlu0 %998  ;;  %v5489_v56 = vpop.eup %3914  ;;  %3934 = vpow2.f32 %v1447_v29  ;;  %v1173_v4 = vsub.f32 %v4932_v51, %v996_v20  ;;  %v1174_v47 = vsub.f32 %v7591_v62, %v996_v20  ;;  %1652 = vadd.xlane.f32.xlu0 %v1651_v45  ;;  %v1558_v34 = vadd.f32 %v5485_v53, %v5483_v16  ;;  %v7596_v53 = vld [vmem:[#allocation54_spill] sm:$0xff] }
 0x270   :  { %7590 = vst [vmem:[#allocation24_spill] sm:$0xff] %v5489_v56  ;;  %v1175_v9 = vsub.f32 %v7592_v25, %v999_v24  ;;  %v5494_v10 = vpop.eup %3916  ;;  %3936 = vpow2.f32 %v1449_v36  ;;  %v1176_v15 = vsub.f32 %v7594_v60, %v999_v24  ;;  %v7595_v25 = vld [vmem:[#allocation52_spill] sm:$0xff] }
 0x271   :  { %7593 = vst [vmem:[#allocation25_spill] sm:$0xff] %v5494_v10  ;;  %v5499_v46 = vpop.eup %3918  ;;  %3938 = vpow2.f32 %v1451_v18  ;;  %v1327_v13 = vmul.f32 1.442695, %v1173_v4  ;;  %v1329_v29 = vmul.f32 1.442695, %v1174_v47  ;;  %v1561_v62 = vadd.f32 %v5494_v10, %v5489_v56  ;;  %1559 = vadd.xlane.f32.xlu1 %v1558_v34  ;;  %v7597_v4 = vld [vmem:[#allocation56_spill] sm:$0xff] }
 0x272   :  { %v1331_v7 = vmul.f32 1.442695, %v1175_v9  ;;  %v5501_v51 = vpop.eup %3920  ;;  %3940 = vpow2.f32 %v1453_v22  ;;  %v1333_v20 = vmul.f32 1.442695, %v1176_v15  ;;  %v1092_v36 = vpop.xlane.xlu1 %1091  ;;  %v7599_v22 = vld [vmem:[#allocation58_spill] sm:$0xff] }
 0x273   :  { %v1095_v45 = vpop.xlane.xlu0 %1094  ;;  %v5505_v24 = vpop.eup %3922  ;;  %3942 = vpow2.f32 %v1327_v13  ;;  %v1237_v60 = vsub.f32 %v7595_v25, %v1092_v36  ;;  %v1238_v18 = vsub.f32 %v7596_v53, %v1092_v36  ;;  %1562 = vadd.xlane.f32.xlu0 %v1561_v62  ;;  %v1654_v34 = vadd.f32 %v5501_v51, %v5499_v46 }
 0x274   :  { %v1239_v47 = vsub.f32 %v7597_v4, %v1095_v45  ;;  %v5510_v9 = vpop.eup %3924  ;;  %3944 = vpow2.f32 %v1329_v29  ;;  %v1240_v15 = vsub.f32 %v7599_v22, %v1095_v45  ;;  %v7602_v22 = vld [vmem:[#allocation29_spill] sm:$0xff] }
 0x275   :  { %7598 = vst [vmem:[#allocation48_spill] sm:$0xff] %v5510_v9  ;;  %v5515_v10 = vpop.eup %3926  ;;  %3946 = vpow2.f32 %v1331_v7  ;;  %v1455_v56 = vmul.f32 1.442695, %v1237_v60  ;;  %v1457_v13 = vmul.f32 1.442695, %v1238_v18  ;;  %v1657_v36 = vadd.f32 %v5510_v9, %v5505_v24  ;;  %1655 = vadd.xlane.f32.xlu1 %v1654_v34 }
 0x276   :  { %v1459_v16 = vmul.f32 1.442695, %v1239_v47  ;;  %v5517_v25 = vpop.eup %3928  ;;  %3948 = vpow2.f32 %v1333_v20  ;;  %v1461_v53 = vmul.f32 1.442695, %v1240_v15  ;;  %v1002_v29 = vpop.xlane.xlu1 %1001 }
 0x277   :  { %7600 = vst [vmem:[#allocation49_spill] sm:$0xff] %v5517_v25  ;;  %v1005_v62 = vpop.xlane.xlu0 %1004  ;;  %v5521_v45 = vpop.eup %3930  ;;  %3950 = vpow2.f32 %v1455_v56  ;;  %v1177_v4 = vsub.f32 %v4944_v57, %v1002_v29  ;;  %v1178_v7 = vsub.f32 %v7602_v22, %v1002_v29  ;;  %1658 = vadd.xlane.f32.xlu0 %v1657_v36  ;;  %v1564_v47 = vadd.f32 %v5517_v25, %v5515_v10  ;;  %v7605_v25 = vld [vmem:[#allocation61_spill] sm:$0xff] }
 0x278   :  { %7601 = vst [vmem:[#allocation50_spill] sm:$0xff] %v5521_v45  ;;  %v1179_v60 = vsub.f32 %v4952_v61, %v1005_v62  ;;  %v5526_v18 = vpop.eup %3932  ;;  %3952 = vpow2.f32 %v1457_v13  ;;  %v1180_v20 = vsub.f32 %v4956_v63, %v1005_v62  ;;  %v7604_v62 = vld [vmem:[#allocation60_spill] sm:$0xff] }
 0x279   :  { %7603 = vst [vmem:[#allocation51_spill] sm:$0xff] %v5526_v18  ;;  %v5531_v15 = vpop.eup %3934  ;;  %3954 = vpow2.f32 %v1459_v16  ;;  %v1335_v34 = vmul.f32 1.442695, %v1177_v4  ;;  %v1337_v56 = vmul.f32 1.442695, %v1178_v7  ;;  %v1567_v61 = vadd.f32 %v5526_v18, %v5521_v45  ;;  %1565 = vadd.xlane.f32.xlu1 %v1564_v47 }
 0x27a   :  { %v1339_v9 = vmul.f32 1.442695, %v1179_v60  ;;  %v5533_v57 = vpop.eup %3936  ;;  %3956 = vpow2.f32 %v1461_v53  ;;  %v1341_v29 = vmul.f32 1.442695, %v1180_v20  ;;  %v1098_v13 = vpop.xlane.xlu1 %1097  ;;  %v7607_v53 = vld [vmem:[#allocation62_spill] sm:$0xff] }
 0x27b   :  { %v1101_v36 = vpop.xlane.xlu0 %1100  ;;  %v5537_v63 = vpop.eup %3938  ;;  %3958 = vpow2.f32 %v1335_v34  ;;  %v1241_v22 = vsub.f32 %v7604_v62, %v1098_v13  ;;  %v1242_v16 = vsub.f32 %v7605_v25, %v1098_v13  ;;  %1568 = vadd.xlane.f32.xlu0 %v1567_v61  ;;  %v1660_v20 = vadd.f32 %v5533_v57, %v5531_v15 }
 0x27c   :  { %v1243_v4 = vsub.f32 %v5178_v6, %v1101_v36  ;;  %v5542_v7 = vpop.eup %3940  ;;  %3960 = vpow2.f32 %v1337_v56  ;;  %v1244_v60 = vsub.f32 %v7607_v53, %v1101_v36  ;;  %v7610_v53 = vld [vmem:[#allocation30_spill] sm:$0xff] }
 0x27d   :  { %7606 = vst [vmem:[#allocation26_spill] sm:$0xff] %v5542_v7  ;;  %v5547_v47 = vpop.eup %3942  ;;  %3962 = vpow2.f32 %v1339_v9  ;;  %v1463_v18 = vmul.f32 1.442695, %v1241_v22  ;;  %v1465_v34 = vmul.f32 1.442695, %v1242_v16  ;;  %v1663_v6 = vadd.f32 %v5542_v7, %v5537_v63  ;;  %1661 = vadd.xlane.f32.xlu1 %v1660_v20 }
 0x27e   :  { %v1467_v45 = vmul.f32 1.442695, %v1243_v4  ;;  %v5549_v62 = vpop.eup %3944  ;;  %3964 = vpow2.f32 %v1341_v29  ;;  %v1469_v25 = vmul.f32 1.442695, %v1244_v60  ;;  %v1008_v56 = vpop.xlane.xlu1 %1007 }
 0x27f   :  { %7608 = vst [vmem:[#allocation27_spill] sm:$0xff] %v5549_v62  ;;  %v1011_v61 = vpop.xlane.xlu0 %1010  ;;  %v5553_v13 = vpop.eup %3946  ;;  %3966 = vpow2.f32 %v1463_v18  ;;  %v1181_v36 = vsub.f32 %v4964_v5, %v1008_v56  ;;  %v1182_v9 = vsub.f32 %v7610_v53, %v1008_v56  ;;  %1664 = vadd.xlane.f32.xlu0 %v1663_v6  ;;  %v1570_v4 = vadd.f32 %v5549_v62, %v5547_v47  ;;  %v7613_v62 = vld [vmem:[#allocation64_spill] sm:$0xff] }
 0x280   :  { %7609 = vst [vmem:[#allocation28_spill] sm:$0xff] %v5553_v13  ;;  %v1183_v22 = vsub.f32 %v4976_v14, %v1011_v61  ;;  %v5558_v16 = vpop.eup %3948  ;;  %3968 = vpow2.f32 %v1465_v34  ;;  %v1184_v29 = vsub.f32 %v4980_v1, %v1011_v61  ;;  %v7612_v61 = vld [vmem:[#allocation63_spill] sm:$0xff] }
 0x281   :  { %7611 = vst [vmem:[#allocation52_spill] sm:$0xff] %v5558_v16  ;;  %v5563_v60 = vpop.eup %3950  ;;  %3970 = vpow2.f32 %v1467_v45  ;;  %v1343_v20 = vmul.f32 1.442695, %v1181_v36  ;;  %v1345_v18 = vmul.f32 1.442695, %v1182_v9  ;;  %v1573_v14 = vadd.f32 %v5558_v16, %v5553_v13  ;;  %1571 = vadd.xlane.f32.xlu1 %v1570_v4 }
 0x282   :  { %v1347_v7 = vmul.f32 1.442695, %v1183_v22  ;;  %v5565_v5 = vpop.eup %3952  ;;  %3972 = vpow2.f32 %v1469_v25  ;;  %v1349_v56 = vmul.f32 1.442695, %v1184_v29  ;;  %v1104_v34 = vpop.xlane.xlu1 %1103  ;;  %v7615_v25 = vld [vmem:[#allocation65_spill] sm:$0xff] }
 0x283   :  { %v1107_v6 = vpop.xlane.xlu0 %1106  ;;  %v5569_v1 = vpop.eup %3954  ;;  %3974 = vpow2.f32 %v1343_v20  ;;  %v1245_v53 = vsub.f32 %v7612_v61, %v1104_v34  ;;  %v1246_v45 = vsub.f32 %v7613_v62, %v1104_v34  ;;  %1574 = vadd.xlane.f32.xlu0 %v1573_v14  ;;  %v1666_v29 = vadd.f32 %v5565_v5, %v5563_v60 }
 0x284   :  { %v1247_v36 = vsub.f32 %v5196_v58, %v1107_v6  ;;  %v5574_v9 = vpop.eup %3956  ;;  %3976 = vpow2.f32 %v1345_v18  ;;  %v1248_v22 = vsub.f32 %v7615_v25, %v1107_v6  ;;  %v7618_v25 = vld [vmem:[#allocation31_spill] sm:$0xff] }
 0x285   :  { %7614 = vst [vmem:[#allocation54_spill] sm:$0xff] %v5574_v9  ;;  %v5579_v4 = vpop.eup %3958  ;;  %3978 = vpow2.f32 %v1347_v7  ;;  %v1471_v16 = vmul.f32 1.442695, %v1245_v53  ;;  %v1473_v20 = vmul.f32 1.442695, %v1246_v45  ;;  %v1669_v58 = vadd.f32 %v5574_v9, %v5569_v1  ;;  %1667 = vadd.xlane.f32.xlu1 %v1666_v29 }
 0x286   :  { %v1475_v13 = vmul.f32 1.442695, %v1247_v36  ;;  %v5581_v61 = vpop.eup %3960  ;;  %3980 = vpow2.f32 %v1349_v56  ;;  %v1477_v62 = vmul.f32 1.442695, %v1248_v22  ;;  %v1014_v18 = vpop.xlane.xlu1 %1013 }
 0x287   :  { %7616 = vst [vmem:[#allocation56_spill] sm:$0xff] %v5581_v61  ;;  %v1017_v14 = vpop.xlane.xlu0 %1016  ;;  %v5585_v34 = vpop.eup %3962  ;;  %3982 = vpow2.f32 %v1471_v16  ;;  %v1185_v6 = vsub.f32 %v4988_v59, %v1014_v18  ;;  %v1186_v7 = vsub.f32 %v7618_v25, %v1014_v18  ;;  %1670 = vadd.xlane.f32.xlu0 %v1669_v58  ;;  %v1576_v36 = vadd.f32 %v5581_v61, %v5579_v4  ;;  %v7621_v61 = vld [vmem:[#allocation67_spill] sm:$0xff] }
 0x288   :  { %7617 = vst [vmem:[#allocation58_spill] sm:$0xff] %v5585_v34  ;;  %v1187_v53 = vsub.f32 %v5006_v0, %v1017_v14  ;;  %v5590_v45 = vpop.eup %3964  ;;  %3984 = vpow2.f32 %v1473_v20  ;;  %v1188_v56 = vsub.f32 %v5010_v3, %v1017_v14  ;;  %v7620_v14 = vld [vmem:[#allocation66_spill] sm:$0xff] }
 0x289   :  { %7619 = vst [vmem:[#allocation29_spill] sm:$0xff] %v5590_v45  ;;  %v5595_v22 = vpop.eup %3966  ;;  %3986 = vpow2.f32 %v1475_v13  ;;  %v1351_v29 = vmul.f32 1.442695, %v1185_v6  ;;  %v1353_v16 = vmul.f32 1.442695, %v1186_v7  ;;  %v1579_v0 = vadd.f32 %v5590_v45, %v5585_v34  ;;  %1577 = vadd.xlane.f32.xlu1 %v1576_v36 }
 0x28a   :  { %v1355_v9 = vmul.f32 1.442695, %v1187_v53  ;;  %v5597_v59 = vpop.eup %3968  ;;  %3988 = vpow2.f32 %v1477_v62  ;;  %v1357_v18 = vmul.f32 1.442695, %v1188_v56  ;;  %v1110_v20 = vpop.xlane.xlu1 %1109  ;;  %v7623_v62 = vld [vmem:[#allocation68_spill] sm:$0xff] }
 0x28b   :  { %v1113_v58 = vpop.xlane.xlu0 %1112  ;;  %v5601_v3 = vpop.eup %3970  ;;  %3990 = vpow2.f32 %v1351_v29  ;;  %v1249_v25 = vsub.f32 %v7620_v14, %v1110_v20  ;;  %v1250_v13 = vsub.f32 %v7621_v61, %v1110_v20  ;;  %1580 = vadd.xlane.f32.xlu0 %v1579_v0  ;;  %v1672_v56 = vadd.f32 %v5597_v59, %v5595_v22 }
 0x28c   :  { %v1251_v6 = vsub.f32 %v5214_v8, %v1113_v58  ;;  %v5606_v7 = vpop.eup %3972  ;;  %3992 = vpow2.f32 %v1353_v16  ;;  %v1252_v53 = vsub.f32 %v7623_v62, %v1113_v58  ;;  %v7626_v62 = vld [vmem:[#allocation34_spill] sm:$0xff] }
 0x28d   :  { %7622 = vst [vmem:[#allocation60_spill] sm:$0xff] %v5606_v7  ;;  %v5611_v36 = vpop.eup %3974  ;;  %3994 = vpow2.f32 %v1355_v9  ;;  %v1479_v45 = vmul.f32 1.442695, %v1249_v25  ;;  %v1481_v29 = vmul.f32 1.442695, %v1250_v13  ;;  %v1675_v8 = vadd.f32 %v5606_v7, %v5601_v3  ;;  %1673 = vadd.xlane.f32.xlu1 %v1672_v56 }
 0x28e   :  { %v1483_v34 = vmul.f32 1.442695, %v1251_v6  ;;  %v5613_v14 = vpop.eup %3976  ;;  %3996 = vpow2.f32 %v1357_v18  ;;  %v1485_v61 = vmul.f32 1.442695, %v1252_v53  ;;  %v1020_v16 = vpop.xlane.xlu1 %1019 }
 0x28f   :  { %7624 = vst [vmem:[#allocation61_spill] sm:$0xff] %v5613_v14  ;;  %v1023_v0 = vpop.xlane.xlu0 %1022  ;;  %v5617_v20 = vpop.eup %3978  ;;  %3998 = vpow2.f32 %v1479_v45  ;;  %v1189_v58 = vsub.f32 %v5018_v23, %v1020_v16  ;;  %v1190_v9 = vsub.f32 %v7626_v62, %v1020_v16  ;;  %1676 = vadd.xlane.f32.xlu0 %v1675_v8  ;;  %v1582_v6 = vadd.f32 %v5613_v14, %v5611_v36  ;;  %v7631_v14 = vld [vmem:[#allocation70_spill] sm:$0xff] }
 0x290   :  { %7625 = vst [vmem:[#allocation62_spill] sm:$0xff] %v5617_v20  ;;  %v1191_v25 = vsub.f32 %v5036_v44, %v1023_v0  ;;  %v5622_v13 = vpop.eup %3980  ;;  %4000 = vpow2.f32 %v1481_v29  ;;  %v1192_v18 = vsub.f32 %v5040_v2, %v1023_v0  ;;  %v7630_v0 = vld [vmem:[#allocation69_spill] sm:$0xff] }
 0x291   :  { %7627 = vst [vmem:[#allocation30_spill] sm:$0xff] %v5622_v13  ;;  %v5627_v53 = vpop.eup %3982  ;;  %4002 = vpow2.f32 %v1483_v34  ;;  %v1359_v56 = vmul.f32 1.442695, %v1189_v58  ;;  %v1361_v45 = vmul.f32 1.442695, %v1190_v9  ;;  %v1585_v44 = vadd.f32 %v5622_v13, %v5617_v20  ;;  %1583 = vadd.xlane.f32.xlu1 %v1582_v6 }
 0x292   :  { %v1363_v7 = vmul.f32 1.442695, %v1191_v25  ;;  %v5629_v23 = vpop.eup %3984  ;;  %4004 = vpow2.f32 %v1485_v61  ;;  %v1365_v16 = vmul.f32 1.442695, %v1192_v18  ;;  %v1116_v29 = vpop.xlane.xlu1 %1115  ;;  %v7633_v61 = vld [vmem:[#allocation71_spill] sm:$0xff] }
 0x293   :  { %7628 = vst [vmem:[#allocation63_spill] sm:$0xff] %v5629_v23  ;;  %v1119_v8 = vpop.xlane.xlu0 %1118  ;;  %v5633_v2 = vpop.eup %3986  ;;  %4006 = vpow2.f32 %v1359_v56  ;;  %v1253_v62 = vsub.f32 %v7630_v0, %v1116_v29  ;;  %v1254_v34 = vsub.f32 %v7631_v14, %v1116_v29  ;;  %1586 = vadd.xlane.f32.xlu0 %v1585_v44  ;;  %v1678_v18 = vadd.f32 %v5629_v23, %v5627_v53  ;;  %v7638_v23 = vld [vmem:[#allocation40_spill] sm:$0xff] }
 0x294   :  { %7629 = vst [vmem:[#allocation64_spill] sm:$0xff] %v5633_v2  ;;  %v1255_v58 = vsub.f32 %v5232_v17, %v1119_v8  ;;  %v5638_v9 = vpop.eup %3988  ;;  %4008 = vpow2.f32 %v1361_v45  ;;  %v1256_v25 = vsub.f32 %v7633_v61, %v1119_v8  ;;  %v7637_v8 = vld [vmem:[#allocation38_spill] sm:$0xff] }
 0x295   :  { %7632 = vst [vmem:[#allocation65_spill] sm:$0xff] %v5638_v9  ;;  %v5643_v6 = vpop.eup %3990  ;;  %4010 = vpow2.f32 %v1363_v7  ;;  %v1487_v13 = vmul.f32 1.442695, %v1253_v62  ;;  %v1489_v56 = vmul.f32 1.442695, %v1254_v34  ;;  %v1681_v17 = vadd.f32 %v5638_v9, %v5633_v2  ;;  %1679 = vadd.xlane.f32.xlu1 %v1678_v18 }
 0x296   :  { %7634 = vst [vmem:[#allocation31_spill] sm:$0xff] %v5643_v6  ;;  %v1491_v20 = vmul.f32 1.442695, %v1255_v58  ;;  %v5645_v0 = vpop.eup %3992  ;;  %4012 = vpow2.f32 %v1365_v16  ;;  %v1493_v14 = vmul.f32 1.442695, %v1256_v25  ;;  %v1026_v45 = vpop.xlane.xlu1 %1025  ;;  %v7640_v16 = vld [vmem:[#allocation43_spill] sm:$0xff] }
 0x297   :  { %7635 = vst [vmem:[#allocation66_spill] sm:$0xff] %v5645_v0  ;;  %v1029_v44 = vpop.xlane.xlu0 %1028  ;;  %v5649_v29 = vpop.eup %3994  ;;  %4014 = vpow2.f32 %v1487_v13  ;;  %v1193_v61 = vsub.f32 %v7637_v8, %v1026_v45  ;;  %v1194_v7 = vsub.f32 %v7638_v23, %v1026_v45  ;;  %1682 = vadd.xlane.f32.xlu0 %v1681_v17  ;;  %v1588_v25 = vadd.f32 %v5645_v0, %v5643_v6  ;;  %v7642_v0 = vld [vmem:[#allocation73_spill] sm:$0xff] }
 0x298   :  { %7636 = vst [vmem:[#allocation67_spill] sm:$0xff] %v5649_v29  ;;  %v1195_v62 = vsub.f32 %v5066_v38, %v1029_v44  ;;  %v5654_v34 = vpop.eup %3996  ;;  %4016 = vpow2.f32 %v1489_v56  ;;  %v1196_v58 = vsub.f32 %v7640_v16, %v1029_v44  ;;  %v7641_v44 = vld [vmem:[#allocation72_spill] sm:$0xff] }
 0x299   :  { %7639 = vst [vmem:[#allocation68_spill] sm:$0xff] %v5654_v34  ;;  %v5659_v18 = vpop.eup %3998  ;;  %4018 = vpow2.f32 %v1491_v20  ;;  %v1367_v9 = vmul.f32 1.442695, %v1193_v61  ;;  %v1369_v13 = vmul.f32 1.442695, %v1194_v7  ;;  %v1591_v38 = vadd.f32 %v5654_v34, %v5649_v29  ;;  %1589 = vadd.xlane.f32.xlu1 %v1588_v25  ;;  %v7643_v61 = vld [vmem:[#allocation74_spill] sm:$0xff] }
 0x29a   :  { %v1371_v2 = vmul.f32 1.442695, %v1195_v62  ;;  %v5661_v8 = vpop.eup %4000  ;;  %4020 = vpow2.f32 %v1493_v14  ;;  %v1373_v23 = vmul.f32 1.442695, %v1196_v58  ;;  %v1122_v56 = vpop.xlane.xlu1 %1121  ;;  %v7644_v14 = vld [vmem:[#allocation75_spill] sm:$0xff] }
 0x29b   :  { %v1125_v17 = vpop.xlane.xlu0 %1124  ;;  %v5665_v45 = vpop.eup %4002  ;;  %4022 = vpow2.f32 %v1367_v9  ;;  %v1257_v16 = vsub.f32 %v7641_v44, %v1122_v56  ;;  %v1258_v20 = vsub.f32 %v7642_v0, %v1122_v56  ;;  %1592 = vadd.xlane.f32.xlu0 %v1591_v38  ;;  %v1684_v25 = vadd.f32 %v5661_v8, %v5659_v18 }
 0x29c   :  { %v1259_v7 = vsub.f32 %v7643_v61, %v1125_v17  ;;  %v5670_v62 = vpop.eup %4004  ;;  %4024 = vpow2.f32 %v1369_v13  ;;  %v1260_v58 = vsub.f32 %v7644_v14, %v1125_v17 }
 0x29d   :  { %v5675_v34 = vpop.eup %4006  ;;  %4026 = vpow2.f32 %v1371_v2  ;;  %v1495_v29 = vmul.f32 1.442695, %v1257_v16  ;;  %v1497_v9 = vmul.f32 1.442695, %v1258_v20  ;;  %v1687_v56 = vadd.f32 %v5670_v62, %v5665_v45  ;;  %1685 = vadd.xlane.f32.xlu1 %v1684_v25 }
 0x29e   :  { %v1499_v6 = vmul.f32 1.442695, %v1259_v7  ;;  %v5677_v44 = vpop.eup %4008  ;;  %4028 = vpow2.f32 %v1373_v23  ;;  %v1501_v0 = vmul.f32 1.442695, %v1260_v58  ;;  %v1032_v13 = vpop.xlane.xlu1 %1031 }
 0x29f   :  { %7645 = vst [vmem:[#allocation34_spill] sm:$0xff] %v5677_v44  ;;  %v1035_v38 = vpop.xlane.xlu0 %1034  ;;  %v5681_v17 = vpop.eup %4010  ;;  %4030 = vpow2.f32 %v1495_v29  ;;  %v1197_v61 = vsub.f32 %v5078_v32, %v1032_v13  ;;  %v1198_v2 = vsub.f32 %v5082_v35, %v1032_v13  ;;  %1688 = vadd.xlane.f32.xlu0 %v1687_v56  ;;  %v1594_v7 = vadd.f32 %v5677_v44, %v5675_v34  ;;  %v7647_v13 = vld [vmem:[#allocation76_spill] sm:$0xff]  ;;  %v7648_v44 = vld [vmem:[#allocation77_spill] sm:$0xff] }
 0x2a0   :  { %v1199_v16 = vsub.f32 %v5096_v31, %v1035_v38  ;;  %v5686_v20 = vpop.eup %4012  ;;  %4032 = vpow2.f32 %v1497_v9  ;;  %v1200_v23 = vsub.f32 %v5100_v33, %v1035_v38 }
 0x2a1   :  { %7646 = vst [vmem:[#allocation69_spill] sm:$0xff] %v5686_v20  ;;  %v5691_v14 = vpop.eup %4014  ;;  %4034 = vpow2.f32 %v1499_v6  ;;  %v1375_v58 = vmul.f32 1.442695, %v1197_v61  ;;  %v1377_v29 = vmul.f32 1.442695, %v1198_v2  ;;  %v1597_v31 = vadd.f32 %v5686_v20, %v5681_v17  ;;  %1595 = vadd.xlane.f32.xlu1 %v1594_v7 }
 0x2a2   :  { %v1379_v25 = vmul.f32 1.442695, %v1199_v16  ;;  %v5693_v32 = vpop.eup %4016  ;;  %4036 = vpow2.f32 %v1501_v0  ;;  %v1381_v35 = vmul.f32 1.442695, %v1200_v23  ;;  %v1128_v9 = vpop.xlane.xlu1 %1127 }
 0x2a3   :  { %v1131_v56 = vpop.xlane.xlu0 %1130  ;;  %v5697_v33 = vpop.eup %4018  ;;  %4038 = vpow2.f32 %v1375_v58  ;;  %v1261_v38 = vsub.f32 %v7647_v13, %v1128_v9  ;;  %v1262_v6 = vsub.f32 %v7648_v44, %v1128_v9  ;;  %1598 = vadd.xlane.f32.xlu0 %v1597_v31  ;;  %v1690_v16 = vadd.f32 %v5693_v32, %v5691_v14 }
 0x2a4   :  { %v1263_v61 = vsub.f32 %v5269_v50, %v1131_v56  ;;  %v5702_v2 = vpop.eup %4020  ;;  %4040 = vpow2.f32 %v1377_v29  ;;  %v1264_v0 = vsub.f32 %v5278_v49, %v1131_v56 }
 0x2a5   :  { %v5707_v23 = vpop.eup %4022  ;;  %4042 = vpow2.f32 %v1379_v25  ;;  %v1503_v7 = vmul.f32 1.442695, %v1261_v38  ;;  %v1505_v58 = vmul.f32 1.442695, %v1262_v6  ;;  %v1693_v50 = vadd.f32 %v5702_v2, %v5697_v33  ;;  %1691 = vadd.xlane.f32.xlu1 %v1690_v16 }
 0x2a6   :  { %v1507_v20 = vmul.f32 1.442695, %v1263_v61  ;;  %v5709_v13 = vpop.eup %4024  ;;  %4044 = vpow2.f32 %v1381_v35  ;;  %v1509_v44 = vmul.f32 1.442695, %v1264_v0  ;;  %v1038_v29 = vpop.xlane.xlu1 %1037 }
 0x2a7   :  { %v1041_v31 = vpop.xlane.xlu0 %1040  ;;  %v5713_v49 = vpop.eup %4026  ;;  %4046 = vpow2.f32 %v1503_v7  ;;  %v1201_v9 = vsub.f32 %v5108_v28, %v1038_v29  ;;  %v1202_v25 = vsub.f32 %v5112_v30, %v1038_v29  ;;  %1694 = vadd.xlane.f32.xlu0 %v1693_v50  ;;  %v1600_v6 = vadd.f32 %v5709_v13, %v5707_v23 }
 0x2a8   :  { %7649 = vst [vmem:[#allocation70_spill] sm:$0xff] %v5713_v49  ;;  %v1203_v56 = vsub.f32 %v5126_v37, %v1041_v31  ;;  %v5718_v38 = vpop.eup %4028  ;;  %4048 = vpow2.f32 %v1505_v58  ;;  %v1204_v35 = vsub.f32 %v5130_v39, %v1041_v31  ;;  %v7654_v31 = vld [vmem:[#allocation78_spill] sm:$0xff] }
 0x2a9   :  { %7650 = vst [vmem:[#allocation71_spill] sm:$0xff] %v5718_v38  ;;  %v5723_v61 = vpop.eup %4030  ;;  %4050 = vpow2.f32 %v1507_v20  ;;  %v1383_v0 = vmul.f32 1.442695, %v1201_v9  ;;  %v1385_v16 = vmul.f32 1.442695, %v1202_v25  ;;  %v1603_v37 = vadd.f32 %v5718_v38, %v5713_v49  ;;  %1601 = vadd.xlane.f32.xlu1 %v1600_v6 }
 0x2aa   :  { %7651 = vst [vmem:[#allocation38_spill] sm:$0xff] %v5723_v61  ;;  %v1387_v7 = vmul.f32 1.442695, %v1203_v56  ;;  %v5725_v28 = vpop.eup %4032  ;;  %4052 = vpow2.f32 %v1509_v44  ;;  %v1389_v30 = vmul.f32 1.442695, %v1204_v35  ;;  %v1134_v58 = vpop.xlane.xlu1 %1133  ;;  %v7656_v44 = vld [vmem:[#allocation79_spill] sm:$0xff] }
 0x2ab   :  { %7652 = vst [vmem:[#allocation40_spill] sm:$0xff] %v5725_v28  ;;  %v1137_v50 = vpop.xlane.xlu0 %1136  ;;  %v5729_v39 = vpop.eup %4034  ;;  %4054 = vpow2.f32 %v1383_v0  ;;  %v1265_v29 = vsub.f32 %v5282_v12, %v1134_v58  ;;  %v1266_v20 = vsub.f32 %v5284_v27, %v1134_v58  ;;  %1604 = vadd.xlane.f32.xlu0 %v1603_v37  ;;  %v1696_v35 = vadd.f32 %v5725_v28, %v5723_v61  ;;  %v7661_v28 = vld [vmem:[#allocation55_spill] sm:$0xff] }
 0x2ac   :  { %7653 = vst [vmem:[#allocation43_spill] sm:$0xff] %v5729_v39  ;;  %v1267_v9 = vsub.f32 %v7654_v31, %v1137_v50  ;;  %v5734_v25 = vpop.eup %4036  ;;  %4056 = vpow2.f32 %v1385_v16  ;;  %v1268_v56 = vsub.f32 %v7656_v44, %v1137_v50  ;;  %v7660_v31 = vld [vmem:[#allocation53_spill] sm:$0xff] }
 0x2ad   :  { %7655 = vst [vmem:[#allocation72_spill] sm:$0xff] %v5734_v25  ;;  %v5739_v6 = vpop.eup %4038  ;;  %4058 = vpow2.f32 %v1387_v7  ;;  %v1511_v38 = vmul.f32 1.442695, %v1265_v29  ;;  %v1513_v0 = vmul.f32 1.442695, %v1266_v20  ;;  %v1699_v58 = vadd.f32 %v5734_v25, %v5729_v39  ;;  %1697 = vadd.xlane.f32.xlu1 %v1696_v35  ;;  %v7662_v29 = vld [vmem:[#allocation57_spill] sm:$0xff] }
 0x2ae   :  { %7657 = vst [vmem:[#allocation73_spill] sm:$0xff] %v5739_v6  ;;  %v1515_v49 = vmul.f32 1.442695, %v1267_v9  ;;  %v5741_v12 = vpop.eup %4040  ;;  %4060 = vpow2.f32 %v1389_v30  ;;  %v1517_v27 = vmul.f32 1.442695, %v1268_v56  ;;  %v1044_v16 = vpop.xlane.xlu1 %1043  ;;  %v7664_v30 = vld [vmem:[#allocation59_spill] sm:$0xff] }
 0x2af   :  { %7658 = vst [vmem:[#allocation74_spill] sm:$0xff] %v5741_v12  ;;  %v1047_v37 = vpop.xlane.xlu0 %1046  ;;  %v5745_v50 = vpop.eup %4042  ;;  %4062 = vpow2.f32 %v1511_v38  ;;  %v1205_v44 = vsub.f32 %v7660_v31, %v1044_v16  ;;  %v1206_v7 = vsub.f32 %v7661_v28, %v1044_v16  ;;  %1700 = vadd.xlane.f32.xlu0 %v1699_v58  ;;  %v1606_v35 = vadd.f32 %v5741_v12, %v5739_v6  ;;  %v7666_v12 = vld [vmem:[#allocation81_spill] sm:$0xff] }
 0x2b0   :  { %7659 = vst [vmem:[#allocation75_spill] sm:$0xff] %v5745_v50  ;;  %v1207_v20 = vsub.f32 %v7662_v29, %v1047_v37  ;;  %v5750_v9 = vpop.eup %4044  ;;  %4064 = vpow2.f32 %v1513_v0  ;;  %v1208_v56 = vsub.f32 %v7664_v30, %v1047_v37  ;;  %v7665_v29 = vld [vmem:[#allocation80_spill] sm:$0xff] }
 0x2b1   :  { %7663 = vst [vmem:[#allocation76_spill] sm:$0xff] %v5750_v9  ;;  %v5755_v25 = vpop.eup %4046  ;;  %4066 = vpow2.f32 %v1515_v49  ;;  %v1391_v39 = vmul.f32 1.442695, %v1205_v44  ;;  %v1393_v38 = vmul.f32 1.442695, %v1206_v7  ;;  %v1609_v16 = vadd.f32 %v5750_v9, %v5745_v50  ;;  %1607 = vadd.xlane.f32.xlu1 %v1606_v35  ;;  %v7667_v44 = vld [vmem:[#allocation82_spill] sm:$0xff] }
 0x2b2   :  { %v1395_v61 = vmul.f32 1.442695, %v1207_v20  ;;  %v5757_v31 = vpop.eup %4048  ;;  %4068 = vpow2.f32 %v1517_v27  ;;  %v1397_v28 = vmul.f32 1.442695, %v1208_v56  ;;  %v1140_v0 = vpop.xlane.xlu1 %1139  ;;  %v7668_v27 = vld [vmem:[#allocation83_spill] sm:$0xff] }
 0x2b3   :  { %v1143_v58 = vpop.xlane.xlu0 %1142  ;;  %v5761_v37 = vpop.eup %4050  ;;  %4070 = vpow2.f32 %v1391_v39  ;;  %v1269_v30 = vsub.f32 %v7665_v29, %v1140_v0  ;;  %v1270_v49 = vsub.f32 %v7666_v12, %v1140_v0  ;;  %1610 = vadd.xlane.f32.xlu0 %v1609_v16  ;;  %v1702_v35 = vadd.f32 %v5757_v31, %v5755_v25 }
 0x2b4   :  { %v1271_v7 = vsub.f32 %v7667_v44, %v1143_v58  ;;  %v5766_v20 = vpop.eup %4052  ;;  %4072 = vpow2.f32 %v1393_v38  ;;  %v1272_v56 = vsub.f32 %v7668_v27, %v1143_v58 }
 0x2b5   :  { %v5771_v9 = vpop.eup %4054  ;;  %4074 = vpow2.f32 %v1395_v61  ;;  %v1519_v50 = vmul.f32 1.442695, %v1269_v30  ;;  %v1521_v39 = vmul.f32 1.442695, %v1270_v49  ;;  %v1705_v0 = vadd.f32 %v5766_v20, %v5761_v37  ;;  %1703 = vadd.xlane.f32.xlu1 %v1702_v35  ;;  %v7671_v35 = vld [vmem:[#allocation86_spill] sm:$0xff] }
 0x2b6   :  { %v1523_v6 = vmul.f32 1.442695, %v1271_v7  ;;  %v5773_v29 = vpop.eup %4056  ;;  %4076 = vpow2.f32 %v1397_v28  ;;  %v1525_v12 = vmul.f32 1.442695, %v1272_v56  ;;  %v1050_v38 = vpop.xlane.xlu1 %1049 }
 0x2b7   :  { %v5777_v16 = vpop.eup %4058  ;;  %4078 = vpow2.f32 %v1519_v50  ;;  %v1209_v58 = vsub.f32 %v5168_v40, %v1050_v38  ;;  %v1210_v44 = vsub.f32 %v5172_v42, %v1050_v38  ;;  %v1612_v61 = vadd.f32 %v5773_v29, %v5771_v9  ;;  %1706 = vadd.xlane.f32.xlu0 %v1705_v0  ;;  %v1533_v28 = vpop.xlane.xlu0 %1532  ;;  %v7672_v0 = vld [vmem:[#allocation87_spill] sm:$0xff] }
 0x2b8   :  { %v5783_v30 = vpop.eup %4060  ;;  %4080 = vpow2.f32 %v1521_v39 }
 0x2b9   :  { %7669 = vst [vmem:[#allocation77_spill] sm:$0xff] %v5783_v30  ;;  %v5785_v49 = vpop.eup %4062  ;;  %4082 = vpow2.f32 %v1523_v6  ;;  %v1399_v7 = vmul.f32 1.442695, %v1209_v58  ;;  %v1401_v27 = vmul.f32 1.442695, %v1210_v44  ;;  %v1615_v50 = vadd.f32 %v5783_v30, %v5777_v16  ;;  %1613 = vadd.xlane.f32.xlu1 %v1612_v61 }
 0x2ba   :  { %v5789_v56 = vpop.eup %4064  ;;  %4084 = vpow2.f32 %v1525_v12  ;;  %v1146_v40 = vpop.xlane.xlu1 %1145 }
 0x2bb   :  { %v5791_v42 = vpop.eup %4066  ;;  %4086 = vrcp.f32 %v1533_v28  ;;  %v1273_v39 = vsub.f32 %v7671_v35, %v1146_v40  ;;  %v1274_v38 = vsub.f32 %v7672_v0, %v1146_v40  ;;  %v1708_v6 = vadd.f32 %v5789_v56, %v5785_v49  ;;  %1616 = vadd.xlane.f32.xlu0 %v1615_v50 }
 0x2bc   :  { %7670 = vst [vmem:[#allocation78_spill] sm:$0xff] %v5791_v42  ;;  %v5797_v58 = vpop.eup %4068  ;;  %4088 = vpow2.f32 %v1399_v7 }
 0x2bd   :  { %7673 = vst [vmem:[#allocation79_spill] sm:$0xff] %v5797_v58  ;;  %v5799_v44 = vpop.eup %4070  ;;  %4090 = vpow2.f32 %v1401_v27  ;;  %v1527_v12 = vmul.f32 1.442695, %v1273_v39  ;;  %v1529_v61 = vmul.f32 1.442695, %v1274_v38  ;;  %v1711_v30 = vadd.f32 %v5797_v58, %v5791_v42  ;;  %1709 = vadd.xlane.f32.xlu1 %v1708_v6 }
 0x2be   :  { %7674 = vst [vmem:[#allocation53_spill] sm:$0xff] %v5799_v44  ;;  %v5803_v28 = vpop.eup %4072 }
 0x2bf   :  { %7675 = vst [vmem:[#allocation55_spill] sm:$0xff] %v5803_v28  ;;  %v5805_v35 = vpop.eup %4074  ;;  %4092 = vpow2.f32 %v1527_v12  ;;  %v1618_v40 = vadd.f32 %v5803_v28, %v5799_v44  ;;  %1712 = vadd.xlane.f32.xlu0 %v1711_v30  ;;  %v32_v28 = vld [vmem:[#allocation2 + $0x8] sm:$0xff] }
 0x2c0   :  { %7676 = vst [vmem:[#allocation57_spill] sm:$0xff] %v5805_v35  ;;  %v5809_v0 = vpop.eup %4076  ;;  %4094 = vpow2.f32 %v1529_v61  ;;  %v31_v61 = vld [vmem:[#allocation2] sm:$0xff] }
 0x2c1   :  { %7677 = vst [vmem:[#allocation59_spill] sm:$0xff] %v5809_v0  ;;  %v5811_v7 = vpop.eup %4078  ;;  %v1621_v27 = vadd.f32 %v5809_v0, %v5805_v35  ;;  %1619 = vadd.xlane.f32.xlu1 %v1618_v40  ;;  %v7683_v0 = vld [vmem:[#allocation84_spill] sm:$0xff]  ;;  %v7684_v40 = vld [vmem:[#allocation85_spill] sm:$0xff] }
 0x2c2   :  { %7678 = vst [vmem:[#allocation80_spill] sm:$0xff] %v5811_v7  ;;  %v5815_v50 = vpop.eup %4080 }
 0x2c3   :  { %7679 = vst [vmem:[#allocation81_spill] sm:$0xff] %v5815_v50  ;;  %v5817_v39 = vpop.eup %4082  ;;  %v1714_v38 = vadd.f32 %v5815_v50, %v5811_v7  ;;  %1622 = vadd.xlane.f32.xlu0 %v1621_v27 }
 0x2c4   :  { %7680 = vst [vmem:[#allocation82_spill] sm:$0xff] %v5817_v39  ;;  %v5821_v6 = vpop.eup %4084 }
 0x2c5   :  { %7681 = vst [vmem:[#allocation83_spill] sm:$0xff] %v5821_v6  ;;  %v4087_v12 = vpop.eup %4086  ;;  %v1717_v30 = vadd.f32 %v5821_v6, %v5817_v39  ;;  %1715 = vadd.xlane.f32.xlu1 %v1714_v38 }
 0x2c6   :  { %v5825_v44 = vpop.eup %4088  ;;  %v1787_v35 = vmul.f32 %v4087_v12, %v7683_v0  ;;  %v1788_v58 = vmul.f32 %v4087_v12, %v7684_v40 }
 0x2c7   :  { %7682 = vst [vmem:[#allocation86_spill] sm:$0xff] %v5825_v44  ;;  %v5829_v42 = vpop.eup %4090  ;;  %1718 = vadd.xlane.f32.xlu0 %v1717_v30 }
 0x2c8   :  { %7685 = vst [vmem:[#allocation87_spill] sm:$0xff] %v5829_v42  ;;  %v5831_v50 = vmul.f32 %v1787_v35, %v31_v61  ;;  %v5833_v7 = vmul.f32 %v1788_v58, %v32_v28  ;;  %v1624_v27 = vadd.f32 %v5829_v42, %v5825_v44 }
 0x2c9   :  { %v5837_v6 = vpop.eup %4092 }
 0x2ca   :  { %7686 = vst [vmem:[#allocation84_spill] sm:$0xff] %v5831_v50  ;;  %7687 = vst [vmem:[#allocation85_spill] sm:$0xff] %v5833_v7  ;;  %v5839_v39 = vpop.eup %4094  ;;  %v2043_v38 = vmax.f32 %v5831_v50, %v5833_v7  ;;  %1625 = vadd.xlane.f32.xlu1 %v1624_v27 }
 0x2cb   :  { %7688 = vst [vmem:[#allocation88_spill] sm:$0xff] %v5837_v6  ;;  %7689 = vst [vmem:[#allocation89_spill] sm:$0xff] %v5839_v39  ;;  %v1720_v0 = vadd.f32 %v5839_v39, %v5837_v6 }
 0x2cc   :  { %2044 = vmax.xlane.f32.xlu0 %v2043_v38 }
 0x2ce   :  { %1721 = vadd.xlane.f32.xlu1 %v1720_v0 }
 0x2da   :  { %v1629_v35 = vpop.xlane.xlu0 %1628 }
 0x2db   :  { %4096 = vrcp.f32 %v1629_v35 }
 0x2de   :  { %v1539_v58 = vpop.xlane.xlu0 %1538  ;;  %v1536_v12 = vpop.xlane.xlu1 %1535 }
 0x2df   :  { %4098 = vrcp.f32 %v1539_v58  ;;  %v35_v58 = vld [vmem:[#allocation2 + $0x20] sm:$0xff] }
 0x2e0   :  { %4100 = vrcp.f32 %v1536_v12  ;;  %v36_v12 = vld [vmem:[#allocation2 + $0x28] sm:$0xff] }
 0x2e2   :  { %v1632_v30 = vpop.xlane.xlu1 %1631 }
 0x2e3   :  { %4102 = vrcp.f32 %v1632_v30 }
 0x2e4   :  { %v1635_v40 = vpop.xlane.xlu0 %1634 }
 0x2e5   :  { %v4097_v42 = vpop.eup %4096  ;;  %4104 = vrcp.f32 %v1635_v40 }
 0x2e6   :  { %v1542_v44 = vpop.xlane.xlu1 %1541  ;;  %v1851_v7 = vmul.f32 %v4097_v42, %v5347_v11  ;;  %v1852_v27 = vmul.f32 %v4097_v42, %v5349_v54  ;;  %v33_v54 = vld [vmem:[#allocation2 + $0x10] sm:$0xff]  ;;  %v34_v42 = vld [vmem:[#allocation2 + $0x18] sm:$0xff] }
 0x2e7   :  { %4106 = vrcp.f32 %v1542_v44 }
 0x2e8   :  { %v1545_v39 = vpop.xlane.xlu0 %1544  ;;  %v5847_v38 = vmul.f32 %v1851_v7, %v31_v61  ;;  %v5849_v0 = vmul.f32 %v1852_v27, %v32_v28 }
 0x2e9   :  { %v4099_v35 = vpop.eup %4098  ;;  %4108 = vrcp.f32 %v1545_v39 }
 0x2ea   :  { %7690 = vst [vmem:[#allocation90_spill] sm:$0xff] %v5847_v38  ;;  %7691 = vst [vmem:[#allocation91_spill] sm:$0xff] %v5849_v0  ;;  %v4101_v6 = vpop.eup %4100  ;;  %v1638_v30 = vpop.xlane.xlu1 %1637  ;;  %v2139_v40 = vmax.f32 %v5847_v38, %v5849_v0  ;;  %v1791_v50 = vmul.f32 %v4099_v35, %v5351_v21  ;;  %v1792_v11 = vmul.f32 %v4099_v35, %v5356_v19 }
 0x2eb   :  { %4110 = vrcp.f32 %v1638_v30  ;;  %v1789_v44 = vmul.f32 %v4101_v6, %v5361_v43  ;;  %v1790_v28 = vmul.f32 %v4101_v6, %v5363_v41 }
 0x2ec   :  { %v1641_v7 = vpop.xlane.xlu0 %1640  ;;  %2140 = vmax.xlane.f32.xlu0 %v2139_v40  ;;  %v5857_v39 = vmul.f32 %v1791_v50, %v35_v58  ;;  %v5859_v61 = vmul.f32 %v1792_v11, %v36_v12  ;;  %v7696_v11 = vld [vmem:[#allocation10_spill] sm:$0xff] }
 0x2ed   :  { %v4103_v27 = vpop.eup %4102  ;;  %4112 = vrcp.f32 %v1641_v7  ;;  %v5861_v0 = vmul.f32 %v1789_v44, %v33_v54  ;;  %v5863_v21 = vmul.f32 %v1790_v28, %v34_v42 }
 0x2ee   :  { %7692 = vst [vmem:[#allocation92_spill] sm:$0xff] %v5857_v39  ;;  %7693 = vst [vmem:[#allocation93_spill] sm:$0xff] %v5859_v61  ;;  %v1548_v19 = vpop.xlane.xlu1 %1547  ;;  %v2049_v35 = vmax.f32 %v5857_v39, %v5859_v61  ;;  %v1853_v43 = vmul.f32 %v4103_v27, %v5373_v52  ;;  %v1854_v41 = vmul.f32 %v4103_v27, %v5375_v55  ;;  %v37_v52 = vld [vmem:[#allocation2 + $0x30] sm:$0xff] }
 0x2ef   :  { %7694 = vst [vmem:[#allocation94_spill] sm:$0xff] %v5861_v0  ;;  %7695 = vst [vmem:[#allocation95_spill] sm:$0xff] %v5863_v21  ;;  %v4105_v6 = vpop.eup %4104  ;;  %4114 = vrcp.f32 %v1548_v19  ;;  %v2046_v50 = vmax.f32 %v5861_v0, %v5863_v21  ;;  %v38_v21 = vld [vmem:[#allocation2 + $0x38] sm:$0xff] }
 0x2f0   :  { %v1551_v30 = vpop.xlane.xlu0 %1550  ;;  %2050 = vmax.xlane.f32.xlu0 %v2049_v35  ;;  %v1855_v40 = vmul.f32 %v4105_v6, %v5377_v26  ;;  %v1856_v44 = vmul.f32 %v4105_v6, %v7696_v11  ;;  %v5873_v28 = vmul.f32 %v1853_v43, %v33_v54  ;;  %v5875_v7 = vmul.f32 %v1854_v41, %v34_v42  ;;  %v7701_v26 = vld [vmem:[#allocation11_spill] sm:$0xff]  ;;  %v39_v54 = vld [vmem:[#allocation2 + $0x40] sm:$0xff]  ;;  %v7702_v43 = vld [vmem:[#allocation12_spill] sm:$0xff] }
 0x2f1   :  { %v4107_v61 = vpop.eup %4106  ;;  %4116 = vrcp.f32 %v1551_v30  ;;  %2047 = vmax.xlane.f32.xlu1 %v2046_v50  ;;  %v40_v42 = vld [vmem:[#allocation2 + $0x48] sm:$0xff] }
 0x2f2   :  { %7697 = vst [vmem:[#allocation10_spill] sm:$0xff] %v5873_v28  ;;  %7698 = vst [vmem:[#allocation96_spill] sm:$0xff] %v5875_v7  ;;  %v1644_v55 = vpop.xlane.xlu1 %1643  ;;  %v5877_v27 = vmul.f32 %v1855_v40, %v35_v58  ;;  %v5879_v19 = vmul.f32 %v1856_v44, %v36_v12  ;;  %v2142_v35 = vmax.f32 %v5873_v28, %v5875_v7  ;;  %v7703_v58 = vld [vmem:[#allocation13_spill] sm:$0xff]  ;;  %v7704_v12 = vld [vmem:[#allocation32_spill] sm:$0xff] }
 0x2f3   :  { %v1793_v0 = vmul.f32 %v4107_v61, %v7701_v26  ;;  %v4109_v6 = vpop.eup %4108  ;;  %4118 = vrcp.f32 %v1644_v55  ;;  %v1794_v41 = vmul.f32 %v4107_v61, %v7702_v43  ;;  %v7709_v43 = vld [vmem:[#allocation33_spill] sm:$0xff] }
 0x2f4   :  { %7699 = vst [vmem:[#allocation97_spill] sm:$0xff] %v5877_v27  ;;  %7700 = vst [vmem:[#allocation98_spill] sm:$0xff] %v5879_v19  ;;  %v1647_v30 = vpop.xlane.xlu0 %1646  ;;  %v2145_v50 = vmax.f32 %v5877_v27, %v5879_v19  ;;  %v1795_v40 = vmul.f32 %v4109_v6, %v7703_v58  ;;  %v1796_v11 = vmul.f32 %v4109_v6, %v7704_v12  ;;  %v7710_v19 = vld [vmem:[#allocation35_spill] sm:$0xff] }
 0x2f5   :  { %v5889_v44 = vmul.f32 %v1793_v0, %v37_v52  ;;  %v4111_v7 = vpop.eup %4110  ;;  %4120 = vrcp.f32 %v1647_v30  ;;  %2143 = vmax.xlane.f32.xlu1 %v2142_v35  ;;  %v5891_v26 = vmul.f32 %v1794_v41, %v38_v21  ;;  %v7711_v41 = vld [vmem:[#allocation36_spill] sm:$0xff] }
 0x2f6   :  { %2146 = vmax.xlane.f32.xlu0 %v2145_v50  ;;  %v1554_v55 = vpop.xlane.xlu1 %1553  ;;  %v5893_v28 = vmul.f32 %v1795_v40, %v39_v54  ;;  %v5895_v61 = vmul.f32 %v1796_v11, %v40_v42  ;;  %v1857_v39 = vmul.f32 %v4111_v7, %v7709_v43  ;;  %v1858_v27 = vmul.f32 %v4111_v7, %v7710_v19  ;;  %v7712_v50 = vld [vmem:[#allocation14_spill] sm:$0xff]  ;;  %v41_v7 = vld [vmem:[#allocation2 + $0x50] sm:$0xff] }
 0x2f7   :  { %7705 = vst [vmem:[#allocation11_spill] sm:$0xff] %v5889_v44  ;;  %7706 = vst [vmem:[#allocation12_spill] sm:$0xff] %v5891_v26  ;;  %v4113_v58 = vpop.eup %4112  ;;  %4122 = vrcp.f32 %v1554_v55  ;;  %v2052_v0 = vmax.f32 %v5889_v44, %v5891_v26  ;;  %v42_v44 = vld [vmem:[#allocation2 + $0x58] sm:$0xff] }
 0x2f8   :  { %7707 = vst [vmem:[#allocation13_spill] sm:$0xff] %v5893_v28  ;;  %7708 = vst [vmem:[#allocation32_spill] sm:$0xff] %v5895_v61  ;;  %v1557_v6 = vpop.xlane.xlu0 %1556  ;;  %v2055_v35 = vmax.f32 %v5893_v28, %v5895_v61  ;;  %v1859_v30 = vmul.f32 %v4113_v58, %v7711_v41  ;;  %v1860_v40 = vmul.f32 %v4113_v58, %v7712_v50  ;;  %v7717_v61 = vld [vmem:[#allocation15_spill] sm:$0xff]  ;;  %v7718_v41 = vld [vmem:[#allocation16_spill] sm:$0xff] }
 0x2f9   :  { %v5905_v12 = vmul.f32 %v1857_v39, %v37_v52  ;;  %v4115_v11 = vpop.eup %4114  ;;  %4124 = vrcp.f32 %v1557_v6  ;;  %2053 = vmax.xlane.f32.xlu1 %v2052_v0  ;;  %v5907_v43 = vmul.f32 %v1858_v27, %v38_v21  ;;  %v43_v52 = vld [vmem:[#allocation2 + $0x60] sm:$0xff]  ;;  %v44_v21 = vld [vmem:[#allocation2 + $0x68] sm:$0xff] }
 0x2fa   :  { %2056 = vmax.xlane.f32.xlu0 %v2055_v35  ;;  %v1650_v19 = vpop.xlane.xlu1 %1649  ;;  %v5909_v55 = vmul.f32 %v1859_v30, %v39_v54  ;;  %v5911_v26 = vmul.f32 %v1860_v40, %v40_v42  ;;  %v1797_v28 = vmul.f32 %v4115_v11, %v7717_v61  ;;  %v1798_v38 = vmul.f32 %v4115_v11, %v7718_v41  ;;  %v7719_v54 = vld [vmem:[#allocation17_spill] sm:$0xff]  ;;  %v7725_v41 = vld [vmem:[#allocation39_spill] sm:$0xff] }
 0x2fb   :  { %7713 = vst [vmem:[#allocation33_spill] sm:$0xff] %v5905_v12  ;;  %7714 = vst [vmem:[#allocation35_spill] sm:$0xff] %v5907_v43  ;;  %v4117_v58 = vpop.eup %4116  ;;  %4126 = vrcp.f32 %v1650_v19  ;;  %v2148_v39 = vmax.f32 %v5905_v12, %v5907_v43  ;;  %v7720_v42 = vld [vmem:[#allocation37_spill] sm:$0xff] }
 0x2fc   :  { %7715 = vst [vmem:[#allocation36_spill] sm:$0xff] %v5909_v55  ;;  %7716 = vst [vmem:[#allocation14_spill] sm:$0xff] %v5911_v26  ;;  %v1653_v27 = vpop.xlane.xlu0 %1652  ;;  %v2151_v0 = vmax.f32 %v5909_v55, %v5911_v26  ;;  %v1799_v6 = vmul.f32 %v4117_v58, %v7719_v54  ;;  %v1800_v35 = vmul.f32 %v4117_v58, %v7720_v42  ;;  %v7726_v26 = vld [vmem:[#allocation41_spill] sm:$0xff] }
 0x2fd   :  { %v5921_v30 = vmul.f32 %v1797_v28, %v41_v7  ;;  %v4119_v61 = vpop.eup %4118  ;;  %4128 = vrcp.f32 %v1653_v27  ;;  %2149 = vmax.xlane.f32.xlu1 %v2148_v39  ;;  %v5923_v50 = vmul.f32 %v1798_v38, %v42_v44  ;;  %v7727_v39 = vld [vmem:[#allocation42_spill] sm:$0xff] }
 0x2fe   :  { %2152 = vmax.xlane.f32.xlu0 %v2151_v0  ;;  %v1560_v40 = vpop.xlane.xlu1 %1559  ;;  %v5925_v11 = vmul.f32 %v1799_v6, %v43_v52  ;;  %v5927_v19 = vmul.f32 %v1800_v35, %v44_v21  ;;  %v1861_v43 = vmul.f32 %v4119_v61, %v7725_v41  ;;  %v1862_v55 = vmul.f32 %v4119_v61, %v7726_v26  ;;  %v7728_v0 = vld [vmem:[#allocation18_spill] sm:$0xff]  ;;  %v45_v26 = vld [vmem:[#allocation2 + $0x70] sm:$0xff] }
 0x2ff   :  { %7721 = vst [vmem:[#allocation15_spill] sm:$0xff] %v5921_v30  ;;  %7722 = vst [vmem:[#allocation16_spill] sm:$0xff] %v5923_v50  ;;  %v4121_v54 = vpop.eup %4120  ;;  %4130 = vrcp.f32 %v1560_v40  ;;  %v2058_v28 = vmax.f32 %v5921_v30, %v5923_v50  ;;  %v46_v30 = vld [vmem:[#allocation2 + $0x78] sm:$0xff] }
 0x300   :  { %7723 = vst [vmem:[#allocation17_spill] sm:$0xff] %v5925_v11  ;;  %7724 = vst [vmem:[#allocation37_spill] sm:$0xff] %v5927_v19  ;;  %v1563_v58 = vpop.xlane.xlu0 %1562  ;;  %v2061_v38 = vmax.f32 %v5925_v11, %v5927_v19  ;;  %v1863_v27 = vmul.f32 %v4121_v54, %v7727_v39  ;;  %v1864_v6 = vmul.f32 %v4121_v54, %v7728_v0  ;;  %v7732_v19 = vld [vmem:[#allocation19_spill] sm:$0xff]  ;;  %v7733_v39 = vld [vmem:[#allocation20_spill] sm:$0xff] }
 0x301   :  { %v5937_v42 = vmul.f32 %v1861_v43, %v41_v7  ;;  %v4123_v35 = vpop.eup %4122  ;;  %4132 = vrcp.f32 %v1563_v58  ;;  %2059 = vmax.xlane.f32.xlu1 %v2058_v28  ;;  %v5939_v41 = vmul.f32 %v1862_v55, %v42_v44  ;;  %v47_v7 = vld [vmem:[#allocation2 + $0x80] sm:$0xff]  ;;  %v48_v44 = vld [vmem:[#allocation2 + $0x88] sm:$0xff] }
 0x302   :  { %2062 = vmax.xlane.f32.xlu0 %v2061_v38  ;;  %v1656_v61 = vpop.xlane.xlu1 %1655  ;;  %v5941_v40 = vmul.f32 %v1863_v27, %v43_v52  ;;  %v5943_v50 = vmul.f32 %v1864_v6, %v44_v21  ;;  %v1801_v11 = vmul.f32 %v4123_v35, %v7732_v19  ;;  %v1802_v12 = vmul.f32 %v4123_v35, %v7733_v39  ;;  %v7734_v52 = vld [vmem:[#allocation21_spill] sm:$0xff]  ;;  %v7735_v21 = vld [vmem:[#allocation44_spill] sm:$0xff] }
 0x303   :  { %7729 = vst [vmem:[#allocation39_spill] sm:$0xff] %v5939_v41  ;;  %v4125_v54 = vpop.eup %4124  ;;  %4134 = vrcp.f32 %v1656_v61  ;;  %v2154_v43 = vmax.f32 %v5937_v42, %v5939_v41 }
 0x304   :  { %7730 = vst [vmem:[#allocation41_spill] sm:$0xff] %v5941_v40  ;;  %7731 = vst [vmem:[#allocation42_spill] sm:$0xff] %v5943_v50  ;;  %v1659_v55 = vpop.xlane.xlu0 %1658  ;;  %v2157_v28 = vmax.f32 %v5941_v40, %v5943_v50  ;;  %v1803_v58 = vmul.f32 %v4125_v54, %v7734_v52  ;;  %v1804_v38 = vmul.f32 %v4125_v54, %v7735_v21  ;;  %v7740_v50 = vld [vmem:[#allocation45_spill] sm:$0xff] }
 0x305   :  { %v5953_v27 = vmul.f32 %v1801_v11, %v45_v26  ;;  %v4127_v19 = vpop.eup %4126  ;;  %4136 = vrcp.f32 %v1659_v55  ;;  %2155 = vmax.xlane.f32.xlu1 %v2154_v43  ;;  %v5955_v0 = vmul.f32 %v1802_v12, %v46_v30  ;;  %v7741_v43 = vld [vmem:[#allocation46_spill] sm:$0xff] }
 0x306   :  { %2158 = vmax.xlane.f32.xlu0 %v2157_v28  ;;  %v1566_v6 = vpop.xlane.xlu1 %1565  ;;  %v5957_v35 = vmul.f32 %v1803_v58, %v47_v7  ;;  %v5959_v61 = vmul.f32 %v1804_v38, %v48_v44  ;;  %v1865_v39 = vmul.f32 %v4127_v19, %v5467_v48  ;;  %v1866_v40 = vmul.f32 %v4127_v19, %v7740_v50  ;;  %v7742_v28 = vld [vmem:[#allocation47_spill] sm:$0xff]  ;;  %v49_v50 = vld [vmem:[#allocation2 + $0x90] sm:$0xff] }
 0x307   :  { %7736 = vst [vmem:[#allocation18_spill] sm:$0xff] %v5953_v27  ;;  %7737 = vst [vmem:[#allocation19_spill] sm:$0xff] %v5955_v0  ;;  %v4129_v52 = vpop.eup %4128  ;;  %4138 = vrcp.f32 %v1566_v6  ;;  %v2064_v11 = vmax.f32 %v5953_v27, %v5955_v0  ;;  %v50_v27 = vld [vmem:[#allocation2 + $0x98] sm:$0xff] }
 0x308   :  { %7738 = vst [vmem:[#allocation20_spill] sm:$0xff] %v5957_v35  ;;  %7739 = vst [vmem:[#allocation21_spill] sm:$0xff] %v5959_v61  ;;  %v1569_v54 = vpop.xlane.xlu0 %1568  ;;  %v2067_v12 = vmax.f32 %v5957_v35, %v5959_v61  ;;  %v1867_v55 = vmul.f32 %v4129_v52, %v7741_v43  ;;  %v1868_v58 = vmul.f32 %v4129_v52, %v7742_v28  ;;  %v7744_v61 = vld [vmem:[#allocation22_spill] sm:$0xff]  ;;  %v7745_v43 = vld [vmem:[#allocation23_spill] sm:$0xff] }
 0x309   :  { %v5969_v21 = vmul.f32 %v1865_v39, %v45_v26  ;;  %v4131_v38 = vpop.eup %4130  ;;  %4140 = vrcp.f32 %v1569_v54  ;;  %2065 = vmax.xlane.f32.xlu1 %v2064_v11  ;;  %v5971_v48 = vmul.f32 %v1866_v40, %v46_v30  ;;  %v51_v39 = vld [vmem:[#allocation2 + $0xa0] sm:$0xff]  ;;  %v52_v30 = vld [vmem:[#allocation2 + $0xa8] sm:$0xff] }
 0x30a   :  { %2068 = vmax.xlane.f32.xlu0 %v2067_v12  ;;  %v1662_v19 = vpop.xlane.xlu1 %1661  ;;  %v5973_v6 = vmul.f32 %v1867_v55, %v47_v7  ;;  %v5975_v0 = vmul.f32 %v1868_v58, %v48_v44  ;;  %v1805_v35 = vmul.f32 %v4131_v38, %v7744_v61  ;;  %v1806_v41 = vmul.f32 %v4131_v38, %v7745_v43  ;;  %v7746_v7 = vld [vmem:[#allocation24_spill] sm:$0xff]  ;;  %v7747_v44 = vld [vmem:[#allocation25_spill] sm:$0xff] }
 0x30b   :  { %v4133_v52 = vpop.eup %4132  ;;  %4142 = vrcp.f32 %v1662_v19  ;;  %v2160_v26 = vmax.f32 %v5969_v21, %v5971_v48 }
 0x30c   :  { %7743 = vst [vmem:[#allocation44_spill] sm:$0xff] %v5975_v0  ;;  %v1665_v40 = vpop.xlane.xlu0 %1664  ;;  %v2163_v11 = vmax.f32 %v5973_v6, %v5975_v0  ;;  %v1807_v54 = vmul.f32 %v4133_v52, %v7746_v7  ;;  %v1808_v12 = vmul.f32 %v4133_v52, %v7747_v44  ;;  %v5985_v55 = vmul.f32 %v1805_v35, %v49_v50 }
 0x30d   :  { %v4135_v61 = vpop.eup %4134  ;;  %4144 = vrcp.f32 %v1665_v40  ;;  %2161 = vmax.xlane.f32.xlu1 %v2160_v26  ;;  %v5987_v28 = vmul.f32 %v1806_v41, %v50_v27  ;;  %v7751_v40 = vld [vmem:[#allocation48_spill] sm:$0xff] }
 0x30e   :  { %2164 = vmax.xlane.f32.xlu0 %v2163_v11  ;;  %v1572_v58 = vpop.xlane.xlu1 %1571  ;;  %v5989_v38 = vmul.f32 %v1807_v54, %v51_v39  ;;  %v5991_v19 = vmul.f32 %v1808_v12, %v52_v30  ;;  %v1869_v43 = vmul.f32 %v4135_v61, %v5499_v46  ;;  %v1870_v0 = vmul.f32 %v4135_v61, %v5501_v51  ;;  %v53_v51 = vld [vmem:[#allocation2 + $0xb0] sm:$0xff] }
 0x30f   :  { %7748 = vst [vmem:[#allocation45_spill] sm:$0xff] %v5987_v28  ;;  %v4137_v7 = vpop.eup %4136  ;;  %4146 = vrcp.f32 %v1572_v58  ;;  %v2070_v35 = vmax.f32 %v5985_v55, %v5987_v28  ;;  %v54_v28 = vld [vmem:[#allocation2 + $0xb8] sm:$0xff] }
 0x310   :  { %7749 = vst [vmem:[#allocation46_spill] sm:$0xff] %v5989_v38  ;;  %7750 = vst [vmem:[#allocation47_spill] sm:$0xff] %v5991_v19  ;;  %v1575_v52 = vpop.xlane.xlu0 %1574  ;;  %v2073_v41 = vmax.f32 %v5989_v38, %v5991_v19  ;;  %v1871_v26 = vmul.f32 %v4137_v7, %v5505_v24  ;;  %v1872_v11 = vmul.f32 %v4137_v7, %v7751_v40  ;;  %v7753_v24 = vld [vmem:[#allocation49_spill] sm:$0xff] }
 0x311   :  { %v6001_v54 = vmul.f32 %v1869_v43, %v49_v50  ;;  %v4139_v44 = vpop.eup %4138  ;;  %4148 = vrcp.f32 %v1575_v52  ;;  %2071 = vmax.xlane.f32.xlu1 %v2070_v35  ;;  %v6003_v46 = vmul.f32 %v1870_v0, %v50_v27  ;;  %v55_v43 = vld [vmem:[#allocation2 + $0xc0] sm:$0xff]  ;;  %v56_v27 = vld [vmem:[#allocation2 + $0xc8] sm:$0xff] }
 0x312   :  { %2074 = vmax.xlane.f32.xlu0 %v2073_v41  ;;  %v1668_v12 = vpop.xlane.xlu1 %1667  ;;  %v6005_v61 = vmul.f32 %v1871_v26, %v51_v39  ;;  %v6007_v58 = vmul.f32 %v1872_v11, %v52_v30  ;;  %v1809_v19 = vmul.f32 %v4139_v44, %v5515_v10  ;;  %v1810_v38 = vmul.f32 %v4139_v44, %v7753_v24  ;;  %v7754_v39 = vld [vmem:[#allocation50_spill] sm:$0xff]  ;;  %v7755_v30 = vld [vmem:[#allocation51_spill] sm:$0xff] }
 0x313   :  { %v4141_v7 = vpop.eup %4140  ;;  %4150 = vrcp.f32 %v1668_v12  ;;  %v2166_v50 = vmax.f32 %v6001_v54, %v6003_v46 }
 0x314   :  { %7752 = vst [vmem:[#allocation22_spill] sm:$0xff] %v6007_v58  ;;  %v1671_v0 = vpop.xlane.xlu0 %1670  ;;  %v2169_v35 = vmax.f32 %v6005_v61, %v6007_v58  ;;  %v1811_v52 = vmul.f32 %v4141_v7, %v7754_v39  ;;  %v1812_v41 = vmul.f32 %v4141_v7, %v7755_v30  ;;  %v6017_v26 = vmul.f32 %v1809_v19, %v53_v51 }
 0x315   :  { %v4143_v10 = vpop.eup %4142  ;;  %4152 = vrcp.f32 %v1671_v0  ;;  %2167 = vmax.xlane.f32.xlu1 %v2166_v50  ;;  %v6019_v40 = vmul.f32 %v1810_v38, %v54_v28  ;;  %v7759_v0 = vld [vmem:[#allocation26_spill] sm:$0xff] }
 0x316   :  { %2170 = vmax.xlane.f32.xlu0 %v2169_v35  ;;  %v1578_v11 = vpop.xlane.xlu1 %1577  ;;  %v6021_v44 = vmul.f32 %v1811_v52, %v55_v43  ;;  %v6023_v12 = vmul.f32 %v1812_v41, %v56_v27  ;;  %v1873_v24 = vmul.f32 %v4143_v10, %v5531_v15  ;;  %v1874_v58 = vmul.f32 %v4143_v10, %v5533_v57  ;;  %v57_v57 = vld [vmem:[#allocation2 + $0xd0] sm:$0xff] }
 0x317   :  { %7756 = vst [vmem:[#allocation23_spill] sm:$0xff] %v6019_v40  ;;  %v4145_v39 = vpop.eup %4144  ;;  %4154 = vrcp.f32 %v1578_v11  ;;  %v2076_v19 = vmax.f32 %v6017_v26, %v6019_v40  ;;  %v58_v40 = vld [vmem:[#allocation2 + $0xd8] sm:$0xff] }
 0x318   :  { %7757 = vst [vmem:[#allocation24_spill] sm:$0xff] %v6021_v44  ;;  %7758 = vst [vmem:[#allocation25_spill] sm:$0xff] %v6023_v12  ;;  %v1581_v7 = vpop.xlane.xlu0 %1580  ;;  %v2079_v38 = vmax.f32 %v6021_v44, %v6023_v12  ;;  %v1875_v50 = vmul.f32 %v4145_v39, %v5537_v63  ;;  %v1876_v35 = vmul.f32 %v4145_v39, %v7759_v0  ;;  %v7761_v63 = vld [vmem:[#allocation27_spill] sm:$0xff] }
 0x319   :  { %v6033_v52 = vmul.f32 %v1873_v24, %v53_v51  ;;  %v4147_v30 = vpop.eup %4146  ;;  %4156 = vrcp.f32 %v1581_v7  ;;  %2077 = vmax.xlane.f32.xlu1 %v2076_v19  ;;  %v6035_v15 = vmul.f32 %v1874_v58, %v54_v28  ;;  %v59_v24 = vld [vmem:[#allocation2 + $0xe0] sm:$0xff]  ;;  %v60_v28 = vld [vmem:[#allocation2 + $0xe8] sm:$0xff] }
 0x31a   :  { %2080 = vmax.xlane.f32.xlu0 %v2079_v38  ;;  %v1674_v41 = vpop.xlane.xlu1 %1673  ;;  %v6037_v10 = vmul.f32 %v1875_v50, %v55_v43  ;;  %v6039_v11 = vmul.f32 %v1876_v35, %v56_v27  ;;  %v1813_v12 = vmul.f32 %v4147_v30, %v5547_v47  ;;  %v1814_v44 = vmul.f32 %v4147_v30, %v7761_v63  ;;  %v7762_v43 = vld [vmem:[#allocation28_spill] sm:$0xff] }
 0x31b   :  { %v4149_v39 = vpop.eup %4148  ;;  %4158 = vrcp.f32 %v1674_v41  ;;  %v2172_v51 = vmax.f32 %v6033_v52, %v6035_v15  ;;  %v7763_v27 = vld [vmem:[#allocation52_spill] sm:$0xff] }
 0x31c   :  { %7760 = vst [vmem:[#allocation48_spill] sm:$0xff] %v6039_v11  ;;  %v1677_v58 = vpop.xlane.xlu0 %1676  ;;  %v2175_v19 = vmax.f32 %v6037_v10, %v6039_v11  ;;  %v1815_v7 = vmul.f32 %v4149_v39, %v7762_v43  ;;  %v1816_v38 = vmul.f32 %v4149_v39, %v7763_v27  ;;  %v6049_v50 = vmul.f32 %v1813_v12, %v57_v57 }
 0x31d   :  { %v4151_v47 = vpop.eup %4150  ;;  %4160 = vrcp.f32 %v1677_v58  ;;  %2173 = vmax.xlane.f32.xlu1 %v2172_v51  ;;  %v6051_v0 = vmul.f32 %v1814_v44, %v58_v40  ;;  %v7767_v58 = vld [vmem:[#allocation54_spill] sm:$0xff] }
 0x31e   :  { %2176 = vmax.xlane.f32.xlu0 %v2175_v19  ;;  %v1584_v35 = vpop.xlane.xlu1 %1583  ;;  %v6053_v30 = vmul.f32 %v1815_v7, %v59_v24  ;;  %v6055_v41 = vmul.f32 %v1816_v38, %v60_v28  ;;  %v1877_v63 = vmul.f32 %v4151_v47, %v5563_v60  ;;  %v1878_v11 = vmul.f32 %v4151_v47, %v5565_v5  ;;  %v61_v5 = vld [vmem:[#allocation2 + $0xf0] sm:$0xff] }
 0x31f   :  { %7764 = vst [vmem:[#allocation49_spill] sm:$0xff] %v6051_v0  ;;  %v4153_v43 = vpop.eup %4152  ;;  %4162 = vrcp.f32 %v1584_v35  ;;  %v2082_v12 = vmax.f32 %v6049_v50, %v6051_v0  ;;  %v62_v0 = vld [vmem:[#allocation2 + $0xf8] sm:$0xff] }
 0x320   :  { %7765 = vst [vmem:[#allocation50_spill] sm:$0xff] %v6053_v30  ;;  %7766 = vst [vmem:[#allocation51_spill] sm:$0xff] %v6055_v41  ;;  %v1587_v39 = vpop.xlane.xlu0 %1586  ;;  %v2085_v44 = vmax.f32 %v6053_v30, %v6055_v41  ;;  %v1879_v51 = vmul.f32 %v4153_v43, %v5569_v1  ;;  %v1880_v19 = vmul.f32 %v4153_v43, %v7767_v58  ;;  %v7769_v1 = vld [vmem:[#allocation56_spill] sm:$0xff] }
 0x321   :  { %v6065_v7 = vmul.f32 %v1877_v63, %v57_v57  ;;  %v4155_v27 = vpop.eup %4154  ;;  %4164 = vrcp.f32 %v1587_v39  ;;  %2083 = vmax.xlane.f32.xlu1 %v2082_v12  ;;  %v6067_v60 = vmul.f32 %v1878_v11, %v58_v40  ;;  %v63_v63 = vld [vmem:[#allocation2 + $0x100] sm:$0xff]  ;;  %v64_v40 = vld [vmem:[#allocation2 + $0x108] sm:$0xff] }
 0x322   :  { %2086 = vmax.xlane.f32.xlu0 %v2085_v44  ;;  %v1680_v38 = vpop.xlane.xlu1 %1679  ;;  %v6069_v47 = vmul.f32 %v1879_v51, %v59_v24  ;;  %v6071_v35 = vmul.f32 %v1880_v19, %v60_v28  ;;  %v1817_v41 = vmul.f32 %v4155_v27, %v5579_v4  ;;  %v1818_v30 = vmul.f32 %v4155_v27, %v7769_v1  ;;  %v7770_v24 = vld [vmem:[#allocation58_spill] sm:$0xff]  ;;  %v7771_v28 = vld [vmem:[#allocation29_spill] sm:$0xff] }
 0x323   :  { %v4157_v43 = vpop.eup %4156  ;;  %4166 = vrcp.f32 %v1680_v38  ;;  %v2178_v57 = vmax.f32 %v6065_v7, %v6067_v60 }
 0x324   :  { %7768 = vst [vmem:[#allocation26_spill] sm:$0xff] %v6071_v35  ;;  %v1683_v11 = vpop.xlane.xlu0 %1682  ;;  %v2181_v12 = vmax.f32 %v6069_v47, %v6071_v35  ;;  %v1819_v39 = vmul.f32 %v4157_v43, %v7770_v24  ;;  %v1820_v44 = vmul.f32 %v4157_v43, %v7771_v28  ;;  %v6081_v51 = vmul.f32 %v1817_v41, %v61_v5 }
 0x325   :  { %v4159_v4 = vpop.eup %4158  ;;  %4168 = vrcp.f32 %v1683_v11  ;;  %2179 = vmax.xlane.f32.xlu1 %v2178_v57  ;;  %v6083_v58 = vmul.f32 %v1818_v30, %v62_v0  ;;  %v7775_v11 = vld [vmem:[#allocation60_spill] sm:$0xff] }
 0x326   :  { %2182 = vmax.xlane.f32.xlu0 %v2181_v12  ;;  %v1590_v19 = vpop.xlane.xlu1 %1589  ;;  %v6085_v27 = vmul.f32 %v1819_v39, %v63_v63  ;;  %v6087_v38 = vmul.f32 %v1820_v44, %v64_v40  ;;  %v1881_v1 = vmul.f32 %v4159_v4, %v5595_v22  ;;  %v1882_v35 = vmul.f32 %v4159_v4, %v5597_v59  ;;  %v65_v59 = vld [vmem:[#allocation2 + $0x110] sm:$0xff] }
 0x327   :  { %7772 = vst [vmem:[#allocation27_spill] sm:$0xff] %v6083_v58  ;;  %v4161_v24 = vpop.eup %4160  ;;  %4170 = vrcp.f32 %v1590_v19  ;;  %v2088_v41 = vmax.f32 %v6081_v51, %v6083_v58  ;;  %v66_v58 = vld [vmem:[#allocation2 + $0x118] sm:$0xff] }
 0x328   :  { %7773 = vst [vmem:[#allocation28_spill] sm:$0xff] %v6085_v27  ;;  %7774 = vst [vmem:[#allocation52_spill] sm:$0xff] %v6087_v38  ;;  %v1593_v43 = vpop.xlane.xlu0 %1592  ;;  %v2091_v30 = vmax.f32 %v6085_v27, %v6087_v38  ;;  %v1883_v57 = vmul.f32 %v4161_v24, %v5601_v3  ;;  %v1884_v12 = vmul.f32 %v4161_v24, %v7775_v11  ;;  %v7779_v3 = vld [vmem:[#allocation61_spill] sm:$0xff] }
 0x329   :  { %v6097_v39 = vmul.f32 %v1881_v1, %v61_v5  ;;  %v4163_v28 = vpop.eup %4162  ;;  %4172 = vrcp.f32 %v1593_v43  ;;  %2089 = vmax.xlane.f32.xlu1 %v2088_v41  ;;  %v6099_v22 = vmul.f32 %v1882_v35, %v62_v0  ;;  %v67_v1 = vld [vmem:[#allocation2 + $0x120] sm:$0xff]  ;;  %v68_v0 = vld [vmem:[#allocation2 + $0x128] sm:$0xff] }
 0x32a   :  { %2092 = vmax.xlane.f32.xlu0 %v2091_v30  ;;  %v1686_v44 = vpop.xlane.xlu1 %1685  ;;  %v6101_v4 = vmul.f32 %v1883_v57, %v63_v63  ;;  %v6103_v19 = vmul.f32 %v1884_v12, %v64_v40  ;;  %v1821_v38 = vmul.f32 %v4163_v28, %v5611_v36  ;;  %v1822_v27 = vmul.f32 %v4163_v28, %v7779_v3  ;;  %v7780_v63 = vld [vmem:[#allocation62_spill] sm:$0xff] }
 0x32b   :  { %7776 = vst [vmem:[#allocation54_spill] sm:$0xff] %v6099_v22  ;;  %v4165_v24 = vpop.eup %4164  ;;  %4174 = vrcp.f32 %v1686_v44  ;;  %v2184_v5 = vmax.f32 %v6097_v39, %v6099_v22  ;;  %v7781_v40 = vld [vmem:[#allocation30_spill] sm:$0xff] }
 0x32c   :  { %7777 = vst [vmem:[#allocation56_spill] sm:$0xff] %v6101_v4  ;;  %7778 = vst [vmem:[#allocation58_spill] sm:$0xff] %v6103_v19  ;;  %v1689_v35 = vpop.xlane.xlu0 %1688  ;;  %v2187_v41 = vmax.f32 %v6101_v4, %v6103_v19  ;;  %v1823_v43 = vmul.f32 %v4165_v24, %v7780_v63  ;;  %v1824_v30 = vmul.f32 %v4165_v24, %v7781_v40  ;;  %v7786_v19 = vld [vmem:[#allocation63_spill] sm:$0xff] }
 0x32d   :  { %v6113_v57 = vmul.f32 %v1821_v38, %v65_v59  ;;  %v4167_v36 = vpop.eup %4166  ;;  %4176 = vrcp.f32 %v1689_v35  ;;  %2185 = vmax.xlane.f32.xlu1 %v2184_v5  ;;  %v6115_v11 = vmul.f32 %v1822_v27, %v66_v58  ;;  %v7787_v5 = vld [vmem:[#allocation64_spill] sm:$0xff] }
 0x32e   :  { %2188 = vmax.xlane.f32.xlu0 %v2187_v41  ;;  %v1596_v12 = vpop.xlane.xlu1 %1595  ;;  %v6117_v28 = vmul.f32 %v1823_v43, %v67_v1  ;;  %v6119_v44 = vmul.f32 %v1824_v30, %v68_v0  ;;  %v1885_v3 = vmul.f32 %v4167_v36, %v5627_v53  ;;  %v1886_v4 = vmul.f32 %v4167_v36, %v7786_v19  ;;  %v7788_v41 = vld [vmem:[#allocation65_spill] sm:$0xff]  ;;  %v69_v19 = vld [vmem:[#allocation2 + $0x130] sm:$0xff] }
 0x32f   :  { %7782 = vst [vmem:[#allocation29_spill] sm:$0xff] %v6113_v57  ;;  %7783 = vst [vmem:[#allocation60_spill] sm:$0xff] %v6115_v11  ;;  %v4169_v63 = vpop.eup %4168  ;;  %4178 = vrcp.f32 %v1596_v12  ;;  %v2094_v38 = vmax.f32 %v6113_v57, %v6115_v11  ;;  %v70_v57 = vld [vmem:[#allocation2 + $0x138] sm:$0xff] }
 0x330   :  { %7784 = vst [vmem:[#allocation61_spill] sm:$0xff] %v6117_v28  ;;  %7785 = vst [vmem:[#allocation62_spill] sm:$0xff] %v6119_v44  ;;  %v1599_v24 = vpop.xlane.xlu0 %1598  ;;  %v2097_v27 = vmax.f32 %v6117_v28, %v6119_v44  ;;  %v1887_v35 = vmul.f32 %v4169_v63, %v7787_v5  ;;  %v1888_v43 = vmul.f32 %v4169_v63, %v7788_v41  ;;  %v7790_v44 = vld [vmem:[#allocation31_spill] sm:$0xff]  ;;  %v7791_v5 = vld [vmem:[#allocation66_spill] sm:$0xff] }
 0x331   :  { %v6129_v40 = vmul.f32 %v1885_v3, %v65_v59  ;;  %v4171_v30 = vpop.eup %4170  ;;  %4180 = vrcp.f32 %v1599_v24  ;;  %2095 = vmax.xlane.f32.xlu1 %v2094_v38  ;;  %v6131_v53 = vmul.f32 %v1886_v4, %v66_v58  ;;  %v71_v3 = vld [vmem:[#allocation2 + $0x140] sm:$0xff]  ;;  %v72_v58 = vld [vmem:[#allocation2 + $0x148] sm:$0xff] }
 0x332   :  { %2098 = vmax.xlane.f32.xlu0 %v2097_v27  ;;  %v1692_v36 = vpop.xlane.xlu1 %1691  ;;  %v6133_v12 = vmul.f32 %v1887_v35, %v67_v1  ;;  %v6135_v11 = vmul.f32 %v1888_v43, %v68_v0  ;;  %v1825_v28 = vmul.f32 %v4171_v30, %v7790_v44  ;;  %v1826_v22 = vmul.f32 %v4171_v30, %v7791_v5  ;;  %v7792_v1 = vld [vmem:[#allocation67_spill] sm:$0xff]  ;;  %v7793_v0 = vld [vmem:[#allocation68_spill] sm:$0xff] }
 0x333   :  { %v4173_v63 = vpop.eup %4172  ;;  %4182 = vrcp.f32 %v1692_v36  ;;  %v2190_v59 = vmax.f32 %v6129_v40, %v6131_v53 }
 0x334   :  { %7789 = vst [vmem:[#allocation30_spill] sm:$0xff] %v6135_v11  ;;  %v1695_v4 = vpop.xlane.xlu0 %1694  ;;  %v2193_v38 = vmax.f32 %v6133_v12, %v6135_v11  ;;  %v1827_v24 = vmul.f32 %v4173_v63, %v7792_v1  ;;  %v1828_v27 = vmul.f32 %v4173_v63, %v7793_v0  ;;  %v6145_v35 = vmul.f32 %v1825_v28, %v69_v19 }
 0x335   :  { %v4175_v44 = vpop.eup %4174  ;;  %4184 = vrcp.f32 %v1695_v4  ;;  %2191 = vmax.xlane.f32.xlu1 %v2190_v59  ;;  %v6147_v41 = vmul.f32 %v1826_v22, %v70_v57 }
 0x336   :  { %2194 = vmax.xlane.f32.xlu0 %v2193_v38  ;;  %v1602_v43 = vpop.xlane.xlu1 %1601  ;;  %v6149_v30 = vmul.f32 %v1827_v24, %v71_v3  ;;  %v6151_v36 = vmul.f32 %v1828_v27, %v72_v58  ;;  %v1889_v5 = vmul.f32 %v4175_v44, %v5659_v18  ;;  %v1890_v11 = vmul.f32 %v4175_v44, %v5661_v8  ;;  %v73_v8 = vld [vmem:[#allocation2 + $0x150] sm:$0xff] }
 0x337   :  { %v4177_v1 = vpop.eup %4176  ;;  %4186 = vrcp.f32 %v1602_v43  ;;  %v2100_v28 = vmax.f32 %v6145_v35, %v6147_v41  ;;  %v74_v43 = vld [vmem:[#allocation2 + $0x158] sm:$0xff] }
 0x338   :  { %7794 = vst [vmem:[#allocation63_spill] sm:$0xff] %v6149_v30  ;;  %7795 = vst [vmem:[#allocation64_spill] sm:$0xff] %v6151_v36  ;;  %v1605_v63 = vpop.xlane.xlu0 %1604  ;;  %v2103_v22 = vmax.f32 %v6149_v30, %v6151_v36  ;;  %v1891_v59 = vmul.f32 %v4177_v1, %v5665_v45  ;;  %v1892_v4 = vmul.f32 %v4177_v1, %v5670_v62  ;;  %v7796_v45 = vld [vmem:[#allocation34_spill] sm:$0xff] }
 0x339   :  { %v6161_v38 = vmul.f32 %v1889_v5, %v69_v19  ;;  %v4179_v24 = vpop.eup %4178  ;;  %4188 = vrcp.f32 %v1605_v63  ;;  %2101 = vmax.xlane.f32.xlu1 %v2100_v28  ;;  %v6163_v18 = vmul.f32 %v1890_v11, %v70_v57  ;;  %v75_v5 = vld [vmem:[#allocation2 + $0x160] sm:$0xff]  ;;  %v76_v57 = vld [vmem:[#allocation2 + $0x168] sm:$0xff] }
 0x33a   :  { %2104 = vmax.xlane.f32.xlu0 %v2103_v22  ;;  %v1698_v0 = vpop.xlane.xlu1 %1697  ;;  %v6165_v27 = vmul.f32 %v1891_v59, %v71_v3  ;;  %v6167_v44 = vmul.f32 %v1892_v4, %v72_v58  ;;  %v1829_v36 = vmul.f32 %v4179_v24, %v5675_v34  ;;  %v1830_v30 = vmul.f32 %v4179_v24, %v7796_v45  ;;  %v7797_v58 = vld [vmem:[#allocation69_spill] sm:$0xff] }
 0x33b   :  { %v4181_v62 = vpop.eup %4180  ;;  %4190 = vrcp.f32 %v1698_v0  ;;  %v2196_v19 = vmax.f32 %v6161_v38, %v6163_v18 }
 0x33c   :  { %v1701_v11 = vpop.xlane.xlu0 %1700  ;;  %v2199_v1 = vmax.f32 %v6165_v27, %v6167_v44  ;;  %v1831_v3 = vmul.f32 %v4181_v62, %v5681_v17  ;;  %v1832_v28 = vmul.f32 %v4181_v62, %v7797_v58  ;;  %v6177_v63 = vmul.f32 %v1829_v36, %v73_v8 }
 0x33d   :  { %v4183_v34 = vpop.eup %4182  ;;  %4192 = vrcp.f32 %v1701_v11  ;;  %2197 = vmax.xlane.f32.xlu1 %v2196_v19  ;;  %v6179_v22 = vmul.f32 %v1830_v30, %v74_v43 }
 0x33e   :  { %2200 = vmax.xlane.f32.xlu0 %v2199_v1  ;;  %v1608_v59 = vpop.xlane.xlu1 %1607  ;;  %v6181_v4 = vmul.f32 %v1831_v3, %v75_v5  ;;  %v6183_v24 = vmul.f32 %v1832_v28, %v76_v57  ;;  %v1893_v0 = vmul.f32 %v4183_v34, %v5691_v14  ;;  %v1894_v45 = vmul.f32 %v4183_v34, %v5693_v32  ;;  %v77_v32 = vld [vmem:[#allocation2 + $0x170] sm:$0xff] }
 0x33f   :  { %v4185_v17 = vpop.eup %4184  ;;  %4194 = vrcp.f32 %v1608_v59  ;;  %v2106_v36 = vmax.f32 %v6177_v63, %v6179_v22  ;;  %v78_v59 = vld [vmem:[#allocation2 + $0x178] sm:$0xff] }
 0x340   :  { %7798 = vst [vmem:[#allocation65_spill] sm:$0xff] %v6183_v24  ;;  %v1611_v62 = vpop.xlane.xlu0 %1610  ;;  %v2109_v30 = vmax.f32 %v6181_v4, %v6183_v24  ;;  %v1895_v19 = vmul.f32 %v4185_v17, %v5697_v33  ;;  %v1896_v11 = vmul.f32 %v4185_v17, %v5702_v2  ;;  %v6193_v1 = vmul.f32 %v1893_v0, %v73_v8  ;;  %v79_v0 = vld [vmem:[#allocation2 + $0x180] sm:$0xff] }
 0x341   :  { %v4187_v3 = vpop.eup %4186  ;;  %4196 = vrcp.f32 %v1611_v62  ;;  %2107 = vmax.xlane.f32.xlu1 %v2106_v36  ;;  %v6195_v14 = vmul.f32 %v1894_v45, %v74_v43  ;;  %v80_v43 = vld [vmem:[#allocation2 + $0x188] sm:$0xff] }
 0x342   :  { %7799 = vst [vmem:[#allocation31_spill] sm:$0xff] %v6193_v1  ;;  %2110 = vmax.xlane.f32.xlu0 %v2109_v30  ;;  %v1704_v58 = vpop.xlane.xlu1 %1703  ;;  %v6197_v28 = vmul.f32 %v1895_v19, %v75_v5  ;;  %v6199_v34 = vmul.f32 %v1896_v11, %v76_v57  ;;  %v1833_v24 = vmul.f32 %v4187_v3, %v5707_v23  ;;  %v7803_v5 = vld [vmem:[#allocation70_spill] sm:$0xff]  ;;  %v7804_v57 = vld [vmem:[#allocation71_spill] sm:$0xff] }
 0x343   :  { %7800 = vst [vmem:[#allocation66_spill] sm:$0xff] %v6195_v14  ;;  %v1834_v33 = vmul.f32 %v4187_v3, %v5709_v13  ;;  %v4189_v2 = vpop.eup %4188  ;;  %4198 = vrcp.f32 %v1704_v58  ;;  %v2202_v8 = vmax.f32 %v6193_v1, %v6195_v14  ;;  %v7809_v58 = vld [vmem:[#allocation38_spill] sm:$0xff] }
 0x344   :  { %7801 = vst [vmem:[#allocation67_spill] sm:$0xff] %v6197_v28  ;;  %7802 = vst [vmem:[#allocation68_spill] sm:$0xff] %v6199_v34  ;;  %v1707_v45 = vpop.xlane.xlu0 %1706  ;;  %v2205_v17 = vmax.f32 %v6197_v28, %v6199_v34  ;;  %v1835_v36 = vmul.f32 %v4189_v2, %v7803_v5  ;;  %v1836_v62 = vmul.f32 %v4189_v2, %v7804_v57  ;;  %v7810_v34 = vld [vmem:[#allocation40_spill] sm:$0xff] }
 0x345   :  { %v6209_v30 = vmul.f32 %v1833_v24, %v77_v32  ;;  %v4191_v23 = vpop.eup %4190  ;;  %4200 = vrcp.f32 %v1707_v45  ;;  %2203 = vmax.xlane.f32.xlu1 %v2202_v8  ;;  %v6211_v13 = vmul.f32 %v1834_v33, %v78_v59  ;;  %v7811_v8 = vld [vmem:[#allocation43_spill] sm:$0xff] }
 0x346   :  { %2206 = vmax.xlane.f32.xlu0 %v2205_v17  ;;  %v1614_v19 = vpop.xlane.xlu1 %1613  ;;  %v6213_v11 = vmul.f32 %v1835_v36, %v79_v0  ;;  %v6215_v3 = vmul.f32 %v1836_v62, %v80_v43  ;;  %v1897_v14 = vmul.f32 %v4191_v23, %v7809_v58  ;;  %v1898_v28 = vmul.f32 %v4191_v23, %v7810_v34  ;;  %v7812_v17 = vld [vmem:[#allocation72_spill] sm:$0xff] }
 0x347   :  { %7805 = vst [vmem:[#allocation34_spill] sm:$0xff] %v6209_v30  ;;  %7806 = vst [vmem:[#allocation69_spill] sm:$0xff] %v6211_v13  ;;  %v4193_v5 = vpop.eup %4192  ;;  %4202 = vrcp.f32 %v1614_v19  ;;  %v2112_v24 = vmax.f32 %v6209_v30, %v6211_v13  ;;  %v81_v34 = vld [vmem:[#allocation2 + $0x190] sm:$0xff]  ;;  %v82_v30 = vld [vmem:[#allocation2 + $0x198] sm:$0xff] }
 0x348   :  { %7807 = vst [vmem:[#allocation70_spill] sm:$0xff] %v6213_v11  ;;  %7808 = vst [vmem:[#allocation71_spill] sm:$0xff] %v6215_v3  ;;  %v1617_v2 = vpop.xlane.xlu0 %1616  ;;  %v2115_v33 = vmax.f32 %v6213_v11, %v6215_v3  ;;  %v1899_v45 = vmul.f32 %v4193_v5, %v7811_v8  ;;  %v1900_v36 = vmul.f32 %v4193_v5, %v7812_v17  ;;  %v7814_v3 = vld [vmem:[#allocation73_spill] sm:$0xff]  ;;  %v7815_v8 = vld [vmem:[#allocation74_spill] sm:$0xff] }
 0x349   :  { %v6225_v57 = vmul.f32 %v1897_v14, %v77_v32  ;;  %v4195_v62 = vpop.eup %4194  ;;  %4204 = vrcp.f32 %v1617_v2  ;;  %2113 = vmax.xlane.f32.xlu1 %v2112_v24  ;;  %v6227_v58 = vmul.f32 %v1898_v28, %v78_v59  ;;  %v83_v32 = vld [vmem:[#allocation2 + $0x1a0] sm:$0xff]  ;;  %v84_v28 = vld [vmem:[#allocation2 + $0x1a8] sm:$0xff] }
 0x34a   :  { %2116 = vmax.xlane.f32.xlu0 %v2115_v33  ;;  %v1710_v23 = vpop.xlane.xlu1 %1709  ;;  %v6229_v19 = vmul.f32 %v1899_v45, %v79_v0  ;;  %v6231_v13 = vmul.f32 %v1900_v36, %v80_v43  ;;  %v1837_v11 = vmul.f32 %v4195_v62, %v7814_v3  ;;  %v1838_v1 = vmul.f32 %v4195_v62, %v7815_v8  ;;  %v7816_v0 = vld [vmem:[#allocation75_spill] sm:$0xff]  ;;  %v7817_v43 = vld [vmem:[#allocation76_spill] sm:$0xff] }
 0x34b   :  { %v4197_v5 = vpop.eup %4196  ;;  %4206 = vrcp.f32 %v1710_v23  ;;  %v2208_v14 = vmax.f32 %v6225_v57, %v6227_v58 }
 0x34c   :  { %7813 = vst [vmem:[#allocation38_spill] sm:$0xff] %v6231_v13  ;;  %v1713_v59 = vpop.xlane.xlu0 %1712  ;;  %v2211_v24 = vmax.f32 %v6229_v19, %v6231_v13  ;;  %v1839_v2 = vmul.f32 %v4197_v5, %v7816_v0  ;;  %v1840_v33 = vmul.f32 %v4197_v5, %v7817_v43  ;;  %v6241_v45 = vmul.f32 %v1837_v11, %v81_v34 }
 0x34d   :  { %v4199_v3 = vpop.eup %4198  ;;  %4208 = vrcp.f32 %v1713_v59  ;;  %2209 = vmax.xlane.f32.xlu1 %v2208_v14  ;;  %v6243_v17 = vmul.f32 %v1838_v1, %v82_v30 }
 0x34e   :  { %2212 = vmax.xlane.f32.xlu0 %v2211_v24  ;;  %v1620_v36 = vpop.xlane.xlu1 %1619  ;;  %v6245_v62 = vmul.f32 %v1839_v2, %v83_v32  ;;  %v6247_v23 = vmul.f32 %v1840_v33, %v84_v28  ;;  %v1901_v8 = vmul.f32 %v4199_v3, %v5755_v25  ;;  %v1902_v13 = vmul.f32 %v4199_v3, %v5757_v31  ;;  %v85_v31 = vld [vmem:[#allocation2 + $0x1b0] sm:$0xff] }
 0x34f   :  { %v4201_v0 = vpop.eup %4200  ;;  %4210 = vrcp.f32 %v1620_v36  ;;  %v2118_v11 = vmax.f32 %v6241_v45, %v6243_v17  ;;  %v86_v36 = vld [vmem:[#allocation2 + $0x1b8] sm:$0xff] }
 0x350   :  { %7818 = vst [vmem:[#allocation40_spill] sm:$0xff] %v6247_v23  ;;  %v1623_v5 = vpop.xlane.xlu0 %1622  ;;  %v2121_v1 = vmax.f32 %v6245_v62, %v6247_v23  ;;  %v1903_v14 = vmul.f32 %v4201_v0, %v5761_v37  ;;  %v1904_v59 = vmul.f32 %v4201_v0, %v5766_v20  ;;  %v6257_v24 = vmul.f32 %v1901_v8, %v81_v34  ;;  %v87_v8 = vld [vmem:[#allocation2 + $0x1c0] sm:$0xff] }
 0x351   :  { %v4203_v2 = vpop.eup %4202  ;;  %4212 = vrcp.f32 %v1623_v5  ;;  %2119 = vmax.xlane.f32.xlu1 %v2118_v11  ;;  %v6259_v25 = vmul.f32 %v1902_v13, %v82_v30  ;;  %v88_v30 = vld [vmem:[#allocation2 + $0x1c8] sm:$0xff] }
 0x352   :  { %2122 = vmax.xlane.f32.xlu0 %v2121_v1  ;;  %v1716_v43 = vpop.xlane.xlu1 %1715  ;;  %v6261_v33 = vmul.f32 %v1903_v14, %v83_v32  ;;  %v6263_v3 = vmul.f32 %v1904_v59, %v84_v28  ;;  %v1841_v23 = vmul.f32 %v4203_v2, %v5771_v9  ;;  %v1842_v37 = vmul.f32 %v4203_v2, %v5773_v29  ;;  %v7822_v28 = vld [vmem:[#allocation77_spill] sm:$0xff] }
 0x353   :  { %7819 = vst [vmem:[#allocation43_spill] sm:$0xff] %v6259_v25  ;;  %v4205_v20 = vpop.eup %4204  ;;  %4214 = vrcp.f32 %v1716_v43  ;;  %v2214_v34 = vmax.f32 %v6257_v24, %v6259_v25 }
 0x354   :  { %7820 = vst [vmem:[#allocation72_spill] sm:$0xff] %v6261_v33  ;;  %7821 = vst [vmem:[#allocation73_spill] sm:$0xff] %v6263_v3  ;;  %v1719_v13 = vpop.xlane.xlu0 %1718  ;;  %v2217_v0 = vmax.f32 %v6261_v33, %v6263_v3  ;;  %v1843_v32 = vmul.f32 %v4205_v20, %v5777_v16  ;;  %v1844_v11 = vmul.f32 %v4205_v20, %v7822_v28  ;;  %v7829_v3 = vld [vmem:[#allocation84_spill] sm:$0xff]  ;;  %v7830_v33 = vld [vmem:[#allocation85_spill] sm:$0xff] }
 0x355   :  { %v6273_v5 = vmul.f32 %v1841_v23, %v85_v31  ;;  %v4207_v9 = vpop.eup %4206  ;;  %4216 = vrcp.f32 %v1719_v13  ;;  %2215 = vmax.xlane.f32.xlu1 %v2214_v34  ;;  %v6275_v29 = vmul.f32 %v1842_v37, %v86_v36  ;;  %v7827_v34 = vld [vmem:[#allocation78_spill] sm:$0xff] }
 0x356   :  { %2218 = vmax.xlane.f32.xlu0 %v2217_v0  ;;  %v6277_v14 = vmul.f32 %v1843_v32, %v87_v8  ;;  %v6279_v59 = vmul.f32 %v1844_v11, %v88_v30  ;;  %v1905_v2 = vmul.f32 %v4207_v9, %v5785_v49  ;;  %v1906_v43 = vmul.f32 %v4207_v9, %v5789_v56  ;;  %v7828_v0 = vld [vmem:[#allocation79_spill] sm:$0xff] }
 0x357   :  { %7823 = vst [vmem:[#allocation74_spill] sm:$0xff] %v6273_v5  ;;  %7824 = vst [vmem:[#allocation75_spill] sm:$0xff] %v6275_v29  ;;  %v1626_v1 = vpop.xlane.xlu1 %1625  ;;  %v4209_v16 = vpop.eup %4208  ;;  %v2124_v23 = vmax.f32 %v6273_v5, %v6275_v29 }
 0x358   :  { %7825 = vst [vmem:[#allocation76_spill] sm:$0xff] %v6277_v14  ;;  %7826 = vst [vmem:[#allocation77_spill] sm:$0xff] %v6279_v59  ;;  %4218 = vrcp.f32 %v1626_v1  ;;  %v2127_v37 = vmax.f32 %v6277_v14, %v6279_v59  ;;  %v1907_v13 = vmul.f32 %v4209_v16, %v7827_v34  ;;  %v1908_v32 = vmul.f32 %v4209_v16, %v7828_v0  ;;  %v89_v1 = vld [vmem:[#allocation2 + $0x1d0] sm:$0xff]  ;;  %v90_v34 = vld [vmem:[#allocation2 + $0x1d8] sm:$0xff] }
 0x359   :  { %v2045_v20 = vpop.xlane.xlu0 %2044  ;;  %v6289_v28 = vmul.f32 %v1905_v2, %v85_v31  ;;  %v4211_v11 = vpop.eup %4210  ;;  %2125 = vmax.xlane.f32.xlu1 %v2124_v23  ;;  %v6293_v9 = vmul.f32 %v1906_v43, %v86_v36  ;;  %v7833_v14 = vld [vmem:[#allocation53_spill] sm:$0xff]  ;;  %v7834_v31 = vld [vmem:[#allocation55_spill] sm:$0xff]  ;;  %v91_v36 = vld [vmem:[#allocation2 + $0x1e0] sm:$0xff] }
 0x35a   :  { %v2235_v49 = vsub.f32 %v7829_v3, %v2045_v20  ;;  %v2236_v56 = vsub.f32 %v7830_v33, %v2045_v20  ;;  %2128 = vmax.xlane.f32.xlu0 %v2127_v37  ;;  %v6295_v5 = vmul.f32 %v1907_v13, %v87_v8  ;;  %v6297_v59 = vmul.f32 %v1908_v32, %v88_v30  ;;  %v92_v43 = vld [vmem:[#allocation2 + $0x1e8] sm:$0xff]  ;;  %v7835_v23 = vld [vmem:[#allocation57_spill] sm:$0xff] }
 0x35b   :  { %v1722_v29 = vpop.xlane.xlu1 %1721  ;;  %v1845_v16 = vmul.f32 %v4211_v11, %v7833_v14  ;;  %v1846_v2 = vmul.f32 %v4211_v11, %v7834_v31  ;;  %v4213_v0 = vpop.eup %4212  ;;  %v2220_v33 = vmax.f32 %v6289_v28, %v6293_v9  ;;  %v7836_v20 = vld [vmem:[#allocation59_spill] sm:$0xff] }
 0x35c   :  { %7831 = vst [vmem:[#allocation78_spill] sm:$0xff] %v6295_v5  ;;  %7832 = vst [vmem:[#allocation79_spill] sm:$0xff] %v6297_v59  ;;  %v2363_v25 = vmul.f32 1.442695, %v2235_v49  ;;  %v2365_v3 = vmul.f32 1.442695, %v2236_v56  ;;  %4220 = vrcp.f32 %v1722_v29  ;;  %v2223_v8 = vmax.f32 %v6295_v5, %v6297_v59 }
 0x35d   :  { %v1847_v30 = vmul.f32 %v4213_v0, %v7835_v23  ;;  %v1848_v37 = vmul.f32 %v4213_v0, %v7836_v20  ;;  %v6307_v13 = vmul.f32 %v1845_v16, %v89_v1  ;;  %v4215_v14 = vpop.eup %4214  ;;  %2221 = vmax.xlane.f32.xlu1 %v2220_v33  ;;  %v6309_v32 = vmul.f32 %v1846_v2, %v90_v34  ;;  %v7840_v49 = vld [vmem:[#allocation80_spill] sm:$0xff]  ;;  %v7841_v0 = vld [vmem:[#allocation81_spill] sm:$0xff]  ;;  %v7842_v33 = vld [vmem:[#allocation82_spill] sm:$0xff] }
 0x35e   :  { %4222 = vpow2.f32 %v2363_v25  ;;  %2224 = vmax.xlane.f32.xlu0 %v2223_v8  ;;  %v1909_v56 = vmul.f32 %v4215_v14, %v7840_v49  ;;  %v1910_v16 = vmul.f32 %v4215_v14, %v7841_v0  ;;  %v7843_v20 = vld [vmem:[#allocation83_spill] sm:$0xff]  ;;  %v93_v49 = vld [vmem:[#allocation2 + $0x1f0] sm:$0xff]  ;;  %v94_v59 = vld [vmem:[#allocation2 + $0x1f8] sm:$0xff] }
 0x35f   :  { %7837 = vst [vmem:[#allocation84_spill] sm:$0xff] %v6309_v32  ;;  %4224 = vpow2.f32 %v2365_v3  ;;  %v6311_v29 = vmul.f32 %v1847_v30, %v91_v36  ;;  %v6313_v11 = vmul.f32 %v1848_v37, %v92_v43  ;;  %v4217_v31 = vpop.eup %4216  ;;  %v2130_v23 = vmax.f32 %v6307_v13, %v6309_v32  ;;  %v7846_v14 = vld [vmem:[#allocation86_spill] sm:$0xff] }
 0x360   :  { %v1911_v2 = vmul.f32 %v4217_v31, %v7842_v33  ;;  %v1912_v3 = vmul.f32 %v4217_v31, %v7843_v20  ;;  %v6323_v8 = vmul.f32 %v1909_v56, %v89_v1  ;;  %v6325_v37 = vmul.f32 %v1910_v16, %v90_v34 }
 0x361   :  { %7838 = vst [vmem:[#allocation85_spill] sm:$0xff] %v6311_v29  ;;  %7839 = vst [vmem:[#allocation53_spill] sm:$0xff] %v6313_v11  ;;  %v2133_v25 = vmax.f32 %v6311_v29, %v6313_v11  ;;  %2131 = vmax.xlane.f32.xlu1 %v2130_v23  ;;  %v7847_v11 = vld [vmem:[#allocation87_spill] sm:$0xff] }
 0x362   :  { %v4219_v30 = vpop.eup %4218  ;;  %v6327_v5 = vmul.f32 %v1911_v2, %v91_v36  ;;  %v6329_v32 = vmul.f32 %v1912_v3, %v92_v43  ;;  %v2226_v31 = vmax.f32 %v6323_v8, %v6325_v37  ;;  %v7850_v43 = vld [vmem:[#allocation88_spill] sm:$0xff] }
 0x363   :  { %2134 = vmax.xlane.f32.xlu0 %v2133_v25  ;;  %v1849_v0 = vmul.f32 %v4219_v30, %v7846_v14  ;;  %v1850_v29 = vmul.f32 %v4219_v30, %v7847_v11  ;;  %v7851_v25 = vld [vmem:[#allocation89_spill] sm:$0xff] }
 0x364   :  { %7844 = vst [vmem:[#allocation55_spill] sm:$0xff] %v6327_v5  ;;  %7845 = vst [vmem:[#allocation57_spill] sm:$0xff] %v6329_v32  ;;  %v2229_v1 = vmax.f32 %v6327_v5, %v6329_v32 }
 0x365   :  { %v6337_v56 = vmul.f32 %v1849_v0, %v93_v49  ;;  %v6339_v34 = vmul.f32 %v1850_v29, %v94_v59  ;;  %2227 = vmax.xlane.f32.xlu1 %v2226_v31  ;;  %v7856_v0 = vld [vmem:[#allocation90_spill] sm:$0xff] }
 0x366   :  { %v4221_v23 = vpop.eup %4220 }
 0x367   :  { %7848 = vst [vmem:[#allocation59_spill] sm:$0xff] %v6337_v56  ;;  %7849 = vst [vmem:[#allocation80_spill] sm:$0xff] %v6339_v34  ;;  %2230 = vmax.xlane.f32.xlu0 %v2229_v1  ;;  %v2136_v36 = vmax.f32 %v6337_v56, %v6339_v34  ;;  %v1913_v16 = vmul.f32 %v4221_v23, %v7850_v43  ;;  %v1914_v11 = vmul.f32 %v4221_v23, %v7851_v25  ;;  %v7857_v1 = vld [vmem:[#allocation91_spill] sm:$0xff] }
 0x368   :  { %v6345_v33 = vpop.eup %4222 }
 0x369   :  { %7852 = vst [vmem:[#allocation81_spill] sm:$0xff] %v6345_v33  ;;  %v6347_v2 = vpop.eup %4224  ;;  %v6349_v20 = vmul.f32 %v1913_v16, %v93_v49  ;;  %v6351_v3 = vmul.f32 %v1914_v11, %v94_v59  ;;  %2137 = vmax.xlane.f32.xlu1 %v2136_v36  ;;  %v7858_v59 = vld [vmem:[#allocation92_spill] sm:$0xff]  ;;  %v7859_v11 = vld [vmem:[#allocation93_spill] sm:$0xff]  ;;  %v7860_v36 = vld [vmem:[#allocation94_spill] sm:$0xff] }
 0x36a   :  { %7853 = vst [vmem:[#allocation82_spill] sm:$0xff] %v6347_v2  ;;  %v2619_v29 = vadd.f32 %v6347_v2, %v6345_v33 }
 0x36b   :  { %7854 = vst [vmem:[#allocation83_spill] sm:$0xff] %v6349_v20  ;;  %7855 = vst [vmem:[#allocation86_spill] sm:$0xff] %v6351_v3  ;;  %v2232_v30 = vmax.f32 %v6349_v20, %v6351_v3  ;;  %v7861_v3 = vld [vmem:[#allocation95_spill] sm:$0xff] }
 0x36c   :  { %2620 = vadd.xlane.f32.xlu0 %v2619_v29 }
 0x36d   :  { %2233 = vmax.xlane.f32.xlu1 %v2232_v30 }
 0x379   :  { %v2141_v14 = vpop.xlane.xlu0 %2140 }
 0x37a   :  { %v2299_v31 = vsub.f32 %v7856_v0, %v2141_v14  ;;  %v2300_v23 = vsub.f32 %v7857_v1, %v2141_v14  ;;  %v7862_v1 = vld [vmem:[#allocation10_spill] sm:$0xff] }
 0x37c   :  { %v2491_v43 = vmul.f32 1.442695, %v2299_v31  ;;  %v2493_v25 = vmul.f32 1.442695, %v2300_v23 }
 0x37d   :  { %v2051_v49 = vpop.xlane.xlu0 %2050 }
 0x37e   :  { %4226 = vpow2.f32 %v2491_v43  ;;  %v2239_v16 = vsub.f32 %v7858_v59, %v2051_v49  ;;  %v2240_v34 = vsub.f32 %v7859_v11, %v2051_v49  ;;  %v2048_v33 = vpop.xlane.xlu1 %2047  ;;  %v7863_v43 = vld [vmem:[#allocation96_spill] sm:$0xff]  ;;  %v7864_v49 = vld [vmem:[#allocation97_spill] sm:$0xff] }
 0x37f   :  { %4228 = vpow2.f32 %v2493_v25  ;;  %v2237_v2 = vsub.f32 %v7860_v36, %v2048_v33  ;;  %v2238_v29 = vsub.f32 %v7861_v3, %v2048_v33  ;;  %v7865_v25 = vld [vmem:[#allocation98_spill] sm:$0xff] }
 0x380   :  { %v2371_v30 = vmul.f32 1.442695, %v2239_v16  ;;  %v2373_v20 = vmul.f32 1.442695, %v2240_v34 }
 0x381   :  { %v2367_v56 = vmul.f32 1.442695, %v2237_v2  ;;  %v2369_v0 = vmul.f32 1.442695, %v2238_v29  ;;  %v7866_v29 = vld [vmem:[#allocation11_spill] sm:$0xff] }
 0x382   :  { %4230 = vpow2.f32 %v2371_v30  ;;  %v2144_v14 = vpop.xlane.xlu1 %2143  ;;  %v7867_v30 = vld [vmem:[#allocation12_spill] sm:$0xff] }
 0x383   :  { %4232 = vpow2.f32 %v2373_v20  ;;  %v2147_v31 = vpop.xlane.xlu0 %2146  ;;  %v2301_v23 = vsub.f32 %v7862_v1, %v2144_v14  ;;  %v2302_v59 = vsub.f32 %v7863_v43, %v2144_v14  ;;  %v7870_v43 = vld [vmem:[#allocation32_spill] sm:$0xff] }
 0x384   :  { %4234 = vpow2.f32 %v2367_v56  ;;  %v2303_v11 = vsub.f32 %v7864_v49, %v2147_v31  ;;  %v2304_v32 = vsub.f32 %v7865_v25, %v2147_v31  ;;  %v7869_v56 = vld [vmem:[#allocation13_spill] sm:$0xff] }
 0x385   :  { %4236 = vpow2.f32 %v2369_v0  ;;  %v2495_v36 = vmul.f32 1.442695, %v2301_v23  ;;  %v2497_v34 = vmul.f32 1.442695, %v2302_v59 }
 0x386   :  { %v2499_v33 = vmul.f32 1.442695, %v2303_v11  ;;  %v2501_v3 = vmul.f32 1.442695, %v2304_v32  ;;  %v2054_v2 = vpop.xlane.xlu1 %2053 }
 0x387   :  { %4238 = vpow2.f32 %v2495_v36  ;;  %v2057_v16 = vpop.xlane.xlu0 %2056  ;;  %v2241_v20 = vsub.f32 %v7866_v29, %v2054_v2  ;;  %v2242_v5 = vsub.f32 %v7867_v30, %v2054_v2  ;;  %v7872_v2 = vld [vmem:[#allocation33_spill] sm:$0xff]  ;;  %v7873_v29 = vld [vmem:[#allocation35_spill] sm:$0xff] }
 0x388   :  { %v6369_v1 = vpop.eup %4226  ;;  %4240 = vpow2.f32 %v2499_v33  ;;  %v2243_v14 = vsub.f32 %v7869_v56, %v2057_v16  ;;  %v2244_v49 = vsub.f32 %v7870_v43, %v2057_v16  ;;  %v7875_v16 = vld [vmem:[#allocation36_spill] sm:$0xff] }
 0x389   :  { %7868 = vst [vmem:[#allocation87_spill] sm:$0xff] %v6369_v1  ;;  %v6373_v31 = vpop.eup %4228  ;;  %4242 = vpow2.f32 %v2501_v3  ;;  %v2375_v0 = vmul.f32 1.442695, %v2241_v20  ;;  %v2377_v32 = vmul.f32 1.442695, %v2242_v5  ;;  %v7876_v20 = vld [vmem:[#allocation14_spill] sm:$0xff] }
 0x38a   :  { %7871 = vst [vmem:[#allocation88_spill] sm:$0xff] %v6373_v31  ;;  %4244 = vpow2.f32 %v2497_v34  ;;  %v2379_v23 = vmul.f32 1.442695, %v2243_v14  ;;  %v2381_v59 = vmul.f32 1.442695, %v2244_v49  ;;  %v2150_v11 = vpop.xlane.xlu1 %2149  ;;  %v2715_v25 = vadd.f32 %v6373_v31, %v6369_v1 }
 0x38b   :  { %4246 = vpow2.f32 %v2375_v0  ;;  %v2153_v36 = vpop.xlane.xlu0 %2152  ;;  %v2305_v33 = vsub.f32 %v7872_v2, %v2150_v11  ;;  %v2306_v30 = vsub.f32 %v7873_v29, %v2150_v11 }
 0x38c   :  { %v6379_v56 = vpop.eup %4230  ;;  %4248 = vpow2.f32 %v2379_v23  ;;  %v2307_v3 = vsub.f32 %v7875_v16, %v2153_v36  ;;  %v2308_v5 = vsub.f32 %v7876_v20, %v2153_v36  ;;  %2716 = vadd.xlane.f32.xlu0 %v2715_v25  ;;  %v7879_v36 = vld [vmem:[#allocation15_spill] sm:$0xff]  ;;  %v7880_v16 = vld [vmem:[#allocation16_spill] sm:$0xff] }
 0x38d   :  { %7874 = vst [vmem:[#allocation89_spill] sm:$0xff] %v6379_v56  ;;  %v6383_v34 = vpop.eup %4232  ;;  %4250 = vpow2.f32 %v2381_v59  ;;  %v2503_v14 = vmul.f32 1.442695, %v2305_v33  ;;  %v2505_v43 = vmul.f32 1.442695, %v2306_v30  ;;  %v7881_v59 = vld [vmem:[#allocation17_spill] sm:$0xff] }
 0x38e   :  { %7877 = vst [vmem:[#allocation90_spill] sm:$0xff] %v6383_v34  ;;  %v6385_v49 = vpop.eup %4234  ;;  %4252 = vpow2.f32 %v2377_v32  ;;  %v2507_v0 = vmul.f32 1.442695, %v2307_v3  ;;  %v2509_v2 = vmul.f32 1.442695, %v2308_v5  ;;  %v2060_v1 = vpop.xlane.xlu1 %2059  ;;  %v2625_v11 = vadd.f32 %v6383_v34, %v6379_v56  ;;  %v7882_v30 = vld [vmem:[#allocation37_spill] sm:$0xff] }
 0x38f   :  { %7878 = vst [vmem:[#allocation91_spill] sm:$0xff] %v6385_v49  ;;  %v6389_v23 = vpop.eup %4236  ;;  %4254 = vpow2.f32 %v2503_v14  ;;  %v2063_v29 = vpop.xlane.xlu0 %2062  ;;  %v2245_v25 = vsub.f32 %v7879_v36, %v2060_v1  ;;  %v2246_v20 = vsub.f32 %v7880_v16, %v2060_v1  ;;  %v7886_v16 = vld [vmem:[#allocation39_spill] sm:$0xff] }
 0x390   :  { %4256 = vpow2.f32 %v2507_v0  ;;  %v2247_v33 = vsub.f32 %v7881_v59, %v2063_v29  ;;  %v2248_v31 = vsub.f32 %v7882_v30, %v2063_v29  ;;  %2626 = vadd.xlane.f32.xlu0 %v2625_v11  ;;  %v2622_v32 = vadd.f32 %v6389_v23, %v6385_v49  ;;  %v7889_v49 = vld [vmem:[#allocation42_spill] sm:$0xff] }
 0x391   :  { %v6397_v3 = vpop.eup %4238  ;;  %4258 = vpow2.f32 %v2509_v2  ;;  %v2383_v5 = vmul.f32 1.442695, %v2245_v25  ;;  %v2385_v34 = vmul.f32 1.442695, %v2246_v20  ;;  %v7888_v2 = vld [vmem:[#allocation41_spill] sm:$0xff] }
 0x392   :  { %7883 = vst [vmem:[#allocation92_spill] sm:$0xff] %v6397_v3  ;;  %v6399_v56 = vpop.eup %4240  ;;  %4260 = vpow2.f32 %v2505_v43  ;;  %v2387_v14 = vmul.f32 1.442695, %v2247_v33  ;;  %v2389_v36 = vmul.f32 1.442695, %v2248_v31  ;;  %2623 = vadd.xlane.f32.xlu1 %v2622_v32  ;;  %v2156_v1 = vpop.xlane.xlu1 %2155 }
 0x393   :  { %7884 = vst [vmem:[#allocation93_spill] sm:$0xff] %v6399_v56  ;;  %v6401_v0 = vpop.eup %4242  ;;  %4262 = vpow2.f32 %v2383_v5  ;;  %v2159_v29 = vpop.xlane.xlu0 %2158  ;;  %v2309_v11 = vsub.f32 %v5937_v42, %v2156_v1  ;;  %v2310_v59 = vsub.f32 %v7886_v16, %v2156_v1 }
 0x394   :  { %7885 = vst [vmem:[#allocation94_spill] sm:$0xff] %v6401_v0  ;;  %v6405_v30 = vpop.eup %4244  ;;  %4264 = vpow2.f32 %v2387_v14  ;;  %v2311_v25 = vsub.f32 %v7888_v2, %v2159_v29  ;;  %v2312_v43 = vsub.f32 %v7889_v49, %v2159_v29  ;;  %v2721_v31 = vadd.f32 %v6401_v0, %v6399_v56  ;;  %v7892_v29 = vld [vmem:[#allocation18_spill] sm:$0xff] }
 0x395   :  { %7887 = vst [vmem:[#allocation95_spill] sm:$0xff] %v6405_v30  ;;  %v6411_v20 = vpop.eup %4246  ;;  %4266 = vpow2.f32 %v2389_v36  ;;  %v2511_v33 = vmul.f32 1.442695, %v2309_v11  ;;  %v2718_v32 = vadd.f32 %v6405_v30, %v6397_v3  ;;  %v2513_v14 = vmul.f32 1.442695, %v2310_v59  ;;  %v7893_v36 = vld [vmem:[#allocation19_spill] sm:$0xff] }
 0x396   :  { %v6415_v42 = vpop.eup %4248  ;;  %4268 = vpow2.f32 %v2385_v34  ;;  %v2515_v5 = vmul.f32 1.442695, %v2311_v25  ;;  %v2517_v1 = vmul.f32 1.442695, %v2312_v43  ;;  %2722 = vadd.xlane.f32.xlu0 %v2721_v31  ;;  %v2066_v16 = vpop.xlane.xlu1 %2065  ;;  %v7894_v3 = vld [vmem:[#allocation20_spill] sm:$0xff]  ;;  %v7895_v34 = vld [vmem:[#allocation21_spill] sm:$0xff] }
 0x397   :  { %7890 = vst [vmem:[#allocation10_spill] sm:$0xff] %v6415_v42  ;;  %v6417_v2 = vpop.eup %4250  ;;  %4270 = vpow2.f32 %v2511_v33  ;;  %2719 = vadd.xlane.f32.xlu1 %v2718_v32  ;;  %v2069_v49 = vpop.xlane.xlu0 %2068  ;;  %v2249_v56 = vsub.f32 %v7892_v29, %v2066_v16  ;;  %v2250_v11 = vsub.f32 %v7893_v36, %v2066_v16 }
 0x398   :  { %7891 = vst [vmem:[#allocation96_spill] sm:$0xff] %v6417_v2  ;;  %v6421_v0 = vpop.eup %4252  ;;  %4272 = vpow2.f32 %v2515_v5  ;;  %v2251_v30 = vsub.f32 %v7894_v3, %v2069_v49  ;;  %v2252_v25 = vsub.f32 %v7895_v34, %v2069_v49  ;;  %v2631_v59 = vadd.f32 %v6417_v2, %v6415_v42 }
 0x399   :  { %v6427_v43 = vpop.eup %4254  ;;  %4274 = vpow2.f32 %v2517_v1  ;;  %v2391_v31 = vmul.f32 1.442695, %v2249_v56  ;;  %v2628_v33 = vadd.f32 %v6421_v0, %v6411_v20  ;;  %v2393_v5 = vmul.f32 1.442695, %v2250_v11 }
 0x39a   :  { %v6431_v32 = vpop.eup %4256  ;;  %4276 = vpow2.f32 %v2513_v14  ;;  %v2395_v16 = vmul.f32 1.442695, %v2251_v30  ;;  %v2397_v29 = vmul.f32 1.442695, %v2252_v25  ;;  %2632 = vadd.xlane.f32.xlu0 %v2631_v59  ;;  %v2162_v3 = vpop.xlane.xlu1 %2161  ;;  %v7898_v14 = vld [vmem:[#allocation44_spill] sm:$0xff] }
 0x39b   :  { %7896 = vst [vmem:[#allocation97_spill] sm:$0xff] %v6431_v32  ;;  %v6433_v36 = vpop.eup %4258  ;;  %4278 = vpow2.f32 %v2391_v31  ;;  %2629 = vadd.xlane.f32.xlu1 %v2628_v33  ;;  %v2165_v49 = vpop.xlane.xlu0 %2164  ;;  %v2313_v34 = vsub.f32 %v5969_v21, %v2162_v3  ;;  %v2314_v56 = vsub.f32 %v5971_v48, %v2162_v3 }
 0x39c   :  { %7897 = vst [vmem:[#allocation98_spill] sm:$0xff] %v6433_v36  ;;  %v6437_v1 = vpop.eup %4260  ;;  %4280 = vpow2.f32 %v2395_v16  ;;  %v2315_v42 = vsub.f32 %v5973_v6, %v2165_v49  ;;  %v2316_v30 = vsub.f32 %v7898_v14, %v2165_v49  ;;  %v2727_v11 = vadd.f32 %v6433_v36, %v6431_v32  ;;  %v7902_v36 = vld [vmem:[#allocation46_spill] sm:$0xff] }
 0x39d   :  { %v6443_v25 = vpop.eup %4262  ;;  %4282 = vpow2.f32 %v2397_v29  ;;  %v2519_v59 = vmul.f32 1.442695, %v2313_v34  ;;  %v2724_v31 = vadd.f32 %v6437_v1, %v6427_v43  ;;  %v2521_v16 = vmul.f32 1.442695, %v2314_v56  ;;  %v7901_v29 = vld [vmem:[#allocation45_spill] sm:$0xff] }
 0x39e   :  { %v6447_v21 = vpop.eup %4264  ;;  %4284 = vpow2.f32 %v2393_v5  ;;  %v2523_v48 = vmul.f32 1.442695, %v2315_v42  ;;  %v2525_v33 = vmul.f32 1.442695, %v2316_v30  ;;  %2728 = vadd.xlane.f32.xlu0 %v2727_v11  ;;  %v2072_v6 = vpop.xlane.xlu1 %2071  ;;  %v7903_v5 = vld [vmem:[#allocation47_spill] sm:$0xff] }
 0x39f   :  { %7899 = vst [vmem:[#allocation11_spill] sm:$0xff] %v6447_v21  ;;  %v6449_v3 = vpop.eup %4266  ;;  %4286 = vpow2.f32 %v2519_v59  ;;  %2725 = vadd.xlane.f32.xlu1 %v2724_v31  ;;  %v2075_v49 = vpop.xlane.xlu0 %2074  ;;  %v2253_v14 = vsub.f32 %v5985_v55, %v2072_v6  ;;  %v2254_v34 = vsub.f32 %v7901_v29, %v2072_v6 }
 0x3a0   :  { %7900 = vst [vmem:[#allocation12_spill] sm:$0xff] %v6449_v3  ;;  %v6453_v32 = vpop.eup %4268  ;;  %4288 = vpow2.f32 %v2523_v48  ;;  %v2255_v2 = vsub.f32 %v7902_v36, %v2075_v49  ;;  %v2256_v42 = vsub.f32 %v7903_v5, %v2075_v49  ;;  %v2637_v56 = vadd.f32 %v6449_v3, %v6447_v21 }
 0x3a1   :  { %v6459_v30 = vpop.eup %4270  ;;  %4290 = vpow2.f32 %v2525_v33  ;;  %v2399_v11 = vmul.f32 1.442695, %v2253_v14  ;;  %v2634_v59 = vadd.f32 %v6453_v32, %v6443_v25  ;;  %v2401_v48 = vmul.f32 1.442695, %v2254_v34 }
 0x3a2   :  { %v6463_v55 = vpop.eup %4272  ;;  %4292 = vpow2.f32 %v2521_v16  ;;  %v2403_v31 = vmul.f32 1.442695, %v2255_v2  ;;  %v2405_v6 = vmul.f32 1.442695, %v2256_v42  ;;  %2638 = vadd.xlane.f32.xlu0 %v2637_v56  ;;  %v2168_v36 = vpop.xlane.xlu1 %2167  ;;  %v7906_v16 = vld [vmem:[#allocation22_spill] sm:$0xff] }
 0x3a3   :  { %7904 = vst [vmem:[#allocation13_spill] sm:$0xff] %v6463_v55  ;;  %v6465_v29 = vpop.eup %4274  ;;  %4294 = vpow2.f32 %v2399_v11  ;;  %2635 = vadd.xlane.f32.xlu1 %v2634_v59  ;;  %v2171_v49 = vpop.xlane.xlu0 %2170  ;;  %v2317_v5 = vsub.f32 %v6001_v54, %v2168_v36  ;;  %v2318_v33 = vsub.f32 %v6003_v46, %v2168_v36 }
 0x3a4   :  { %7905 = vst [vmem:[#allocation32_spill] sm:$0xff] %v6465_v29  ;;  %v6469_v14 = vpop.eup %4276  ;;  %4296 = vpow2.f32 %v2403_v31  ;;  %v2319_v21 = vsub.f32 %v6005_v61, %v2171_v49  ;;  %v2320_v2 = vsub.f32 %v7906_v16, %v2171_v49  ;;  %v2733_v34 = vadd.f32 %v6465_v29, %v6463_v55  ;;  %v7910_v29 = vld [vmem:[#allocation24_spill] sm:$0xff] }
 0x3a5   :  { %v6475_v42 = vpop.eup %4278  ;;  %4298 = vpow2.f32 %v2405_v6  ;;  %v2527_v56 = vmul.f32 1.442695, %v2317_v5  ;;  %v2730_v11 = vadd.f32 %v6469_v14, %v6459_v30  ;;  %v2529_v31 = vmul.f32 1.442695, %v2318_v33  ;;  %v7909_v6 = vld [vmem:[#allocation23_spill] sm:$0xff] }
 0x3a6   :  { %v6479_v54 = vpop.eup %4280  ;;  %4300 = vpow2.f32 %v2401_v48  ;;  %v2531_v46 = vmul.f32 1.442695, %v2319_v21  ;;  %v2533_v59 = vmul.f32 1.442695, %v2320_v2  ;;  %2734 = vadd.xlane.f32.xlu0 %v2733_v34  ;;  %v2078_v61 = vpop.xlane.xlu1 %2077  ;;  %v7911_v48 = vld [vmem:[#allocation25_spill] sm:$0xff] }
 0x3a7   :  { %7907 = vst [vmem:[#allocation33_spill] sm:$0xff] %v6479_v54  ;;  %v6481_v36 = vpop.eup %4282  ;;  %4302 = vpow2.f32 %v2527_v56  ;;  %2731 = vadd.xlane.f32.xlu1 %v2730_v11  ;;  %v2081_v49 = vpop.xlane.xlu0 %2080  ;;  %v2257_v16 = vsub.f32 %v6017_v26, %v2078_v61  ;;  %v2258_v5 = vsub.f32 %v7909_v6, %v2078_v61 }
 0x3a8   :  { %7908 = vst [vmem:[#allocation35_spill] sm:$0xff] %v6481_v36  ;;  %v6485_v55 = vpop.eup %4284  ;;  %4304 = vpow2.f32 %v2531_v46  ;;  %v2259_v3 = vsub.f32 %v7910_v29, %v2081_v49  ;;  %v2260_v21 = vsub.f32 %v7911_v48, %v2081_v49  ;;  %v2643_v33 = vadd.f32 %v6481_v36, %v6479_v54 }
 0x3a9   :  { %v6491_v2 = vpop.eup %4286  ;;  %4306 = vpow2.f32 %v2533_v59  ;;  %v2407_v34 = vmul.f32 1.442695, %v2257_v16  ;;  %v2640_v56 = vadd.f32 %v6485_v55, %v6475_v42  ;;  %v2409_v46 = vmul.f32 1.442695, %v2258_v5 }
 0x3aa   :  { %v6495_v26 = vpop.eup %4288  ;;  %4308 = vpow2.f32 %v2529_v31  ;;  %v2411_v11 = vmul.f32 1.442695, %v2259_v3  ;;  %v2413_v61 = vmul.f32 1.442695, %v2260_v21  ;;  %2644 = vadd.xlane.f32.xlu0 %v2643_v33  ;;  %v2174_v29 = vpop.xlane.xlu1 %2173  ;;  %v7914_v31 = vld [vmem:[#allocation48_spill] sm:$0xff] }
 0x3ab   :  { %7912 = vst [vmem:[#allocation36_spill] sm:$0xff] %v6495_v26  ;;  %v6497_v6 = vpop.eup %4290  ;;  %4310 = vpow2.f32 %v2407_v34  ;;  %2641 = vadd.xlane.f32.xlu1 %v2640_v56  ;;  %v2177_v49 = vpop.xlane.xlu0 %2176  ;;  %v2321_v48 = vsub.f32 %v6033_v52, %v2174_v29  ;;  %v2322_v59 = vsub.f32 %v6035_v15, %v2174_v29 }
 0x3ac   :  { %7913 = vst [vmem:[#allocation14_spill] sm:$0xff] %v6497_v6  ;;  %v6501_v16 = vpop.eup %4292  ;;  %4312 = vpow2.f32 %v2411_v11  ;;  %v2323_v54 = vsub.f32 %v6037_v10, %v2177_v49  ;;  %v2324_v3 = vsub.f32 %v7914_v31, %v2177_v49  ;;  %v2739_v5 = vadd.f32 %v6497_v6, %v6495_v26  ;;  %v7918_v6 = vld [vmem:[#allocation50_spill] sm:$0xff] }
 0x3ad   :  { %v6507_v21 = vpop.eup %4294  ;;  %4314 = vpow2.f32 %v2413_v61  ;;  %v2535_v33 = vmul.f32 1.442695, %v2321_v48  ;;  %v2736_v34 = vadd.f32 %v6501_v16, %v6491_v2  ;;  %v2537_v11 = vmul.f32 1.442695, %v2322_v59  ;;  %v7917_v61 = vld [vmem:[#allocation49_spill] sm:$0xff] }
 0x3ae   :  { %v6511_v52 = vpop.eup %4296  ;;  %4316 = vpow2.f32 %v2409_v46  ;;  %v2539_v15 = vmul.f32 1.442695, %v2323_v54  ;;  %v2541_v56 = vmul.f32 1.442695, %v2324_v3  ;;  %2740 = vadd.xlane.f32.xlu0 %v2739_v5  ;;  %v2084_v10 = vpop.xlane.xlu1 %2083  ;;  %v7919_v46 = vld [vmem:[#allocation51_spill] sm:$0xff] }
 0x3af   :  { %7915 = vst [vmem:[#allocation15_spill] sm:$0xff] %v6511_v52  ;;  %v6513_v29 = vpop.eup %4298  ;;  %4318 = vpow2.f32 %v2535_v33  ;;  %2737 = vadd.xlane.f32.xlu1 %v2736_v34  ;;  %v2087_v49 = vpop.xlane.xlu0 %2086  ;;  %v2261_v31 = vsub.f32 %v6049_v50, %v2084_v10  ;;  %v2262_v48 = vsub.f32 %v7917_v61, %v2084_v10 }
 0x3b0   :  { %7916 = vst [vmem:[#allocation16_spill] sm:$0xff] %v6513_v29  ;;  %v6517_v26 = vpop.eup %4300  ;;  %4320 = vpow2.f32 %v2539_v15  ;;  %v2263_v36 = vsub.f32 %v7918_v6, %v2087_v49  ;;  %v2264_v54 = vsub.f32 %v7919_v46, %v2087_v49  ;;  %v2649_v59 = vadd.f32 %v6513_v29, %v6511_v52 }
 0x3b1   :  { %v6523_v3 = vpop.eup %4302  ;;  %4322 = vpow2.f32 %v2541_v56  ;;  %v2415_v5 = vmul.f32 1.442695, %v2261_v31  ;;  %v2646_v33 = vadd.f32 %v6517_v26, %v6507_v21  ;;  %v2417_v15 = vmul.f32 1.442695, %v2262_v48 }
 0x3b2   :  { %v6527_v50 = vpop.eup %4304  ;;  %4324 = vpow2.f32 %v2537_v11  ;;  %v2419_v34 = vmul.f32 1.442695, %v2263_v36  ;;  %v2421_v10 = vmul.f32 1.442695, %v2264_v54  ;;  %2650 = vadd.xlane.f32.xlu0 %v2649_v59  ;;  %v2180_v6 = vpop.xlane.xlu1 %2179  ;;  %v7922_v11 = vld [vmem:[#allocation26_spill] sm:$0xff] }
 0x3b3   :  { %7920 = vst [vmem:[#allocation17_spill] sm:$0xff] %v6527_v50  ;;  %v6529_v61 = vpop.eup %4306  ;;  %4326 = vpow2.f32 %v2415_v5  ;;  %2647 = vadd.xlane.f32.xlu1 %v2646_v33  ;;  %v2183_v49 = vpop.xlane.xlu0 %2182  ;;  %v2325_v46 = vsub.f32 %v6065_v7, %v2180_v6  ;;  %v2326_v56 = vsub.f32 %v6067_v60, %v2180_v6 }
 0x3b4   :  { %7921 = vst [vmem:[#allocation37_spill] sm:$0xff] %v6529_v61  ;;  %v6533_v31 = vpop.eup %4308  ;;  %4328 = vpow2.f32 %v2419_v34  ;;  %v2327_v52 = vsub.f32 %v6069_v47, %v2183_v49  ;;  %v2328_v36 = vsub.f32 %v7922_v11, %v2183_v49  ;;  %v2745_v48 = vadd.f32 %v6529_v61, %v6527_v50  ;;  %v7927_v61 = vld [vmem:[#allocation28_spill] sm:$0xff] }
 0x3b5   :  { %v6539_v54 = vpop.eup %4310  ;;  %4330 = vpow2.f32 %v2421_v10  ;;  %v2543_v59 = vmul.f32 1.442695, %v2325_v46  ;;  %v2742_v5 = vadd.f32 %v6533_v31, %v6523_v3  ;;  %v2545_v34 = vmul.f32 1.442695, %v2326_v56  ;;  %v7926_v10 = vld [vmem:[#allocation27_spill] sm:$0xff] }
 0x3b6   :  { %7923 = vst [vmem:[#allocation39_spill] sm:$0xff] %v6539_v54  ;;  %v6543_v7 = vpop.eup %4312  ;;  %4332 = vpow2.f32 %v2417_v15  ;;  %v2547_v60 = vmul.f32 1.442695, %v2327_v52  ;;  %v2549_v33 = vmul.f32 1.442695, %v2328_v36  ;;  %2746 = vadd.xlane.f32.xlu0 %v2745_v48  ;;  %v2090_v47 = vpop.xlane.xlu1 %2089  ;;  %v7928_v15 = vld [vmem:[#allocation52_spill] sm:$0xff] }
 0x3b7   :  { %7924 = vst [vmem:[#allocation41_spill] sm:$0xff] %v6543_v7  ;;  %v6545_v6 = vpop.eup %4314  ;;  %4334 = vpow2.f32 %v2543_v59  ;;  %2743 = vadd.xlane.f32.xlu1 %v2742_v5  ;;  %v2093_v49 = vpop.xlane.xlu0 %2092  ;;  %v2265_v11 = vsub.f32 %v6081_v51, %v2090_v47  ;;  %v2266_v46 = vsub.f32 %v7926_v10, %v2090_v47 }
 0x3b8   :  { %7925 = vst [vmem:[#allocation42_spill] sm:$0xff] %v6545_v6  ;;  %v6549_v50 = vpop.eup %4316  ;;  %4336 = vpow2.f32 %v2547_v60  ;;  %v2267_v29 = vsub.f32 %v7927_v61, %v2093_v49  ;;  %v2268_v52 = vsub.f32 %v7928_v15, %v2093_v49  ;;  %v2655_v56 = vadd.f32 %v6545_v6, %v6543_v7  ;;  %v7934_v6 = vld [vmem:[#allocation56_spill] sm:$0xff] }
 0x3b9   :  { %v6555_v36 = vpop.eup %4318  ;;  %4338 = vpow2.f32 %v2549_v33  ;;  %v2423_v48 = vmul.f32 1.442695, %v2265_v11  ;;  %v2652_v59 = vadd.f32 %v6549_v50, %v6539_v54  ;;  %v2425_v60 = vmul.f32 1.442695, %v2266_v46  ;;  %v7932_v33 = vld [vmem:[#allocation54_spill] sm:$0xff] }
 0x3ba   :  { %7929 = vst [vmem:[#allocation18_spill] sm:$0xff] %v6555_v36  ;;  %v6559_v51 = vpop.eup %4320  ;;  %4340 = vpow2.f32 %v2545_v34  ;;  %v2427_v5 = vmul.f32 1.442695, %v2267_v29  ;;  %v2429_v47 = vmul.f32 1.442695, %v2268_v52  ;;  %2656 = vadd.xlane.f32.xlu0 %v2655_v56  ;;  %v2186_v61 = vpop.xlane.xlu1 %2185  ;;  %v7935_v34 = vld [vmem:[#allocation58_spill] sm:$0xff] }
 0x3bb   :  { %7930 = vst [vmem:[#allocation19_spill] sm:$0xff] %v6559_v51  ;;  %v6561_v10 = vpop.eup %4322  ;;  %4342 = vpow2.f32 %v2423_v48  ;;  %2653 = vadd.xlane.f32.xlu1 %v2652_v59  ;;  %v2189_v49 = vpop.xlane.xlu0 %2188  ;;  %v2329_v15 = vsub.f32 %v6097_v39, %v2186_v61  ;;  %v2330_v11 = vsub.f32 %v7932_v33, %v2186_v61 }
 0x3bc   :  { %7931 = vst [vmem:[#allocation20_spill] sm:$0xff] %v6561_v10  ;;  %v6565_v7 = vpop.eup %4324  ;;  %4344 = vpow2.f32 %v2427_v5  ;;  %v2331_v54 = vsub.f32 %v7934_v6, %v2189_v49  ;;  %v2332_v29 = vsub.f32 %v7935_v34, %v2189_v49  ;;  %v2751_v46 = vadd.f32 %v6561_v10, %v6559_v51  ;;  %v7937_v34 = vld [vmem:[#allocation29_spill] sm:$0xff] }
 0x3bd   :  { %7933 = vst [vmem:[#allocation21_spill] sm:$0xff] %v6565_v7  ;;  %v6571_v52 = vpop.eup %4326  ;;  %4346 = vpow2.f32 %v2429_v47  ;;  %v2551_v56 = vmul.f32 1.442695, %v2329_v15  ;;  %v2748_v48 = vadd.f32 %v6565_v7, %v6555_v36  ;;  %v2553_v5 = vmul.f32 1.442695, %v2330_v11  ;;  %v7938_v47 = vld [vmem:[#allocation60_spill] sm:$0xff] }
 0x3be   :  { %v6575_v39 = vpop.eup %4328  ;;  %4348 = vpow2.f32 %v2425_v60  ;;  %v2555_v59 = vmul.f32 1.442695, %v2331_v54  ;;  %v2557_v61 = vmul.f32 1.442695, %v2332_v29  ;;  %2752 = vadd.xlane.f32.xlu0 %v2751_v46  ;;  %v2096_v6 = vpop.xlane.xlu1 %2095  ;;  %v7939_v36 = vld [vmem:[#allocation61_spill] sm:$0xff]  ;;  %v7940_v60 = vld [vmem:[#allocation62_spill] sm:$0xff] }
 0x3bf   :  { %7936 = vst [vmem:[#allocation44_spill] sm:$0xff] %v6575_v39  ;;  %v6577_v33 = vpop.eup %4330  ;;  %4350 = vpow2.f32 %v2551_v56  ;;  %2749 = vadd.xlane.f32.xlu1 %v2748_v48  ;;  %v2099_v49 = vpop.xlane.xlu0 %2098  ;;  %v2269_v51 = vsub.f32 %v7937_v34, %v2096_v6  ;;  %v2270_v15 = vsub.f32 %v7938_v47, %v2096_v6 }
 0x3c0   :  { %v6581_v10 = vpop.eup %4332  ;;  %4352 = vpow2.f32 %v2555_v59  ;;  %v2271_v7 = vsub.f32 %v7939_v36, %v2099_v49  ;;  %v2272_v54 = vsub.f32 %v7940_v60, %v2099_v49  ;;  %v2661_v11 = vadd.f32 %v6577_v33, %v6575_v39 }
 0x3c1   :  { %v6587_v29 = vpop.eup %4334  ;;  %4354 = vpow2.f32 %v2557_v61  ;;  %v2431_v46 = vmul.f32 1.442695, %v2269_v51  ;;  %v2658_v56 = vadd.f32 %v6581_v10, %v6571_v52  ;;  %v2433_v59 = vmul.f32 1.442695, %v2270_v15 }
 0x3c2   :  { %v6591_v48 = vpop.eup %4336  ;;  %4356 = vpow2.f32 %v2553_v5  ;;  %v2435_v6 = vmul.f32 1.442695, %v2271_v7  ;;  %v2437_v34 = vmul.f32 1.442695, %v2272_v54  ;;  %2662 = vadd.xlane.f32.xlu0 %v2661_v11  ;;  %v2192_v36 = vpop.xlane.xlu1 %2191  ;;  %v7943_v5 = vld [vmem:[#allocation30_spill] sm:$0xff] }
 0x3c3   :  { %7941 = vst [vmem:[#allocation45_spill] sm:$0xff] %v6591_v48  ;;  %v6593_v47 = vpop.eup %4338  ;;  %4358 = vpow2.f32 %v2431_v46  ;;  %2659 = vadd.xlane.f32.xlu1 %v2658_v56  ;;  %v2195_v49 = vpop.xlane.xlu0 %2194  ;;  %v2333_v60 = vsub.f32 %v6129_v40, %v2192_v36  ;;  %v2334_v51 = vsub.f32 %v6131_v53, %v2192_v36 }
 0x3c4   :  { %7942 = vst [vmem:[#allocation46_spill] sm:$0xff] %v6593_v47  ;;  %v6597_v61 = vpop.eup %4340  ;;  %4360 = vpow2.f32 %v2435_v6  ;;  %v2335_v39 = vsub.f32 %v6133_v12, %v2195_v49  ;;  %v2336_v7 = vsub.f32 %v7943_v5, %v2195_v49  ;;  %v2757_v15 = vadd.f32 %v6593_v47, %v6591_v48  ;;  %v7945_v48 = vld [vmem:[#allocation63_spill] sm:$0xff] }
 0x3c5   :  { %v6603_v54 = vpop.eup %4342  ;;  %4362 = vpow2.f32 %v2437_v34  ;;  %v2559_v11 = vmul.f32 1.442695, %v2333_v60  ;;  %v2754_v46 = vadd.f32 %v6597_v61, %v6587_v29  ;;  %v2561_v6 = vmul.f32 1.442695, %v2334_v51 }
 0x3c6   :  { %v6607_v40 = vpop.eup %4344  ;;  %4364 = vpow2.f32 %v2433_v59  ;;  %v2563_v53 = vmul.f32 1.442695, %v2335_v39  ;;  %v2565_v56 = vmul.f32 1.442695, %v2336_v7  ;;  %2758 = vadd.xlane.f32.xlu0 %v2757_v15  ;;  %v2102_v12 = vpop.xlane.xlu1 %2101  ;;  %v7946_v59 = vld [vmem:[#allocation64_spill] sm:$0xff] }
 0x3c7   :  { %7944 = vst [vmem:[#allocation47_spill] sm:$0xff] %v6607_v40  ;;  %v6609_v36 = vpop.eup %4346  ;;  %4366 = vpow2.f32 %v2559_v11  ;;  %2755 = vadd.xlane.f32.xlu1 %v2754_v46  ;;  %v2105_v49 = vpop.xlane.xlu0 %2104  ;;  %v2273_v5 = vsub.f32 %v6145_v35, %v2102_v12  ;;  %v2274_v34 = vsub.f32 %v6147_v41, %v2102_v12 }
 0x3c8   :  { %v6613_v60 = vpop.eup %4348  ;;  %4368 = vpow2.f32 %v2563_v53  ;;  %v2275_v47 = vsub.f32 %v7945_v48, %v2105_v49  ;;  %v2276_v39 = vsub.f32 %v7946_v59, %v2105_v49  ;;  %v2667_v51 = vadd.f32 %v6609_v36, %v6607_v40 }
 0x3c9   :  { %v6619_v7 = vpop.eup %4350  ;;  %4370 = vpow2.f32 %v2565_v56  ;;  %v2439_v15 = vmul.f32 1.442695, %v2273_v5  ;;  %v2664_v11 = vadd.f32 %v6613_v60, %v6603_v54  ;;  %v2441_v53 = vmul.f32 1.442695, %v2274_v34 }
 0x3ca   :  { %v6623_v35 = vpop.eup %4352  ;;  %4372 = vpow2.f32 %v2561_v6  ;;  %v2443_v41 = vmul.f32 1.442695, %v2275_v47  ;;  %v2445_v46 = vmul.f32 1.442695, %v2276_v39  ;;  %2668 = vadd.xlane.f32.xlu0 %v2667_v51  ;;  %v2198_v48 = vpop.xlane.xlu1 %2197 }
 0x3cb   :  { %7947 = vst [vmem:[#allocation22_spill] sm:$0xff] %v6623_v35  ;;  %v6625_v12 = vpop.eup %4354  ;;  %4374 = vpow2.f32 %v2439_v15  ;;  %2665 = vadd.xlane.f32.xlu1 %v2664_v11  ;;  %v2201_v49 = vpop.xlane.xlu0 %2200  ;;  %v2337_v59 = vsub.f32 %v6161_v38, %v2198_v48  ;;  %v2338_v56 = vsub.f32 %v6163_v18, %v2198_v48 }
 0x3cc   :  { %7948 = vst [vmem:[#allocation23_spill] sm:$0xff] %v6625_v12  ;;  %v6629_v5 = vpop.eup %4356  ;;  %4376 = vpow2.f32 %v2443_v41  ;;  %v2339_v40 = vsub.f32 %v6165_v27, %v2201_v49  ;;  %v2340_v47 = vsub.f32 %v6167_v44, %v2201_v49  ;;  %v2763_v6 = vadd.f32 %v6625_v12, %v6623_v35  ;;  %v7958_v35 = vld [vmem:[#allocation67_spill] sm:$0xff] }
 0x3cd   :  { %v6635_v34 = vpop.eup %4358  ;;  %4378 = vpow2.f32 %v2445_v46  ;;  %v2567_v39 = vmul.f32 1.442695, %v2337_v59  ;;  %v2760_v51 = vadd.f32 %v6629_v5, %v6619_v7  ;;  %v2569_v11 = vmul.f32 1.442695, %v2338_v56 }
 0x3ce   :  { %v6639_v38 = vpop.eup %4360  ;;  %4380 = vpow2.f32 %v2441_v53  ;;  %v2571_v18 = vmul.f32 1.442695, %v2339_v40  ;;  %v2573_v15 = vmul.f32 1.442695, %v2340_v47  ;;  %2764 = vadd.xlane.f32.xlu0 %v2763_v6  ;;  %v2108_v27 = vpop.xlane.xlu1 %2107  ;;  %v7951_v53 = vld [vmem:[#allocation65_spill] sm:$0xff] }
 0x3cf   :  { %7949 = vst [vmem:[#allocation24_spill] sm:$0xff] %v6639_v38  ;;  %v6641_v41 = vpop.eup %4362  ;;  %4382 = vpow2.f32 %v2567_v39  ;;  %2761 = vadd.xlane.f32.xlu1 %v2760_v51  ;;  %v2111_v44 = vpop.xlane.xlu0 %2110  ;;  %v2277_v48 = vsub.f32 %v6177_v63, %v2108_v27  ;;  %v2278_v46 = vsub.f32 %v6179_v22, %v2108_v27 }
 0x3d0   :  { %7950 = vst [vmem:[#allocation25_spill] sm:$0xff] %v6641_v41  ;;  %v6645_v49 = vpop.eup %4364  ;;  %4384 = vpow2.f32 %v2571_v18  ;;  %v2279_v59 = vsub.f32 %v6181_v4, %v2111_v44  ;;  %v2280_v40 = vsub.f32 %v7951_v53, %v2111_v44  ;;  %v2673_v56 = vadd.f32 %v6641_v41, %v6639_v38  ;;  %v7955_v53 = vld [vmem:[#allocation31_spill] sm:$0xff] }
 0x3d1   :  { %v6651_v47 = vpop.eup %4366  ;;  %4386 = vpow2.f32 %v2573_v15  ;;  %v2447_v6 = vmul.f32 1.442695, %v2277_v48  ;;  %v2670_v39 = vadd.f32 %v6645_v49, %v6635_v34  ;;  %v2449_v18 = vmul.f32 1.442695, %v2278_v46  ;;  %v7956_v15 = vld [vmem:[#allocation66_spill] sm:$0xff] }
 0x3d2   :  { %7952 = vst [vmem:[#allocation48_spill] sm:$0xff] %v6651_v47  ;;  %v6655_v63 = vpop.eup %4368  ;;  %4388 = vpow2.f32 %v2569_v11  ;;  %v2451_v22 = vmul.f32 1.442695, %v2279_v59  ;;  %v2453_v51 = vmul.f32 1.442695, %v2280_v40  ;;  %2674 = vadd.xlane.f32.xlu0 %v2673_v56  ;;  %v2204_v4 = vpop.xlane.xlu1 %2203  ;;  %v7959_v11 = vld [vmem:[#allocation68_spill] sm:$0xff] }
 0x3d3   :  { %7953 = vst [vmem:[#allocation49_spill] sm:$0xff] %v6655_v63  ;;  %v6657_v27 = vpop.eup %4370  ;;  %4390 = vpow2.f32 %v2447_v6  ;;  %2671 = vadd.xlane.f32.xlu1 %v2670_v39  ;;  %v2207_v44 = vpop.xlane.xlu0 %2206  ;;  %v2341_v38 = vsub.f32 %v7955_v53, %v2204_v4  ;;  %v2342_v48 = vsub.f32 %v7956_v15, %v2204_v4 }
 0x3d4   :  { %7954 = vst [vmem:[#allocation50_spill] sm:$0xff] %v6657_v27  ;;  %v6661_v41 = vpop.eup %4372  ;;  %4392 = vpow2.f32 %v2451_v22  ;;  %v2343_v12 = vsub.f32 %v7958_v35, %v2207_v44  ;;  %v2344_v59 = vsub.f32 %v7959_v11, %v2207_v44  ;;  %v2769_v46 = vadd.f32 %v6657_v27, %v6655_v63  ;;  %v7961_v11 = vld [vmem:[#allocation34_spill] sm:$0xff] }
 0x3d5   :  { %7957 = vst [vmem:[#allocation51_spill] sm:$0xff] %v6661_v41  ;;  %v6667_v40 = vpop.eup %4374  ;;  %4394 = vpow2.f32 %v2453_v51  ;;  %v2575_v56 = vmul.f32 1.442695, %v2341_v38  ;;  %v2766_v6 = vadd.f32 %v6661_v41, %v6651_v47  ;;  %v2577_v22 = vmul.f32 1.442695, %v2342_v48  ;;  %v7962_v51 = vld [vmem:[#allocation69_spill] sm:$0xff] }
 0x3d6   :  { %v6671_v39 = vpop.eup %4376  ;;  %4396 = vpow2.f32 %v2449_v18  ;;  %v2579_v4 = vmul.f32 1.442695, %v2343_v12  ;;  %v2581_v53 = vmul.f32 1.442695, %v2344_v59  ;;  %2770 = vadd.xlane.f32.xlu0 %v2769_v46  ;;  %v2114_v35 = vpop.xlane.xlu1 %2113  ;;  %v7963_v47 = vld [vmem:[#allocation70_spill] sm:$0xff]  ;;  %v7964_v18 = vld [vmem:[#allocation71_spill] sm:$0xff] }
 0x3d7   :  { %7960 = vst [vmem:[#allocation26_spill] sm:$0xff] %v6671_v39  ;;  %v6673_v15 = vpop.eup %4378  ;;  %4398 = vpow2.f32 %v2575_v56  ;;  %2767 = vadd.xlane.f32.xlu1 %v2766_v6  ;;  %v2117_v44 = vpop.xlane.xlu0 %2116  ;;  %v2281_v63 = vsub.f32 %v7961_v11, %v2114_v35  ;;  %v2282_v38 = vsub.f32 %v7962_v51, %v2114_v35 }
 0x3d8   :  { %v6677_v27 = vpop.eup %4380  ;;  %4400 = vpow2.f32 %v2579_v4  ;;  %v2283_v41 = vsub.f32 %v7963_v47, %v2117_v44  ;;  %v2284_v12 = vsub.f32 %v7964_v18, %v2117_v44  ;;  %v2679_v48 = vadd.f32 %v6673_v15, %v6671_v39 }
 0x3d9   :  { %v6683_v59 = vpop.eup %4382  ;;  %4402 = vpow2.f32 %v2581_v53  ;;  %v2455_v46 = vmul.f32 1.442695, %v2281_v63  ;;  %v2676_v56 = vadd.f32 %v6677_v27, %v6667_v40  ;;  %v2457_v4 = vmul.f32 1.442695, %v2282_v38 }
 0x3da   :  { %v6687_v6 = vpop.eup %4384  ;;  %4404 = vpow2.f32 %v2577_v22  ;;  %v2459_v35 = vmul.f32 1.442695, %v2283_v41  ;;  %v2461_v11 = vmul.f32 1.442695, %v2284_v12  ;;  %2680 = vadd.xlane.f32.xlu0 %v2679_v48  ;;  %v2210_v47 = vpop.xlane.xlu1 %2209  ;;  %v7967_v22 = vld [vmem:[#allocation38_spill] sm:$0xff] }
 0x3db   :  { %7965 = vst [vmem:[#allocation27_spill] sm:$0xff] %v6687_v6  ;;  %v6689_v51 = vpop.eup %4386  ;;  %4406 = vpow2.f32 %v2455_v46  ;;  %2677 = vadd.xlane.f32.xlu1 %v2676_v56  ;;  %v2213_v44 = vpop.xlane.xlu0 %2212  ;;  %v2345_v18 = vsub.f32 %v6225_v57, %v2210_v47  ;;  %v2346_v63 = vsub.f32 %v6227_v58, %v2210_v47 }
 0x3dc   :  { %7966 = vst [vmem:[#allocation28_spill] sm:$0xff] %v6689_v51  ;;  %v6693_v53 = vpop.eup %4388  ;;  %4408 = vpow2.f32 %v2459_v35  ;;  %v2347_v39 = vsub.f32 %v6229_v19, %v2213_v44  ;;  %v2348_v41 = vsub.f32 %v7967_v22, %v2213_v44  ;;  %v2775_v38 = vadd.f32 %v6689_v51, %v6687_v6 }
 0x3dd   :  { %v6699_v12 = vpop.eup %4390  ;;  %4410 = vpow2.f32 %v2461_v11  ;;  %v2583_v48 = vmul.f32 1.442695, %v2345_v18  ;;  %v2772_v46 = vadd.f32 %v6693_v53, %v6683_v59  ;;  %v2585_v35 = vmul.f32 1.442695, %v2346_v63 }
 0x3de   :  { %v6703_v57 = vpop.eup %4392  ;;  %4412 = vpow2.f32 %v2457_v4  ;;  %v2587_v58 = vmul.f32 1.442695, %v2347_v39  ;;  %v2589_v56 = vmul.f32 1.442695, %v2348_v41  ;;  %2776 = vadd.xlane.f32.xlu0 %v2775_v38  ;;  %v2120_v19 = vpop.xlane.xlu1 %2119  ;;  %v7970_v4 = vld [vmem:[#allocation40_spill] sm:$0xff] }
 0x3df   :  { %7968 = vst [vmem:[#allocation52_spill] sm:$0xff] %v6703_v57  ;;  %v6705_v47 = vpop.eup %4394  ;;  %4414 = vpow2.f32 %v2583_v48  ;;  %2773 = vadd.xlane.f32.xlu1 %v2772_v46  ;;  %v2123_v44 = vpop.xlane.xlu0 %2122  ;;  %v2285_v22 = vsub.f32 %v6241_v45, %v2120_v19  ;;  %v2286_v11 = vsub.f32 %v6243_v17, %v2120_v19 }
 0x3e0   :  { %7969 = vst [vmem:[#allocation54_spill] sm:$0xff] %v6705_v47  ;;  %v6709_v18 = vpop.eup %4396  ;;  %4416 = vpow2.f32 %v2587_v58  ;;  %v2287_v6 = vsub.f32 %v6245_v62, %v2123_v44  ;;  %v2288_v39 = vsub.f32 %v7970_v4, %v2123_v44  ;;  %v2685_v63 = vadd.f32 %v6705_v47, %v6703_v57  ;;  %v7976_v47 = vld [vmem:[#allocation72_spill] sm:$0xff] }
 0x3e1   :  { %v6715_v41 = vpop.eup %4398  ;;  %4418 = vpow2.f32 %v2589_v56  ;;  %v2463_v38 = vmul.f32 1.442695, %v2285_v22  ;;  %v2682_v48 = vadd.f32 %v6709_v18, %v6699_v12  ;;  %v2465_v58 = vmul.f32 1.442695, %v2286_v11  ;;  %v7974_v56 = vld [vmem:[#allocation43_spill] sm:$0xff] }
 0x3e2   :  { %7971 = vst [vmem:[#allocation56_spill] sm:$0xff] %v6715_v41  ;;  %v6719_v45 = vpop.eup %4400  ;;  %4420 = vpow2.f32 %v2585_v35  ;;  %v2467_v17 = vmul.f32 1.442695, %v2287_v6  ;;  %v2469_v46 = vmul.f32 1.442695, %v2288_v39  ;;  %2686 = vadd.xlane.f32.xlu0 %v2685_v63  ;;  %v2216_v62 = vpop.xlane.xlu1 %2215  ;;  %v7977_v35 = vld [vmem:[#allocation73_spill] sm:$0xff] }
 0x3e3   :  { %7972 = vst [vmem:[#allocation58_spill] sm:$0xff] %v6719_v45  ;;  %v6721_v19 = vpop.eup %4402  ;;  %4422 = vpow2.f32 %v2463_v38  ;;  %2683 = vadd.xlane.f32.xlu1 %v2682_v48  ;;  %v2219_v44 = vpop.xlane.xlu0 %2218  ;;  %v2349_v4 = vsub.f32 %v6257_v24, %v2216_v62  ;;  %v2350_v22 = vsub.f32 %v7974_v56, %v2216_v62 }
 0x3e4   :  { %7973 = vst [vmem:[#allocation29_spill] sm:$0xff] %v6721_v19  ;;  %v6725_v57 = vpop.eup %4404  ;;  %4424 = vpow2.f32 %v2467_v17  ;;  %v2351_v51 = vsub.f32 %v7976_v47, %v2219_v44  ;;  %v2352_v6 = vsub.f32 %v7977_v35, %v2219_v44  ;;  %v2781_v11 = vadd.f32 %v6721_v19, %v6719_v45  ;;  %v7980_v35 = vld [vmem:[#allocation74_spill] sm:$0xff] }
 0x3e5   :  { %7975 = vst [vmem:[#allocation60_spill] sm:$0xff] %v6725_v57  ;;  %v6731_v39 = vpop.eup %4406  ;;  %4426 = vpow2.f32 %v2469_v46  ;;  %v2591_v63 = vmul.f32 1.442695, %v2349_v4  ;;  %v2778_v38 = vadd.f32 %v6725_v57, %v6715_v41  ;;  %v2593_v17 = vmul.f32 1.442695, %v2350_v22  ;;  %v7981_v46 = vld [vmem:[#allocation75_spill] sm:$0xff] }
 0x3e6   :  { %v6735_v24 = vpop.eup %4408  ;;  %4428 = vpow2.f32 %v2465_v58  ;;  %v2595_v48 = vmul.f32 1.442695, %v2351_v51  ;;  %v2597_v62 = vmul.f32 1.442695, %v2352_v6  ;;  %2782 = vadd.xlane.f32.xlu0 %v2781_v11  ;;  %v2126_v47 = vpop.xlane.xlu1 %2125  ;;  %v7982_v41 = vld [vmem:[#allocation76_spill] sm:$0xff]  ;;  %v7983_v58 = vld [vmem:[#allocation77_spill] sm:$0xff] }
 0x3e7   :  { %7978 = vst [vmem:[#allocation61_spill] sm:$0xff] %v6735_v24  ;;  %v6737_v56 = vpop.eup %4410  ;;  %4430 = vpow2.f32 %v2591_v63  ;;  %2779 = vadd.xlane.f32.xlu1 %v2778_v38  ;;  %v2129_v44 = vpop.xlane.xlu0 %2128  ;;  %v2289_v45 = vsub.f32 %v7980_v35, %v2126_v47  ;;  %v2290_v4 = vsub.f32 %v7981_v46, %v2126_v47 }
 0x3e8   :  { %7979 = vst [vmem:[#allocation62_spill] sm:$0xff] %v6737_v56  ;;  %v6741_v19 = vpop.eup %4412  ;;  %4432 = vpow2.f32 %v2595_v48  ;;  %v2291_v57 = vsub.f32 %v7982_v41, %v2129_v44  ;;  %v2292_v51 = vsub.f32 %v7983_v58, %v2129_v44  ;;  %v2691_v22 = vadd.f32 %v6737_v56, %v6735_v24  ;;  %v7987_v24 = vld [vmem:[#allocation78_spill] sm:$0xff] }
 0x3e9   :  { %v6747_v6 = vpop.eup %4414  ;;  %4434 = vpow2.f32 %v2597_v62  ;;  %v2471_v11 = vmul.f32 1.442695, %v2289_v45  ;;  %v2688_v63 = vadd.f32 %v6741_v19, %v6731_v39  ;;  %v2473_v48 = vmul.f32 1.442695, %v2290_v4 }
 0x3ea   :  { %7984 = vst [vmem:[#allocation30_spill] sm:$0xff] %v6747_v6  ;;  %v6751_v38 = vpop.eup %4416  ;;  %4436 = vpow2.f32 %v2593_v17  ;;  %v2475_v47 = vmul.f32 1.442695, %v2291_v57  ;;  %v2477_v35 = vmul.f32 1.442695, %v2292_v51  ;;  %2692 = vadd.xlane.f32.xlu0 %v2691_v22  ;;  %v2222_v41 = vpop.xlane.xlu1 %2221  ;;  %v7988_v17 = vld [vmem:[#allocation79_spill] sm:$0xff] }
 0x3eb   :  { %7985 = vst [vmem:[#allocation63_spill] sm:$0xff] %v6751_v38  ;;  %v6753_v46 = vpop.eup %4418  ;;  %4438 = vpow2.f32 %v2471_v11  ;;  %2689 = vadd.xlane.f32.xlu1 %v2688_v63  ;;  %v2225_v44 = vpop.xlane.xlu0 %2224  ;;  %v2353_v58 = vsub.f32 %v6289_v28, %v2222_v41  ;;  %v2354_v45 = vsub.f32 %v6293_v9, %v2222_v41 }
 0x3ec   :  { %7986 = vst [vmem:[#allocation64_spill] sm:$0xff] %v6753_v46  ;;  %v6757_v62 = vpop.eup %4420  ;;  %4440 = vpow2.f32 %v2475_v47  ;;  %v2355_v56 = vsub.f32 %v7987_v24, %v2225_v44  ;;  %v2356_v57 = vsub.f32 %v7988_v17, %v2225_v44  ;;  %v2787_v4 = vadd.f32 %v6753_v46, %v6751_v38  ;;  %v7992_v46 = vld [vmem:[#allocation85_spill] sm:$0xff] }
 0x3ed   :  { %v6763_v51 = vpop.eup %4422  ;;  %4442 = vpow2.f32 %v2477_v35  ;;  %v2599_v22 = vmul.f32 1.442695, %v2353_v58  ;;  %v2784_v11 = vadd.f32 %v6757_v62, %v6747_v6  ;;  %v2601_v47 = vmul.f32 1.442695, %v2354_v45  ;;  %v7991_v35 = vld [vmem:[#allocation84_spill] sm:$0xff] }
 0x3ee   :  { %v6767_v28 = vpop.eup %4424  ;;  %4444 = vpow2.f32 %v2473_v48  ;;  %v2603_v9 = vmul.f32 1.442695, %v2355_v56  ;;  %v2605_v63 = vmul.f32 1.442695, %v2356_v57  ;;  %2788 = vadd.xlane.f32.xlu0 %v2787_v4  ;;  %v2132_v24 = vpop.xlane.xlu1 %2131  ;;  %v7993_v48 = vld [vmem:[#allocation53_spill] sm:$0xff] }
 0x3ef   :  { %7989 = vst [vmem:[#allocation65_spill] sm:$0xff] %v6767_v28  ;;  %v6769_v41 = vpop.eup %4426  ;;  %4446 = vpow2.f32 %v2599_v22  ;;  %2785 = vadd.xlane.f32.xlu1 %v2784_v11  ;;  %v2293_v17 = vsub.f32 %v6307_v13, %v2132_v24  ;;  %v2294_v58 = vsub.f32 %v7991_v35, %v2132_v24 }
 0x3f0   :  { %7990 = vst [vmem:[#allocation31_spill] sm:$0xff] %v6769_v41  ;;  %v2135_v44 = vpop.xlane.xlu0 %2134  ;;  %v6773_v38 = vpop.eup %4428  ;;  %4448 = vpow2.f32 %v2603_v9  ;;  %v2697_v45 = vadd.f32 %v6769_v41, %v6767_v28  ;;  %v7998_v28 = vld [vmem:[#allocation55_spill] sm:$0xff] }
 0x3f1   :  { %v2295_v6 = vsub.f32 %v7992_v46, %v2135_v44  ;;  %v2296_v56 = vsub.f32 %v7993_v48, %v2135_v44  ;;  %v6779_v57 = vpop.eup %4430  ;;  %4450 = vpow2.f32 %v2605_v63  ;;  %v2479_v4 = vmul.f32 1.442695, %v2293_v17 }
 0x3f2   :  { %7994 = vst [vmem:[#allocation66_spill] sm:$0xff] %v6779_v57  ;;  %v2694_v22 = vadd.f32 %v6773_v38, %v6763_v51  ;;  %v6783_v13 = vpop.eup %4432  ;;  %4452 = vpow2.f32 %v2601_v47  ;;  %v2481_v9 = vmul.f32 1.442695, %v2294_v58  ;;  %2698 = vadd.xlane.f32.xlu0 %v2697_v45  ;;  %v2228_v46 = vpop.xlane.xlu1 %2227  ;;  %v7999_v47 = vld [vmem:[#allocation57_spill] sm:$0xff] }
 0x3f3   :  { %7995 = vst [vmem:[#allocation67_spill] sm:$0xff] %v6783_v13  ;;  %v2483_v11 = vmul.f32 1.442695, %v2295_v6  ;;  %v2485_v24 = vmul.f32 1.442695, %v2296_v56  ;;  %v6785_v35 = vpop.eup %4434  ;;  %4454 = vpow2.f32 %v2479_v4  ;;  %v2357_v48 = vsub.f32 %v6323_v8, %v2228_v46 }
 0x3f4   :  { %7996 = vst [vmem:[#allocation68_spill] sm:$0xff] %v6785_v35  ;;  %2695 = vadd.xlane.f32.xlu1 %v2694_v22  ;;  %v2231_v44 = vpop.xlane.xlu0 %2230  ;;  %v2358_v63 = vsub.f32 %v6325_v37, %v2228_v46  ;;  %v6789_v17 = vpop.eup %4436  ;;  %v2793_v58 = vadd.f32 %v6785_v35, %v6783_v13  ;;  %v8004_v13 = vld [vmem:[#allocation80_spill] sm:$0xff] }
 0x3f5   :  { %7997 = vst [vmem:[#allocation34_spill] sm:$0xff] %v6789_v17  ;;  %4456 = vpow2.f32 %v2483_v11  ;;  %v2359_v41 = vsub.f32 %v7998_v28, %v2231_v44  ;;  %v2360_v6 = vsub.f32 %v7999_v47, %v2231_v44  ;;  %v6795_v56 = vpop.eup %4438  ;;  %v2607_v45 = vmul.f32 1.442695, %v2357_v48  ;;  %v8003_v44 = vld [vmem:[#allocation59_spill] sm:$0xff] }
 0x3f6   :  { %8000 = vst [vmem:[#allocation69_spill] sm:$0xff] %v6795_v56  ;;  %4458 = vpow2.f32 %v2485_v24  ;;  %v2790_v4 = vadd.f32 %v6789_v17, %v6779_v57  ;;  %v6799_v8 = vpop.eup %4440  ;;  %v2609_v11 = vmul.f32 1.442695, %v2358_v63  ;;  %2794 = vadd.xlane.f32.xlu0 %v2793_v58  ;;  %v2138_v28 = vpop.xlane.xlu1 %2137 }
 0x3f7   :  { %8001 = vst [vmem:[#allocation70_spill] sm:$0xff] %v6799_v8  ;;  %4460 = vpow2.f32 %v2481_v9  ;;  %v2611_v37 = vmul.f32 1.442695, %v2359_v41  ;;  %v2613_v22 = vmul.f32 1.442695, %v2360_v6  ;;  %v6801_v46 = vpop.eup %4442  ;;  %v2297_v47 = vsub.f32 %v8003_v44, %v2138_v28 }
 0x3f8   :  { %8002 = vst [vmem:[#allocation71_spill] sm:$0xff] %v6801_v46  ;;  %4462 = vpow2.f32 %v2607_v45  ;;  %2791 = vadd.xlane.f32.xlu1 %v2790_v4  ;;  %v2298_v24 = vsub.f32 %v8004_v13, %v2138_v28  ;;  %v6805_v48 = vpop.eup %4444  ;;  %v2703_v35 = vadd.f32 %v6801_v46, %v6799_v8  ;;  %v8009_v4 = vld [vmem:[#allocation83_spill] sm:$0xff]  ;;  %v8010_v28 = vld [vmem:[#allocation86_spill] sm:$0xff] }
 0x3f9   :  { %8005 = vst [vmem:[#allocation38_spill] sm:$0xff] %v6805_v48  ;;  %4464 = vpow2.f32 %v2611_v37  ;;  %v6809_v9 = vpop.eup %4446  ;;  %v2487_v41 = vmul.f32 1.442695, %v2297_v47  ;;  %v2700_v6 = vadd.f32 %v6805_v48, %v6795_v56  ;;  %v8028_v48 = vld [vmem:[#allocation95_spill] sm:$0xff] }
 0x3fa   :  { %8006 = vst [vmem:[#allocation40_spill] sm:$0xff] %v6809_v9  ;;  %4466 = vpow2.f32 %v2613_v22  ;;  %v2489_v63 = vmul.f32 1.442695, %v2298_v24  ;;  %v6813_v58 = vpop.eup %4448  ;;  %2704 = vadd.xlane.f32.xlu0 %v2703_v35  ;;  %v2234_v45 = vpop.xlane.xlu1 %2233 }
 0x3fb   :  { %8007 = vst [vmem:[#allocation43_spill] sm:$0xff] %v6813_v58  ;;  %4468 = vpow2.f32 %v2609_v11  ;;  %v6815_v13 = vpop.eup %4450  ;;  %v2361_v37 = vsub.f32 %v8009_v4, %v2234_v45  ;;  %v2362_v44 = vsub.f32 %v8010_v28, %v2234_v45 }
 0x3fc   :  { %8008 = vst [vmem:[#allocation72_spill] sm:$0xff] %v6815_v13  ;;  %2701 = vadd.xlane.f32.xlu1 %v2700_v6  ;;  %v6819_v8 = vpop.eup %4452  ;;  %4470 = vpow2.f32 %v2487_v41  ;;  %v2799_v22 = vadd.f32 %v6815_v13, %v6813_v58  ;;  %v8024_v13 = vld [vmem:[#allocation82_spill] sm:$0xff] }
 0x3fd   :  { %8011 = vst [vmem:[#allocation73_spill] sm:$0xff] %v6819_v8  ;;  %v6823_v47 = vpop.eup %4454  ;;  %4472 = vpow2.f32 %v2489_v63  ;;  %v2615_v24 = vmul.f32 1.442695, %v2361_v37  ;;  %v2617_v11 = vmul.f32 1.442695, %v2362_v44  ;;  %v2796_v35 = vadd.f32 %v6819_v8, %v6809_v9 }
 0x3fe   :  { %8012 = vst [vmem:[#allocation74_spill] sm:$0xff] %v6823_v47  ;;  %2800 = vadd.xlane.f32.xlu0 %v2799_v22 }
 0x3ff   :  { %v6827_v46 = vpop.eup %4456  ;;  %4474 = vpow2.f32 %v2615_v24 }
 0x400   :  { %8013 = vst [vmem:[#allocation75_spill] sm:$0xff] %v6827_v46  ;;  %v6829_v6 = vpop.eup %4458  ;;  %2797 = vadd.xlane.f32.xlu1 %v2796_v35  ;;  %4476 = vpow2.f32 %v2617_v11 }
 0x401   :  { %8014 = vst [vmem:[#allocation76_spill] sm:$0xff] %v6829_v6  ;;  %v6831_v45 = vpop.eup %4460  ;;  %v2709_v41 = vadd.f32 %v6829_v6, %v6827_v46 }
 0x402   :  { %8015 = vst [vmem:[#allocation77_spill] sm:$0xff] %v6831_v45  ;;  %v6835_v4 = vpop.eup %4462  ;;  %v2706_v63 = vadd.f32 %v6831_v45, %v6823_v47  ;;  %v8026_v45 = vld [vmem:[#allocation91_spill] sm:$0xff] }
 0x403   :  { %8016 = vst [vmem:[#allocation78_spill] sm:$0xff] %v6835_v4  ;;  %v6839_v37 = vpop.eup %4464  ;;  %2710 = vadd.xlane.f32.xlu0 %v2709_v41 }
 0x404   :  { %8017 = vst [vmem:[#allocation79_spill] sm:$0xff] %v6839_v37  ;;  %v6841_v28 = vpop.eup %4466  ;;  %2707 = vadd.xlane.f32.xlu1 %v2706_v63 }
 0x405   :  { %8018 = vst [vmem:[#allocation84_spill] sm:$0xff] %v6841_v28  ;;  %v6843_v44 = vpop.eup %4468  ;;  %v2805_v22 = vadd.f32 %v6841_v28, %v6839_v37  ;;  %v2621_v28 = vpop.xlane.xlu0 %2620 }
 0x406   :  { %8019 = vst [vmem:[#allocation85_spill] sm:$0xff] %v6843_v44  ;;  %v2802_v24 = vadd.f32 %v6843_v44, %v6835_v4  ;;  %v6849_v11 = vpop.eup %4470  ;;  %4478 = vrcp.f32 %v2621_v28  ;;  %v8025_v28 = vld [vmem:[#allocation81_spill] sm:$0xff] }
 0x407   :  { %8020 = vst [vmem:[#allocation53_spill] sm:$0xff] %v6849_v11  ;;  %2806 = vadd.xlane.f32.xlu0 %v2805_v22  ;;  %v6851_v35 = vpop.eup %4472 }
 0x408   :  { %8021 = vst [vmem:[#allocation55_spill] sm:$0xff] %v6851_v35  ;;  %2803 = vadd.xlane.f32.xlu1 %v2802_v24  ;;  %v2712_v41 = vadd.f32 %v6851_v35, %v6849_v11 }
 0x409   :  { %v6855_v46 = vpop.eup %4474 }
 0x40a   :  { %8022 = vst [vmem:[#allocation57_spill] sm:$0xff] %v6855_v46  ;;  %v6857_v63 = vpop.eup %4476 }
 0x40b   :  { %8023 = vst [vmem:[#allocation59_spill] sm:$0xff] %v6857_v63  ;;  %v2808_v37 = vadd.f32 %v6857_v63, %v6855_v46 }
 0x40c   :  { %2713 = vadd.xlane.f32.xlu1 %v2712_v41 }
 0x410   :  { %2809 = vadd.xlane.f32.xlu1 %v2808_v37  ;;  %v4479_v11 = vpop.eup %4478 }
 0x411   :  { %v2876_v47 = vmul.f32 %v4479_v11, %v8024_v13  ;;  %v2875_v63 = vmul.f32 %v4479_v11, %v8025_v28  ;;  %v8027_v13 = vld [vmem:[#allocation88_spill] sm:$0xff] }
 0x412   :  { %v8030_v11 = vld [vmem:[#allocation92_spill] sm:$0xff] }
 0x419   :  { %v2717_v6 = vpop.xlane.xlu0 %2716 }
 0x41d   :  { %v2627_v4 = vpop.xlane.xlu0 %2626 }
 0x41f   :  { %v2624_v22 = vpop.xlane.xlu1 %2623 }
 0x420   :  { %4480 = vrcp.f32 %v2624_v22 }
 0x421   :  { %4482 = vrcp.f32 %v2717_v6 }
 0x423   :  { %v2723_v24 = vpop.xlane.xlu0 %2722 }
 0x424   :  { %v2720_v58 = vpop.xlane.xlu1 %2719 }
 0x425   :  { %4484 = vrcp.f32 %v2720_v58 }
 0x426   :  { %4486 = vrcp.f32 %v2627_v4 }
 0x427   :  { %v2633_v35 = vpop.xlane.xlu0 %2632 }
 0x428   :  { %v2630_v44 = vpop.xlane.xlu1 %2629 }
 0x429   :  { %4488 = vrcp.f32 %v2630_v44 }
 0x42a   :  { %v4481_v41 = vpop.eup %4480  ;;  %4490 = vrcp.f32 %v2723_v24 }
 0x42b   :  { %v2729_v37 = vpop.xlane.xlu0 %2728  ;;  %v2878_v46 = vmul.f32 %v4481_v41, %v6389_v23  ;;  %v2877_v22 = vmul.f32 %v4481_v41, %v8026_v45  ;;  %v4483_v9 = vpop.eup %4482  ;;  %v8029_v23 = vld [vmem:[#allocation87_spill] sm:$0xff] }
 0x42c   :  { %v2726_v6 = vpop.xlane.xlu1 %2725  ;;  %v2940_v24 = vmul.f32 %v4483_v9, %v8027_v13  ;;  %v2939_v17 = vmul.f32 %v4483_v9, %v8029_v23 }
 0x42d   :  { %4492 = vrcp.f32 %v2726_v6  ;;  %v3698_v58 = vpack.c.bf16 %v2878_v46, %v2876_v47  ;;  %v3700_v8 = vpack.c.bf16 %v2877_v22, %v2875_v63  ;;  %v8031_v63 = vld [vmem:[#allocation90_spill] sm:$0xff] }
 0x42e   :  { %4494 = vrcp.f32 %v2633_v35 }
 0x42f   :  { %v4485_v4 = vpop.eup %4484  ;;  %v2639_v56 = vpop.xlane.xlu0 %2638  ;;  %3699 = vmatprep.subr.bf16.mxu0 %v3698_v58  ;;  %v8032_v58 = vld [vmem:[#allocation89_spill] sm:$0xff] }
 0x430   :  { %v2636_v44 = vpop.xlane.xlu1 %2635  ;;  %3701 = vmatpush1.bf16.xpose.msra.mxu0 %v3700_v8  ;;  %v2942_v57 = vmul.f32 %v4485_v4, %v8028_v48  ;;  %v2941_v28 = vmul.f32 %v4485_v4, %v8030_v11  ;;  %v4487_v45 = vpop.eup %4486 }
 0x431   :  { %4496 = vrcp.f32 %v2636_v44  ;;  %v2880_v22 = vmul.f32 %v4487_v45, %v8031_v63  ;;  %v2879_v13 = vmul.f32 %v4487_v45, %v8032_v58  ;;  %v8035_v63 = vld [vmem:[#allocation96_spill] sm:$0xff]  ;;  %v8036_v58 = vld [vmem:[#allocation10_spill] sm:$0xff] }
 0x432   :  { %v3762_v41 = vpack.c.bf16 %v2942_v57, %v2940_v24  ;;  %v3764_v6 = vpack.c.bf16 %v2941_v28, %v2939_v17  ;;  %4498 = vrcp.f32 %v2729_v37  ;;  %v8033_v24 = vld [vmem:[#allocation94_spill] sm:$0xff]  ;;  %v8034_v28 = vld [vmem:[#allocation93_spill] sm:$0xff] }
 0x433   :  { %v4489_v46 = vpop.eup %4488  ;;  %v2735_v47 = vpop.xlane.xlu0 %2734 }
 0x434   :  { %3763 = vmatprep.subr.bf16.mxu1 %v3762_v41  ;;  %v2732_v35 = vpop.xlane.xlu1 %2731  ;;  %v2882_v8 = vmul.f32 %v4489_v46, %v6421_v0  ;;  %v2881_v48 = vmul.f32 %v4489_v46, %v6411_v20  ;;  %v4491_v9 = vpop.eup %4490 }
 0x435   :  { %4500 = vrcp.f32 %v2732_v35  ;;  %3765 = vmatpush1.bf16.xpose.msra.mxu1 %v3764_v6  ;;  %v2944_v23 = vmul.f32 %v4491_v9, %v8033_v24  ;;  %v2943_v0 = vmul.f32 %v4491_v9, %v8034_v28 }
 0x436   :  { %v3702_v4 = vpack.c.bf16 %v2882_v8, %v2880_v22  ;;  %v3704_v44 = vpack.c.bf16 %v2881_v48, %v2879_v13  ;;  %4502 = vrcp.f32 %v2639_v56 }
 0x437   :  { %v4493_v57 = vpop.eup %4492  ;;  %v2645_v17 = vpop.xlane.xlu0 %2644 }
 0x438   :  { %3703 = vmatprep.subr.bf16.mxu0 %v3702_v4  ;;  %v2642_v37 = vpop.xlane.xlu1 %2641  ;;  %v2946_v11 = vmul.f32 %v4493_v57, %v6437_v1  ;;  %v2945_v45 = vmul.f32 %v4493_v57, %v6427_v43  ;;  %v4495_v41 = vpop.eup %4494  ;;  %v8037_v57 = vld [vmem:[#allocation98_spill] sm:$0xff] }
 0x439   :  { %4504 = vrcp.f32 %v2642_v37  ;;  %3705 = vmatpush1.bf16.xpose.msra.mxu0 %v3704_v44  ;;  %v2884_v22 = vmul.f32 %v4495_v41, %v8035_v63  ;;  %v2883_v1 = vmul.f32 %v4495_v41, %v8036_v58 }
 0x43a   :  { %v3766_v20 = vpack.c.bf16 %v2946_v11, %v2944_v23  ;;  %v3768_v6 = vpack.c.bf16 %v2945_v45, %v2943_v0  ;;  %4506 = vrcp.f32 %v2735_v47  ;;  %v8038_v23 = vld [vmem:[#allocation97_spill] sm:$0xff] }
 0x43b   :  { %v4497_v46 = vpop.eup %4496  ;;  %v2741_v35 = vpop.xlane.xlu0 %2740 }
 0x43c   :  { %3767 = vmatprep.subr.bf16.mxu1 %v3766_v20  ;;  %v2738_v56 = vpop.xlane.xlu1 %2737  ;;  %v2886_v8 = vmul.f32 %v4497_v46, %v6453_v32  ;;  %v2885_v13 = vmul.f32 %v4497_v46, %v6443_v25  ;;  %v4499_v48 = vpop.eup %4498  ;;  %v8039_v20 = vld [vmem:[#allocation12_spill] sm:$0xff] }
 0x43d   :  { %4508 = vrcp.f32 %v2738_v56  ;;  %3769 = vmatpush1.bf16.xpose.msra.mxu1 %v3768_v6  ;;  %v2948_v37 = vmul.f32 %v4499_v48, %v8037_v57  ;;  %v2947_v32 = vmul.f32 %v4499_v48, %v8038_v23  ;;  %v8040_v56 = vld [vmem:[#allocation11_spill] sm:$0xff] }
 0x43e   :  { %v3706_v43 = vpack.c.bf16 %v2886_v8, %v2884_v22  ;;  %v3708_v9 = vpack.c.bf16 %v2885_v13, %v2883_v1  ;;  %4510 = vrcp.f32 %v2645_v17  ;;  %v8041_v13 = vld [vmem:[#allocation32_spill] sm:$0xff]  ;;  %v8043_v23 = vld [vmem:[#allocation35_spill] sm:$0xff] }
 0x43f   :  { %v4501_v4 = vpop.eup %4500  ;;  %v2651_v44 = vpop.xlane.xlu0 %2650 }
 0x440   :  { %3707 = vmatprep.subr.bf16.mxu0 %v3706_v43  ;;  %v2648_v47 = vpop.xlane.xlu1 %2647  ;;  %v2950_v24 = vmul.f32 %v4501_v4, %v6469_v14  ;;  %v2949_v11 = vmul.f32 %v4501_v4, %v6459_v30  ;;  %v4503_v28 = vpop.eup %4502 }
 0x441   :  { %4512 = vrcp.f32 %v2648_v47  ;;  %3709 = vmatpush1.bf16.xpose.msra.mxu0 %v3708_v9  ;;  %v2888_v6 = vmul.f32 %v4503_v28, %v8039_v20  ;;  %v2887_v14 = vmul.f32 %v4503_v28, %v8040_v56  ;;  %v8042_v9 = vld [vmem:[#allocation13_spill] sm:$0xff] }
 0x442   :  { %v3770_v25 = vpack.c.bf16 %v2950_v24, %v2948_v37  ;;  %v3772_v0 = vpack.c.bf16 %v2949_v11, %v2947_v32  ;;  %4514 = vrcp.f32 %v2741_v35  ;;  %v8044_v28 = vld [vmem:[#allocation33_spill] sm:$0xff] }
 0x443   :  { %v4505_v45 = vpop.eup %4504  ;;  %v2747_v41 = vpop.xlane.xlu0 %2746 }
 0x444   :  { %3771 = vmatprep.subr.bf16.mxu1 %v3770_v25  ;;  %v2744_v17 = vpop.xlane.xlu1 %2743  ;;  %v2890_v46 = vmul.f32 %v4505_v45, %v6485_v55  ;;  %v2889_v63 = vmul.f32 %v4505_v45, %v6475_v42  ;;  %v4507_v22 = vpop.eup %4506 }
 0x445   :  { %4516 = vrcp.f32 %v2744_v17  ;;  %3773 = vmatpush1.bf16.xpose.msra.mxu1 %v3772_v0  ;;  %v2952_v48 = vmul.f32 %v4507_v22, %v8041_v13  ;;  %v2951_v55 = vmul.f32 %v4507_v22, %v8042_v9  ;;  %v8049_v9 = vld [vmem:[#allocation39_spill] sm:$0xff] }
 0x446   :  { %v3710_v30 = vpack.c.bf16 %v2890_v46, %v2888_v6  ;;  %v3712_v8 = vpack.c.bf16 %v2889_v63, %v2887_v14  ;;  %4518 = vrcp.f32 %v2651_v44  ;;  %v8045_v6 = vld [vmem:[#allocation14_spill] sm:$0xff]  ;;  %v8046_v14 = vld [vmem:[#allocation36_spill] sm:$0xff] }
 0x447   :  { %v4509_v58 = vpop.eup %4508  ;;  %v2657_v1 = vpop.xlane.xlu0 %2656 }
 0x448   :  { %3711 = vmatprep.subr.bf16.mxu0 %v3710_v30  ;;  %v2654_v35 = vpop.xlane.xlu1 %2653  ;;  %v2954_v43 = vmul.f32 %v4509_v58, %v6501_v16  ;;  %v2953_v4 = vmul.f32 %v4509_v58, %v6491_v2  ;;  %v4511_v47 = vpop.eup %4510 }
 0x449   :  { %4520 = vrcp.f32 %v2654_v35  ;;  %3713 = vmatpush1.bf16.xpose.msra.mxu0 %v3712_v8  ;;  %v2892_v32 = vmul.f32 %v4511_v47, %v8043_v23  ;;  %v2891_v16 = vmul.f32 %v4511_v47, %v8044_v28  ;;  %v8047_v35 = vld [vmem:[#allocation16_spill] sm:$0xff]  ;;  %v8051_v23 = vld [vmem:[#allocation21_spill] sm:$0xff]  ;;  %v8053_v28 = vld [vmem:[#allocation18_spill] sm:$0xff] }
 0x44a   :  { %v3774_v42 = vpack.c.bf16 %v2954_v43, %v2952_v48  ;;  %v3776_v57 = vpack.c.bf16 %v2953_v4, %v2951_v55  ;;  %4522 = vrcp.f32 %v2747_v41  ;;  %v8048_v43 = vld [vmem:[#allocation15_spill] sm:$0xff] }
 0x44b   :  { %v4513_v37 = vpop.eup %4512  ;;  %v2753_v24 = vpop.xlane.xlu0 %2752 }
 0x44c   :  { %3775 = vmatprep.subr.bf16.mxu1 %v3774_v42  ;;  %v2750_v44 = vpop.xlane.xlu1 %2749  ;;  %v2894_v11 = vmul.f32 %v4513_v37, %v6517_v26  ;;  %v2893_v25 = vmul.f32 %v4513_v37, %v6507_v21  ;;  %v4515_v0 = vpop.eup %4514 }
 0x44d   :  { %4524 = vrcp.f32 %v2750_v44  ;;  %3777 = vmatpush1.bf16.xpose.msra.mxu1 %v3776_v57  ;;  %v2956_v46 = vmul.f32 %v4515_v0, %v8045_v6  ;;  %v2955_v26 = vmul.f32 %v4515_v0, %v8046_v14 }
 0x44e   :  { %v3714_v2 = vpack.c.bf16 %v2894_v11, %v2892_v32  ;;  %v3716_v45 = vpack.c.bf16 %v2893_v25, %v2891_v16  ;;  %4526 = vrcp.f32 %v2657_v1  ;;  %v8052_v11 = vld [vmem:[#allocation17_spill] sm:$0xff] }
 0x44f   :  { %v4517_v17 = vpop.eup %4516  ;;  %v2663_v20 = vpop.xlane.xlu0 %2662 }
 0x450   :  { %3715 = vmatprep.subr.bf16.mxu0 %v3714_v2  ;;  %v2660_v41 = vpop.xlane.xlu1 %2659  ;;  %v2958_v56 = vmul.f32 %v4517_v17, %v6533_v31  ;;  %v2957_v63 = vmul.f32 %v4517_v17, %v6523_v3  ;;  %v4519_v22 = vpop.eup %4518 }
 0x451   :  { %4528 = vrcp.f32 %v2660_v41  ;;  %3717 = vmatpush1.bf16.xpose.msra.mxu0 %v3716_v45  ;;  %v2896_v13 = vmul.f32 %v4519_v22, %v8047_v35  ;;  %v2895_v31 = vmul.f32 %v4519_v22, %v8048_v43  ;;  %v8054_v41 = vld [vmem:[#allocation42_spill] sm:$0xff] }
 0x452   :  { %v3778_v21 = vpack.c.bf16 %v2958_v56, %v2956_v46  ;;  %v3780_v30 = vpack.c.bf16 %v2957_v63, %v2955_v26  ;;  %4530 = vrcp.f32 %v2753_v24  ;;  %v8050_v24 = vld [vmem:[#allocation37_spill] sm:$0xff] }
 0x453   :  { %v4521_v8 = vpop.eup %4520  ;;  %v2759_v58 = vpop.xlane.xlu0 %2758  ;;  %v8055_v56 = vld [vmem:[#allocation41_spill] sm:$0xff] }
 0x454   :  { %3779 = vmatprep.subr.bf16.mxu1 %v3778_v21  ;;  %v2756_v1 = vpop.xlane.xlu1 %2755  ;;  %v2898_v48 = vmul.f32 %v4521_v8, %v6549_v50  ;;  %v2897_v55 = vmul.f32 %v4521_v8, %v8049_v9  ;;  %v4523_v4 = vpop.eup %4522 }
 0x455   :  { %4532 = vrcp.f32 %v2756_v1  ;;  %3781 = vmatpush1.bf16.xpose.msra.mxu1 %v3780_v30  ;;  %v2960_v44 = vmul.f32 %v4523_v4, %v8050_v24  ;;  %v2959_v50 = vmul.f32 %v4523_v4, %v8052_v11  ;;  %v8056_v1 = vld [vmem:[#allocation20_spill] sm:$0xff] }
 0x456   :  { %v3718_v3 = vpack.c.bf16 %v2898_v48, %v2896_v13  ;;  %v3720_v47 = vpack.c.bf16 %v2897_v55, %v2895_v31  ;;  %4534 = vrcp.f32 %v2663_v20  ;;  %v8057_v48 = vld [vmem:[#allocation19_spill] sm:$0xff] }
 0x457   :  { %v4525_v42 = vpop.eup %4524  ;;  %v2669_v57 = vpop.xlane.xlu0 %2668 }
 0x458   :  { %3719 = vmatprep.subr.bf16.mxu0 %v3718_v3  ;;  %v2666_v37 = vpop.xlane.xlu1 %2665  ;;  %v2962_v32 = vmul.f32 %v4525_v42, %v8051_v23  ;;  %v2961_v16 = vmul.f32 %v4525_v42, %v8053_v28  ;;  %v4527_v25 = vpop.eup %4526 }
 0x459   :  { %4536 = vrcp.f32 %v2666_v37  ;;  %3721 = vmatpush1.bf16.xpose.msra.mxu0 %v3720_v47  ;;  %v2900_v6 = vmul.f32 %v4527_v25, %v8054_v41  ;;  %v2899_v14 = vmul.f32 %v4527_v25, %v8055_v56 }
 0x45a   :  { %v3782_v0 = vpack.c.bf16 %v2962_v32, %v2960_v44  ;;  %v3784_v2 = vpack.c.bf16 %v2961_v16, %v2959_v50  ;;  %4538 = vrcp.f32 %v2759_v58  ;;  %v8059_v50 = vld [vmem:[#allocation46_spill] sm:$0xff]  ;;  %v8060_v16 = vld [vmem:[#allocation45_spill] sm:$0xff] }
 0x45b   :  { %v4529_v45 = vpop.eup %4528  ;;  %v2765_v17 = vpop.xlane.xlu0 %2764 }
 0x45c   :  { %3783 = vmatprep.subr.bf16.mxu1 %v3782_v0  ;;  %v2762_v20 = vpop.xlane.xlu1 %2761  ;;  %v2902_v46 = vmul.f32 %v4529_v45, %v6581_v10  ;;  %v2901_v26 = vmul.f32 %v4529_v45, %v6571_v52  ;;  %v4531_v63 = vpop.eup %4530 }
 0x45d   :  { %4540 = vrcp.f32 %v2762_v20  ;;  %3785 = vmatpush1.bf16.xpose.msra.mxu1 %v3784_v2  ;;  %v2964_v35 = vmul.f32 %v4531_v63, %v8056_v1  ;;  %v2963_v10 = vmul.f32 %v4531_v63, %v8057_v48  ;;  %v8064_v1 = vld [vmem:[#allocation22_spill] sm:$0xff] }
 0x45e   :  { %v3722_v22 = vpack.c.bf16 %v2902_v46, %v2900_v6  ;;  %v3724_v21 = vpack.c.bf16 %v2901_v26, %v2899_v14  ;;  %4542 = vrcp.f32 %v2669_v57  ;;  %v8058_v57 = vld [vmem:[#allocation44_spill] sm:$0xff]  ;;  %v8061_v46 = vld [vmem:[#allocation47_spill] sm:$0xff] }
 0x45f   :  { %v4533_v30 = vpop.eup %4532  ;;  %v2675_v8 = vpop.xlane.xlu0 %2674 }
 0x460   :  { %3723 = vmatprep.subr.bf16.mxu0 %v3722_v22  ;;  %v2672_v58 = vpop.xlane.xlu1 %2671  ;;  %v2966_v13 = vmul.f32 %v4533_v30, %v6597_v61  ;;  %v2965_v43 = vmul.f32 %v4533_v30, %v6587_v29  ;;  %v4535_v31 = vpop.eup %4534  ;;  %v8062_v30 = vld [vmem:[#allocation23_spill] sm:$0xff] }
 0x461   :  { %4544 = vrcp.f32 %v2672_v58  ;;  %3725 = vmatpush1.bf16.xpose.msra.mxu0 %v3724_v21  ;;  %v2904_v47 = vmul.f32 %v4535_v31, %v6577_v33  ;;  %v2903_v61 = vmul.f32 %v4535_v31, %v8058_v57  ;;  %v8063_v58 = vld [vmem:[#allocation51_spill] sm:$0xff] }
 0x462   :  { %v3786_v52 = vpack.c.bf16 %v2966_v13, %v2964_v35  ;;  %v3788_v9 = vpack.c.bf16 %v2965_v43, %v2963_v10  ;;  %4546 = vrcp.f32 %v2765_v17  ;;  %v8065_v35 = vld [vmem:[#allocation48_spill] sm:$0xff] }
 0x463   :  { %v4537_v55 = vpop.eup %4536  ;;  %v2771_v4 = vpop.xlane.xlu0 %2770 }
 0x464   :  { %3787 = vmatprep.subr.bf16.mxu1 %v3786_v52  ;;  %v2768_v3 = vpop.xlane.xlu1 %2767  ;;  %v2906_v42 = vmul.f32 %v4537_v55, %v6613_v60  ;;  %v2905_v37 = vmul.f32 %v4537_v55, %v6603_v54  ;;  %v4539_v24 = vpop.eup %4538 }
 0x465   :  { %4548 = vrcp.f32 %v2768_v3  ;;  %3789 = vmatpush1.bf16.xpose.msra.mxu1 %v3788_v9  ;;  %v2968_v28 = vmul.f32 %v4539_v24, %v8059_v50  ;;  %v2967_v60 = vmul.f32 %v4539_v24, %v8060_v16  ;;  %v8066_v9 = vld [vmem:[#allocation25_spill] sm:$0xff]  ;;  %v8067_v3 = vld [vmem:[#allocation24_spill] sm:$0xff] }
 0x466   :  { %v3726_v29 = vpack.c.bf16 %v2906_v42, %v2904_v47  ;;  %v3728_v44 = vpack.c.bf16 %v2905_v37, %v2903_v61  ;;  %4550 = vrcp.f32 %v2675_v8  ;;  %v8069_v50 = vld [vmem:[#allocation49_spill] sm:$0xff] }
 0x467   :  { %v4541_v23 = vpop.eup %4540  ;;  %v2681_v32 = vpop.xlane.xlu0 %2680 }
 0x468   :  { %3727 = vmatprep.subr.bf16.mxu0 %v3726_v29  ;;  %v2678_v11 = vpop.xlane.xlu1 %2677  ;;  %v2970_v33 = vmul.f32 %v4541_v23, %v6629_v5  ;;  %v2969_v25 = vmul.f32 %v4541_v23, %v6619_v7  ;;  %v4543_v0 = vpop.eup %4542  ;;  %v8068_v23 = vld [vmem:[#allocation50_spill] sm:$0xff] }
 0x469   :  { %4552 = vrcp.f32 %v2678_v11  ;;  %3729 = vmatpush1.bf16.xpose.msra.mxu0 %v3728_v44  ;;  %v2908_v41 = vmul.f32 %v4543_v0, %v6609_v36  ;;  %v2907_v5 = vmul.f32 %v4543_v0, %v8061_v46 }
 0x46a   :  { %v3790_v54 = vpack.c.bf16 %v2970_v33, %v2968_v28  ;;  %v3792_v2 = vpack.c.bf16 %v2969_v25, %v2967_v60  ;;  %4554 = vrcp.f32 %v2771_v4 }
 0x46b   :  { %v4545_v45 = vpop.eup %4544  ;;  %v2777_v17 = vpop.xlane.xlu0 %2776 }
 0x46c   :  { %3791 = vmatprep.subr.bf16.mxu1 %v3790_v54  ;;  %v2774_v20 = vpop.xlane.xlu1 %2773  ;;  %v2910_v6 = vmul.f32 %v4545_v45, %v6645_v49  ;;  %v2909_v56 = vmul.f32 %v4545_v45, %v6635_v34  ;;  %v4547_v14 = vpop.eup %4546  ;;  %v8070_v45 = vld [vmem:[#allocation26_spill] sm:$0xff] }
 0x46d   :  { %4556 = vrcp.f32 %v2774_v20  ;;  %3793 = vmatpush1.bf16.xpose.msra.mxu1 %v3792_v2  ;;  %v2972_v8 = vmul.f32 %v4547_v14, %v8062_v30  ;;  %v2971_v49 = vmul.f32 %v4547_v14, %v8064_v1  ;;  %v8075_v1 = vld [vmem:[#allocation54_spill] sm:$0xff] }
 0x46e   :  { %v3730_v7 = vpack.c.bf16 %v2910_v6, %v2908_v41  ;;  %v3732_v26 = vpack.c.bf16 %v2909_v56, %v2907_v5  ;;  %4558 = vrcp.f32 %v2681_v32  ;;  %v8071_v56 = vld [vmem:[#allocation28_spill] sm:$0xff] }
 0x46f   :  { %v4549_v63 = vpop.eup %4548  ;;  %v2687_v22 = vpop.xlane.xlu0 %2686 }
 0x470   :  { %3731 = vmatprep.subr.bf16.mxu0 %v3730_v7  ;;  %v2684_v21 = vpop.xlane.xlu1 %2683  ;;  %v2974_v36 = vmul.f32 %v4549_v63, %v8063_v58  ;;  %v2973_v13 = vmul.f32 %v4549_v63, %v8065_v35  ;;  %v4551_v48 = vpop.eup %4550  ;;  %v8072_v7 = vld [vmem:[#allocation60_spill] sm:$0xff] }
 0x471   :  { %4560 = vrcp.f32 %v2684_v21  ;;  %3733 = vmatpush1.bf16.xpose.msra.mxu0 %v3732_v26  ;;  %v2912_v55 = vmul.f32 %v4551_v48, %v8066_v9  ;;  %v2911_v47 = vmul.f32 %v4551_v48, %v8067_v3  ;;  %v8073_v26 = vld [vmem:[#allocation27_spill] sm:$0xff]  ;;  %v8074_v63 = vld [vmem:[#allocation56_spill] sm:$0xff] }
 0x472   :  { %v3794_v34 = vpack.c.bf16 %v2974_v36, %v2972_v8  ;;  %v3796_v10 = vpack.c.bf16 %v2973_v13, %v2971_v49  ;;  %4562 = vrcp.f32 %v2777_v17  ;;  %v8076_v13 = vld [vmem:[#allocation52_spill] sm:$0xff] }
 0x473   :  { %v4553_v43 = vpop.eup %4552  ;;  %v2783_v31 = vpop.xlane.xlu0 %2782 }
 0x474   :  { %3795 = vmatprep.subr.bf16.mxu1 %v3794_v34  ;;  %v2780_v52 = vpop.xlane.xlu1 %2779  ;;  %v2914_v4 = vmul.f32 %v4553_v43, %v6677_v27  ;;  %v2913_v42 = vmul.f32 %v4553_v43, %v6667_v40  ;;  %v4555_v57 = vpop.eup %4554 }
 0x475   :  { %4564 = vrcp.f32 %v2780_v52  ;;  %3797 = vmatpush1.bf16.xpose.msra.mxu1 %v3796_v10  ;;  %v2976_v32 = vmul.f32 %v4555_v57, %v8068_v23  ;;  %v2975_v27 = vmul.f32 %v4555_v57, %v8069_v50  ;;  %v8079_v57 = vld [vmem:[#allocation30_spill] sm:$0xff] }
 0x476   :  { %v3734_v61 = vpack.c.bf16 %v2914_v4, %v2912_v55  ;;  %v3736_v37 = vpack.c.bf16 %v2913_v42, %v2911_v47  ;;  %4566 = vrcp.f32 %v2687_v22  ;;  %v8077_v4 = vld [vmem:[#allocation29_spill] sm:$0xff]  ;;  %v8078_v42 = vld [vmem:[#allocation58_spill] sm:$0xff] }
 0x477   :  { %v4557_v24 = vpop.eup %4556  ;;  %v2693_v29 = vpop.xlane.xlu0 %2692 }
 0x478   :  { %3735 = vmatprep.subr.bf16.mxu0 %v3734_v61  ;;  %v2690_v44 = vpop.xlane.xlu1 %2689  ;;  %v2978_v11 = vmul.f32 %v4557_v24, %v6693_v53  ;;  %v2977_v28 = vmul.f32 %v4557_v24, %v6683_v59  ;;  %v4559_v33 = vpop.eup %4558 }
 0x479   :  { %4568 = vrcp.f32 %v2690_v44  ;;  %3737 = vmatpush1.bf16.xpose.msra.mxu0 %v3736_v37  ;;  %v2916_v54 = vmul.f32 %v4559_v33, %v6673_v15  ;;  %v2915_v53 = vmul.f32 %v4559_v33, %v8070_v45 }
 0x47a   :  { %v3798_v40 = vpack.c.bf16 %v2978_v11, %v2976_v32  ;;  %v3800_v16 = vpack.c.bf16 %v2977_v28, %v2975_v27  ;;  %4570 = vrcp.f32 %v2783_v31  ;;  %v8080_v32 = vld [vmem:[#allocation62_spill] sm:$0xff]  ;;  %v8081_v27 = vld [vmem:[#allocation61_spill] sm:$0xff] }
 0x47b   :  { %v4561_v60 = vpop.eup %4560  ;;  %v2789_v25 = vpop.xlane.xlu0 %2788 }
 0x47c   :  { %3799 = vmatprep.subr.bf16.mxu1 %v3798_v40  ;;  %v2786_v0 = vpop.xlane.xlu1 %2785  ;;  %v2918_v2 = vmul.f32 %v4561_v60, %v6709_v18  ;;  %v2917_v17 = vmul.f32 %v4561_v60, %v6699_v12  ;;  %v4563_v20 = vpop.eup %4562 }
 0x47d   :  { %4572 = vrcp.f32 %v2786_v0  ;;  %3801 = vmatpush1.bf16.xpose.msra.mxu1 %v3800_v16  ;;  %v2980_v14 = vmul.f32 %v4563_v20, %v8071_v56  ;;  %v2979_v18 = vmul.f32 %v4563_v20, %v8073_v26  ;;  %v8082_v0 = vld [vmem:[#allocation64_spill] sm:$0xff]  ;;  %v8086_v56 = vld [vmem:[#allocation31_spill] sm:$0xff]  ;;  %v8088_v26 = vld [vmem:[#allocation65_spill] sm:$0xff] }
 0x47e   :  { %v3738_v59 = vpack.c.bf16 %v2918_v2, %v2916_v54  ;;  %v3740_v41 = vpack.c.bf16 %v2917_v17, %v2915_v53  ;;  %4574 = vrcp.f32 %v2693_v29  ;;  %v8083_v2 = vld [vmem:[#allocation34_spill] sm:$0xff]  ;;  %v8084_v53 = vld [vmem:[#allocation63_spill] sm:$0xff] }
 0x47f   :  { %v4565_v6 = vpop.eup %4564  ;;  %v2699_v46 = vpop.xlane.xlu0 %2698 }
 0x480   :  { %3739 = vmatprep.subr.bf16.mxu0 %v3738_v59  ;;  %v2982_v15 = vmul.f32 %v4565_v6, %v8072_v7  ;;  %v2981_v22 = vmul.f32 %v4565_v6, %v8074_v63  ;;  %v4567_v21 = vpop.eup %4566  ;;  %v8087_v7 = vld [vmem:[#allocation38_spill] sm:$0xff]  ;;  %v8089_v63 = vld [vmem:[#allocation69_spill] sm:$0xff] }
 0x481   :  { %v2696_v5 = vpop.xlane.xlu1 %2695  ;;  %3741 = vmatpush1.bf16.xpose.msra.mxu0 %v3740_v41  ;;  %v2920_v49 = vmul.f32 %v4567_v21, %v8075_v1  ;;  %v2919_v48 = vmul.f32 %v4567_v21, %v8076_v13  ;;  %v8090_v1 = vld [vmem:[#allocation68_spill] sm:$0xff] }
 0x482   :  { %4576 = vrcp.f32 %v2696_v5  ;;  %v3802_v12 = vpack.c.bf16 %v2982_v15, %v2980_v14  ;;  %v3804_v30 = vpack.c.bf16 %v2981_v22, %v2979_v18 }
 0x483   :  { %v4569_v8 = vpop.eup %4568  ;;  %4578 = vrcp.f32 %v2789_v25  ;;  %v2795_v58 = vpop.xlane.xlu0 %2794 }
 0x484   :  { %3803 = vmatprep.subr.bf16.mxu1 %v3802_v12  ;;  %v2922_v35 = vmul.f32 %v4569_v8, %v6741_v19  ;;  %v2921_v34 = vmul.f32 %v4569_v8, %v6731_v39  ;;  %v4571_v10 = vpop.eup %4570 }
 0x485   :  { %v2792_v36 = vpop.xlane.xlu1 %2791  ;;  %3805 = vmatpush1.bf16.xpose.msra.mxu1 %v3804_v30  ;;  %v2984_v3 = vmul.f32 %v4571_v10, %v8077_v4  ;;  %v2983_v19 = vmul.f32 %v4571_v10, %v8078_v42  ;;  %v8093_v10 = vld [vmem:[#allocation40_spill] sm:$0xff]  ;;  %v8095_v42 = vld [vmem:[#allocation77_spill] sm:$0xff] }
 0x486   :  { %4580 = vrcp.f32 %v2792_v36  ;;  %v3742_v43 = vpack.c.bf16 %v2922_v35, %v2920_v49  ;;  %v3744_v31 = vpack.c.bf16 %v2921_v34, %v2919_v48  ;;  %v8091_v35 = vld [vmem:[#allocation73_spill] sm:$0xff]  ;;  %v8092_v48 = vld [vmem:[#allocation67_spill] sm:$0xff] }
 0x487   :  { %v4573_v52 = vpop.eup %4572  ;;  %4582 = vrcp.f32 %v2699_v46  ;;  %v2705_v9 = vpop.xlane.xlu0 %2704 }
 0x488   :  { %3743 = vmatprep.subr.bf16.mxu0 %v3742_v43  ;;  %v2986_v47 = vmul.f32 %v4573_v52, %v6757_v62  ;;  %v2985_v61 = vmul.f32 %v4573_v52, %v8079_v57  ;;  %v4575_v37 = vpop.eup %4574  ;;  %v8096_v57 = vld [vmem:[#allocation70_spill] sm:$0xff] }
 0x489   :  { %v2702_v55 = vpop.xlane.xlu1 %2701  ;;  %3745 = vmatpush1.bf16.xpose.msra.mxu0 %v3744_v31  ;;  %v2924_v11 = vmul.f32 %v4575_v37, %v8080_v32  ;;  %v2923_v62 = vmul.f32 %v4575_v37, %v8081_v27  ;;  %v8097_v37 = vld [vmem:[#allocation74_spill] sm:$0xff]  ;;  %v8098_v32 = vld [vmem:[#allocation72_spill] sm:$0xff] }
 0x48a   :  { %4584 = vrcp.f32 %v2702_v55  ;;  %v3806_v39 = vpack.c.bf16 %v2986_v47, %v2984_v3  ;;  %v3808_v24 = vpack.c.bf16 %v2985_v61, %v2983_v19  ;;  %v8094_v3 = vld [vmem:[#allocation71_spill] sm:$0xff] }
 0x48b   :  { %4586 = vrcp.f32 %v2795_v58  ;;  %v2801_v44 = vpop.xlane.xlu0 %2800 }
 0x48c   :  { %v4577_v29 = vpop.eup %4576  ;;  %3807 = vmatprep.subr.bf16.mxu1 %v3806_v39 }
 0x48d   :  { %v2798_v23 = vpop.xlane.xlu1 %2797  ;;  %v2926_v50 = vmul.f32 %v4577_v29, %v6773_v38  ;;  %v2925_v28 = vmul.f32 %v4577_v29, %v6763_v51  ;;  %v4579_v33 = vpop.eup %4578  ;;  %3809 = vmatpush1.bf16.xpose.msra.mxu1 %v3808_v24  ;;  %v8085_v38 = vld [vmem:[#allocation66_spill] sm:$0xff] }
 0x48e   :  { %4588 = vrcp.f32 %v2798_v23  ;;  %v2988_v54 = vmul.f32 %v4579_v33, %v8082_v0  ;;  %v2987_v17 = vmul.f32 %v4579_v33, %v8084_v53  ;;  %v8101_v33 = vld [vmem:[#allocation78_spill] sm:$0xff] }
 0x48f   :  { %v3746_v40 = vpack.c.bf16 %v2926_v50, %v2924_v11  ;;  %v3748_v16 = vpack.c.bf16 %v2925_v28, %v2923_v62  ;;  %4590 = vrcp.f32 %v2705_v9  ;;  %v8099_v50 = vld [vmem:[#allocation85_spill] sm:$0xff]  ;;  %v8100_v62 = vld [vmem:[#allocation43_spill] sm:$0xff] }
 0x490   :  { %v4581_v60 = vpop.eup %4580  ;;  %v2711_v51 = vpop.xlane.xlu0 %2710 }
 0x491   :  { %3747 = vmatprep.subr.bf16.mxu0 %v3746_v40  ;;  %v2708_v25 = vpop.xlane.xlu1 %2707  ;;  %v2990_v45 = vmul.f32 %v4581_v60, %v8083_v2  ;;  %v2989_v20 = vmul.f32 %v4581_v60, %v8085_v38  ;;  %v4583_v59 = vpop.eup %4582 }
 0x492   :  { %4592 = vrcp.f32 %v2708_v25  ;;  %3749 = vmatpush1.bf16.xpose.msra.mxu0 %v3748_v16  ;;  %v2928_v14 = vmul.f32 %v4583_v59, %v8086_v56  ;;  %v2927_v18 = vmul.f32 %v4583_v59, %v8088_v26 }
 0x493   :  { %v3810_v41 = vpack.c.bf16 %v2990_v45, %v2988_v54  ;;  %v3812_v6 = vpack.c.bf16 %v2989_v20, %v2987_v17  ;;  %4594 = vrcp.f32 %v2801_v44  ;;  %v8102_v54 = vld [vmem:[#allocation76_spill] sm:$0xff]  ;;  %v8103_v45 = vld [vmem:[#allocation55_spill] sm:$0xff]  ;;  %v8105_v20 = vld [vmem:[#allocation53_spill] sm:$0xff] }
 0x494   :  { %v4585_v46 = vpop.eup %4584  ;;  %v2807_v58 = vpop.xlane.xlu0 %2806  ;;  %v8104_v17 = vld [vmem:[#allocation75_spill] sm:$0xff] }
 0x495   :  { %3811 = vmatprep.subr.bf16.mxu1 %v3810_v41  ;;  %v2804_v5 = vpop.xlane.xlu1 %2803  ;;  %v2930_v15 = vmul.f32 %v4585_v46, %v8087_v7  ;;  %v2929_v22 = vmul.f32 %v4585_v46, %v8089_v63  ;;  %v4587_v21 = vpop.eup %4586 }
 0x496   :  { %4596 = vrcp.f32 %v2804_v5  ;;  %3813 = vmatpush1.bf16.xpose.msra.mxu1 %v3812_v6  ;;  %v2992_v49 = vmul.f32 %v4587_v21, %v8090_v1  ;;  %v2991_v34 = vmul.f32 %v4587_v21, %v8092_v48  ;;  %v8106_v5 = vld [vmem:[#allocation84_spill] sm:$0xff] }
 0x497   :  { %v3750_v12 = vpack.c.bf16 %v2930_v15, %v2928_v14  ;;  %v3752_v30 = vpack.c.bf16 %v2929_v22, %v2927_v18  ;;  %4598 = vrcp.f32 %v2711_v51  ;;  %v8107_v14 = vld [vmem:[#allocation59_spill] sm:$0xff]  ;;  %v8109_v18 = vld [vmem:[#allocation57_spill] sm:$0xff] }
 0x498   :  { %v4589_v8 = vpop.eup %4588  ;;  %v8108_v15 = vld [vmem:[#allocation79_spill] sm:$0xff] }
 0x499   :  { %3751 = vmatprep.subr.bf16.mxu0 %v3750_v12  ;;  %v2714_v36 = vpop.xlane.xlu1 %2713  ;;  %v2994_v13 = vmul.f32 %v4589_v8, %v8091_v35  ;;  %v2993_v43 = vmul.f32 %v4589_v8, %v8093_v10  ;;  %v4591_v31 = vpop.eup %4590  ;;  %v6992_v12 = vld [vmem:[%s7089_s0] sm:$0xff] }
 0x49a   :  { %4600 = vrcp.f32 %v2714_v36  ;;  %3753 = vmatpush1.bf16.xpose.msra.mxu0 %v3752_v30  ;;  %v2932_v47 = vmul.f32 %v4591_v31, %v8094_v3  ;;  %v2931_v61 = vmul.f32 %v4591_v31, %v8096_v57  ;;  %v6998_v30 = vld [vmem:[%s7089_s0 + $0x8] sm:$0xff] }
 0x49b   :  { %v3814_v52 = vpack.c.bf16 %v2994_v13, %v2992_v49  ;;  %v3816_v9 = vpack.c.bf16 %v2993_v43, %v2991_v34  ;;  %4602 = vrcp.f32 %v2807_v58  ;;  %v4672_v43 = vmov 0  }
 0x49c   :  { %v4593_v55 = vpop.eup %4592  ;;  %3834 = vset.pattern.permute.xlu0 %v4672_v43  ;;  %3835 = vset.pattern.permute.xlu1 %v4672_v43 }
 0x49d   :  { %3815 = vmatprep.subr.bf16.mxu1 %v3814_v52  ;;  %v2810_v4 = vpop.xlane.xlu1 %2809  ;;  %v2934_v19 = vmul.f32 %v4593_v55, %v8095_v42  ;;  %v2933_v39 = vmul.f32 %v4593_v55, %v8097_v37  ;;  %v4595_v24 = vpop.eup %4594 }
 0x49e   :  { %4604 = vrcp.f32 %v2810_v4  ;;  %3817 = vmatpush1.bf16.xpose.msra.mxu1 %v3816_v9  ;;  %v2996_v11 = vmul.f32 %v4595_v24, %v8098_v32  ;;  %v2995_v28 = vmul.f32 %v4595_v24, %v8100_v62  ;;  %v95_v62 = vld [vmem:[%s7091_s2] sm:$0xf] }
 0x49f   :  { %v3754_v29 = vpack.c.bf16 %v2934_v19, %v2932_v47  ;;  %v3756_v44 = vpack.c.bf16 %v2933_v39, %v2931_v61 }
 0x4a0   :  { %v4597_v23 = vpop.eup %4596 }
 0x4a1   :  { %3755 = vmatprep.subr.bf16.mxu0 %v3754_v29  ;;  %v2998_v27 = vmul.f32 %v4597_v23, %v8099_v50  ;;  %v2997_v40 = vmul.f32 %v4597_v23, %v8101_v33  ;;  %v4599_v16 = vpop.eup %4598 }
 0x4a2   :  { %3757 = vmatpush1.bf16.xpose.msra.mxu0 %v3756_v44  ;;  %v2936_v2 = vmul.f32 %v4599_v16, %v8102_v54  ;;  %v2935_v38 = vmul.f32 %v4599_v16, %v8104_v17 }
 0x4a3   :  { %v3818_v60 = vpack.c.bf16 %v2998_v27, %v2996_v11  ;;  %v3820_v25 = vpack.c.bf16 %v2997_v40, %v2995_v28  ;;  %v96_v27 = vld [vmem:[%s7091_s2 + $0x4] sm:$0xf] }
 0x4a4   :  { %v4601_v0 = vpop.eup %4600 }
 0x4a5   :  { %3819 = vmatprep.subr.bf16.mxu1 %v3818_v60  ;;  %v2938_v53 = vmul.f32 %v4601_v0, %v8103_v45  ;;  %v2937_v59 = vmul.f32 %v4601_v0, %v8105_v20  ;;  %v4603_v51 = vpop.eup %4602 }
 0x4a6   :  { %3821 = vmatpush1.bf16.xpose.msra.mxu1 %v3820_v25  ;;  %v3000_v56 = vmul.f32 %v4603_v51, %v8106_v5  ;;  %v2999_v26 = vmul.f32 %v4603_v51, %v8108_v15 }
 0x4a7   :  { %v3758_v41 = vpack.c.bf16 %v2938_v53, %v2936_v2  ;;  %v3760_v6 = vpack.c.bf16 %v2937_v59, %v2935_v38 }
 0x4a8   :  { %v4605_v46 = vpop.eup %4604 }
 0x4a9   :  { %3759 = vmatprep.subr.bf16.mxu0 %v3758_v41  ;;  %v3002_v7 = vmul.f32 %v4605_v46, %v8107_v14  ;;  %v3001_v63 = vmul.f32 %v4605_v46, %v8109_v18 }
 0x4aa   :  { %3761 = vmatpush1.bf16.xpose.msra.mxu0 %v3760_v6 }
 0x4ab   :  { %v3822_v22 = vpack.c.bf16 %v3002_v7, %v3000_v56  ;;  %v3824_v21 = vpack.c.bf16 %v3001_v63, %v2999_v26  ;;  %v8110_v7 = vld [vmem:[#allocation8_spill] sm:$0xff]  ;;  %v8111_v26 = vld [vmem:[#allocation9_spill] sm:$0xff] }
 0x4ad   :  { %3823 = vmatprep.subr.bf16.mxu1 %v3822_v22 }
 0x4ae   :  { %3825 = vmatpush1.bf16.xpose.msra.mxu1 %v3824_v21  ;;  %v8112_v21 = vmov 0.0  }
 0x4b1   :  { %3068 = vmatmul.mubr.f32.vlgmr.msra.gmra.mrb[64].mxu0 %v6992_v12 }
 0x4b5   :  { %3139 = vmatmul.mubr.f32.vlgmr.msra.gmra.mrb[64].mxu1 %v6998_v30 }
 0x584   :  { %v3069_v8 = vpop.f32.mrb[64].mxu0 }
 0x585   :  { %v3145_v58 = vsel %vm334_vm0, %v3069_v8, 0.0  ;;  %v3071_v36 = vpop.f32.mrb[65].mxu0 }
 0x586   :  { %v3146_v1 = vsel %vm334_vm0, %v3071_v36, 0.0 }
 0x587   :  { %v3147_v49 = vadd.f32 %v3146_v1, %v3145_v58 }
 0x588   :  { %v3140_v35 = vpop.f32.mrb[64].mxu1 }
 0x589   :  { %v3150_v13 = vsel %vm334_vm0, %v3140_v35, 0.0  ;;  %v3142_v48 = vpop.f32.mrb[65].mxu1  ;;  %3148 = vadd.xlane.f32.xlu0 %v3147_v49 }
 0x58a   :  { %v3151_v34 = vsel %vm334_vm0, %v3142_v48, 0.0 }
 0x58b   :  { %v3152_v10 = vadd.f32 %v3151_v34, %v3150_v13 }
 0x58d   :  { %3153 = vadd.xlane.f32.xlu1 %v3152_v10 }
 0x616   :  { %v3149_v31 = vpop.xlane.xlu0 %3148 }
 0x617   :  { %v3155_v52 = vsel %vm334_vm0, %v3149_v31, 0.0 }
 0x61a   :  { %v3154_v9 = vpop.xlane.xlu1 %3153 }
 0x61b   :  { %v3156_v55 = vsel %vm334_vm0, %v3154_v9, 0.0 }
 0x61c   :  { %v3157_v4 = vadd.f32 %v3156_v55, %v3155_v52 }
 0x61e   :  { %v3159_v3 = vmul.f32 0.001953125, %v3157_v4 }
 0x620   :  { %v3162_v47 = vsub.f32 %v3140_v35, %v3159_v3  ;;  %v3163_v42 = vsub.f32 %v3142_v48, %v3159_v3  ;;  %v3160_v19 = vsub.f32 %v3069_v8, %v3159_v3  ;;  %v3161_v57 = vsub.f32 %v3071_v36, %v3159_v3 }
 0x622   :  { %v3166_v61 = vmul.f32 %v3162_v47, %v3162_v47  ;;  %v3167_v37 = vmul.f32 %v3163_v42, %v3163_v42  ;;  %v3164_v39 = vmul.f32 %v3160_v19, %v3160_v19  ;;  %v3165_v24 = vmul.f32 %v3161_v57, %v3161_v57 }
 0x624   :  { %v3173_v29 = vsel %vm334_vm0, %v3166_v61, 0.0  ;;  %v3174_v44 = vsel %vm334_vm0, %v3167_v37, 0.0  ;;  %v3168_v23 = vsel %vm334_vm0, %v3164_v39, 0.0  ;;  %v3169_v32 = vsel %vm334_vm0, %v3165_v24, 0.0 }
 0x625   :  { %v3175_v11 = vadd.f32 %v3174_v44, %v3173_v29  ;;  %v3170_v50 = vadd.f32 %v3169_v32, %v3168_v23 }
 0x627   :  { %3176 = vadd.xlane.f32.xlu1 %v3175_v11  ;;  %3171 = vadd.xlane.f32.xlu0 %v3170_v50 }
 0x638   :  { %3199 = vperm.xlu1 %3835, %v96_v27  }
 0x63d   :  { %3184 = vperm.xlu0 %3834, %v95_v62  }
 0x6b4   :  { %v3177_v28 = vpop.xlane.xlu1 %3176  ;;  %v3172_v33 = vpop.xlane.xlu0 %3171 }
 0x6b5   :  { %v3179_v40 = vsel %vm334_vm0, %v3177_v28, 0.0  ;;  %v3178_v16 = vsel %vm334_vm0, %v3172_v33, 0.0 }
 0x6b6   :  { %v3180_v60 = vadd.f32 %v3179_v40, %v3178_v16 }
 0x6b8   :  { %v3181_v25 = vmul.f32 0.001953125, %v3180_v60  ;;  %v3200_v20 = vpop.permute.xlu1 %3199 }
 0x6ba   :  { %v3191_v0 = vadd.f32 1e-05, %v3181_v25 }
 0x6bc   :  { %4606 = vrsqrt.f32 %v3191_v0  ;;  %v3185_v54 = vpop.permute.xlu0 %3184 }
 0x6bd   :  { %v3187_v2 = vmul.f32 %v3185_v54, %v3160_v19  ;;  %v3188_v45 = vmul.f32 %v3185_v54, %v3161_v57  ;;  %v3189_v53 = vmul.f32 %v3185_v54, %v3162_v47  ;;  %v3190_v17 = vmul.f32 %v3185_v54, %v3163_v42 }
 0x6c6   :  { %v4607_v38 = vpop.eup %4606 }
 0x6c7   :  { %v3193_v59 = vmul.f32 %v4607_v38, %v3187_v2  ;;  %v3194_v51 = vmul.f32 %v4607_v38, %v3188_v45  ;;  %v3195_v41 = vmul.f32 %v4607_v38, %v3189_v53  ;;  %v3196_v6 = vmul.f32 %v4607_v38, %v3190_v17 }
 0x6c9   :  { %v3202_v46 = vadd.f32 %v3200_v20, %v3193_v59  ;;  %v3203_v5 = vadd.f32 %v3200_v20, %v3194_v51  ;;  %v3204_v56 = vadd.f32 %v3200_v20, %v3195_v41  ;;  %v3205_v14 = vadd.f32 %v3200_v20, %v3196_v6  ;;  %v97_v6 = vld [vmem:[%s7091_s2 + $0x8] sm:$0xf] }
 0x6cb   :  { %v7020_v15 = vadd.f32 %v3203_v5, %v8110_v7  ;;  %v7023_v18 = vadd.f32 %v3205_v14, %v8111_v26  ;;  %v7026_v63 = vadd.f32 %v6992_v12, %v3202_v46  ;;  %v7029_v22 = vadd.f32 %v6998_v30, %v3204_v56  ;;  %v98_v46 = vld [vmem:[%s7091_s2 + $0xc] sm:$0xf]  ;;  %s4673_s2 = smov [#allocation5]  }
 0x6cc   :  { %s3612_s13 = sshll.u32 %s4673_s2, 4  ;;  %s3613_s13 = int_to_ptr.vmem [resolvable:$true] %s3612_s13 }
 0x6cd   :  { %3210 = vmatprep.subr.mxu0 %v7020_v15  ;;  %3274 = vmatprep.mubr.f32.mxu0 %v7020_v15  ;;  %s4642_s14 = scalar_lea.vmem %s3613_s13, 256  ;;  %p4647_p9 = scmp.lt.s32.totalorder %s3613_s13, %s3613_s13 }
 0x6ce   :  { %3280 = vmatprep.subr.mxu1 %v7023_v18  ;;  %3344 = vmatprep.mubr.f32.mxu1 %v7023_v18  ;;  %p4643_p8 = scmp.ne.s32.totalorder %s3613_s13, %s4642_s14  ;;  %p4648_p10 = scmp.lt.s32.totalorder %s4642_s14, %s4642_s14 }
 0x6cf   :  { %3211 = vmatpush1.xpose.msra.mxu0 %v7026_v63  ;;  %3281 = vmatpush1.xpose.msra.mxu1 %v7029_v22 }
 0x6d0   :  { %3692 = vmatprep.subr.msk.mxu0 %vm334_vm0, %v7020_v15  ;;  %3695 = vmatprep.subr.msk.mxu1 %vm334_vm0, %v7023_v18  ;;  %p4649_p11 = por %p4648_p10, %p4647_p9 }
 0x6d2   :  { %3275 = vmatmul.mubr.f32.vlgmr.msra.gmra.mrb[66].mxu0 %v7026_v63  ;;  %3345 = vmatmul.mubr.f32.vlgmr.msra.gmra.mrb[66].mxu1 %v7029_v22  ;;  %p4650_p12 = pnand %p4649_p11, %p4643_p8 }
 0x6d3   :  { %3693 = vmatpush1.msk.msra.mxu0 %vm334_vm0, %v7026_v63  ;;  %3696 = vmatpush1.msk.msra.mxu1 %vm334_vm0, %v7029_v22 }
 0x6d4   :  { %3446 = vmatprep.mubr.f32.mxu0 %v8112_v21  ;;  %3526 = vmatprep.mubr.f32.mxu1 %v8112_v21 }
 0x7a5   :  { %v3276_v12 = vpop.f32.mrb[66].mxu0  ;;  %v3346_v30 = vpop.f32.mrb[66].mxu1 }
 0x7a6   :  { %v3278_v8 = vpop.f32.mrb[67].mxu0  ;;  %v3348_v58 = vpop.f32.mrb[67].mxu1  ;;  %v3354_v36 = vsel %vm3350_vm2, %v3346_v30, -inf  ;;  %v3351_v1 = vsel %vm3350_vm2, %v3276_v12, -inf }
 0x7a7   :  { %3355 = vmax.xlane.f32.xlu0 %v3354_v36  ;;  %3352 = vmax.xlane.f32.xlu1 %v3351_v1 }
 0x834   :  { %v3356_v49 = vpop.xlane.xlu0 %3355  ;;  %v3353_v35 = vpop.xlane.xlu1 %3352 }
 0x835   :  { %v3358_v13 = vsub.f32 %v3346_v30, %v3356_v49  ;;  %v3357_v48 = vsub.f32 %v3276_v12, %v3353_v35 }
 0x837   :  { %v3359_v34 = vmul.f32 1.442695, %v3357_v48  ;;  %v3361_v10 = vmul.f32 1.442695, %v3358_v13 }
 0x839   :  { %4608 = vpow2.f32 %v3359_v34 }
 0x83a   :  { %4610 = vpow2.f32 %v3361_v10 }
 0x843   :  { %v4609_v43 = vpop.eup %4608 }
 0x844   :  { %v3363_v31 = vsel %vm3350_vm2, %v4609_v43, 0.0  ;;  %v4611_v52 = vpop.eup %4610 }
 0x845   :  { %3364 = vadd.xlane.f32.xlu1 %v3363_v31  ;;  %v3366_v9 = vsel %vm3350_vm2, %v4611_v52, 0.0 }
 0x849   :  { %3367 = vadd.xlane.f32.xlu1 %v3366_v9 }
 0x8d2   :  { %v3365_v55 = vpop.xlane.xlu1 %3364 }
 0x8d3   :  { %4612 = vrcp.f32 %v3365_v55 }
 0x8d6   :  { %v3368_v4 = vpop.xlane.xlu1 %3367 }
 0x8d7   :  { %4614 = vrcp.f32 %v3368_v4 }
 0x8dd   :  { %v4613_v3 = vpop.eup %4612 }
 0x8de   :  { %v3371_v47 = vmul.f32 %v4613_v3, %v4609_v43 }
 0x8e0   :  { %3694 = vmatmul.mubr.msk.f32.vlgmr.msra.gmra.mrb[68].mxu0 %vm237_vm1, %v3371_v47 }
 0x8e1   :  { %v4615_v42 = vpop.eup %4614 }
 0x8e2   :  { %v3372_v19 = vmul.f32 %v4615_v42, %v4611_v52 }
 0x8e4   :  { %3697 = vmatmul.mubr.msk.f32.vlgmr.msra.gmra.mrb[68].mxu1 %vm237_vm1, %v3372_v19 }
 0x9b3   :  { %v3448_v57 = vpop.f32.mrb[68].mxu0 }
 0x9b4   :  { %v3533_v61 = vsel %vm334_vm0, %v3448_v57, 0.0  ;;  %v3450_v37 = vpop.f32.mrb[69].mxu0 }
 0x9b5   :  { %v3534_v39 = vsel %vm334_vm0, %v3450_v37, 0.0 }
 0x9b6   :  { %v3535_v24 = vadd.f32 %v3534_v39, %v3533_v61 }
 0x9b7   :  { %v3528_v29 = vpop.f32.mrb[68].mxu1 }
 0x9b8   :  { %v3538_v44 = vsel %vm334_vm0, %v3528_v29, 0.0  ;;  %v3530_v23 = vpop.f32.mrb[69].mxu1  ;;  %3536 = vadd.xlane.f32.xlu1 %v3535_v24 }
 0x9b9   :  { %v3539_v32 = vsel %vm334_vm0, %v3530_v23, 0.0 }
 0x9ba   :  { %v3540_v11 = vadd.f32 %v3539_v32, %v3538_v44 }
 0x9bc   :  { %3541 = vadd.xlane.f32.xlu1 %v3540_v11 }
 0xa45   :  { %v3537_v50 = vpop.xlane.xlu1 %3536 }
 0xa46   :  { %v3543_v62 = vsel %vm334_vm0, %v3537_v50, 0.0 }
 0xa49   :  { %v3542_v27 = vpop.xlane.xlu1 %3541 }
 0xa4a   :  { %v3544_v28 = vsel %vm334_vm0, %v3542_v27, 0.0 }
 0xa4b   :  { %v3545_v33 = vadd.f32 %v3544_v28, %v3543_v62 }
 0xa4d   :  { %v3546_v40 = vmul.f32 0.001953125, %v3545_v33 }
 0xa4f   :  { %v3549_v16 = vsub.f32 %v3528_v29, %v3546_v40  ;;  %v3550_v60 = vsub.f32 %v3530_v23, %v3546_v40  ;;  %v3547_v25 = vsub.f32 %v3448_v57, %v3546_v40  ;;  %v3548_v0 = vsub.f32 %v3450_v37, %v3546_v40 }
 0xa51   :  { %v3553_v54 = vmul.f32 %v3549_v16, %v3549_v16  ;;  %v3554_v2 = vmul.f32 %v3550_v60, %v3550_v60  ;;  %v3551_v45 = vmul.f32 %v3547_v25, %v3547_v25  ;;  %v3552_v53 = vmul.f32 %v3548_v0, %v3548_v0 }
 0xa53   :  { %v3560_v17 = vsel %vm334_vm0, %v3553_v54, 0.0  ;;  %v3561_v38 = vsel %vm334_vm0, %v3554_v2, 0.0  ;;  %v3555_v20 = vsel %vm334_vm0, %v3551_v45, 0.0  ;;  %v3556_v59 = vsel %vm334_vm0, %v3552_v53, 0.0 }
 0xa54   :  { %v3562_v51 = vadd.f32 %v3561_v38, %v3560_v17  ;;  %v3557_v41 = vadd.f32 %v3556_v59, %v3555_v20 }
 0xa56   :  { %3563 = vadd.xlane.f32.xlu0 %v3562_v51  ;;  %3558 = vadd.xlane.f32.xlu1 %v3557_v41 }
 0xa67   :  { %3571 = vperm.xlu1 %3835, %v97_v6  }
 0xa6c   :  { %3586 = vperm.xlu0 %3834, %v98_v46  }
 0xae3   :  { %v3564_v5 = vpop.xlane.xlu0 %3563  ;;  %v3559_v56 = vpop.xlane.xlu1 %3558 }
 0xae4   :  { %v3566_v14 = vsel %vm334_vm0, %v3564_v5, 0.0  ;;  %v3565_v7 = vsel %vm334_vm0, %v3559_v56, 0.0 }
 0xae5   :  { %v3567_v26 = vadd.f32 %v3566_v14, %v3565_v7 }
 0xae7   :  { %v3568_v21 = vmul.f32 0.001953125, %v3567_v26  ;;  %v3572_v30 = vpop.permute.xlu1 %3571 }
 0xae8   :  { %v3574_v8 = vmul.f32 %v3572_v30, %v3547_v25  ;;  %v3575_v58 = vmul.f32 %v3572_v30, %v3548_v0  ;;  %v3576_v36 = vmul.f32 %v3572_v30, %v3549_v16  ;;  %v3577_v1 = vmul.f32 %v3572_v30, %v3550_v60 }
 0xae9   :  { %v3578_v12 = vadd.f32 1e-05, %v3568_v21 }
 0xaeb   :  { %4616 = vrsqrt.f32 %v3578_v12  ;;  %v3587_v10 = vpop.permute.xlu0 %3586 }
 0xaf5   :  { %v4617_v49 = vpop.eup %4616 }
 0xaf6   :  { %v3580_v35 = vmul.f32 %v4617_v49, %v3574_v8  ;;  %v3581_v13 = vmul.f32 %v4617_v49, %v3575_v58  ;;  %v3582_v48 = vmul.f32 %v4617_v49, %v3576_v36  ;;  %v3583_v34 = vmul.f32 %v4617_v49, %v3577_v1 }
 0xaf8   :  { %v3589_v43 = vadd.f32 %v3587_v10, %v3580_v35  ;;  %v3590_v31 = vadd.f32 %v3587_v10, %v3581_v13  ;;  %v3591_v52 = vadd.f32 %v3587_v10, %v3582_v48  ;;  %v3592_v9 = vadd.f32 %v3587_v10, %v3583_v34 }
 0xafa   :  { %v3593_v55 = vadd.f32 %v3589_v43, %v7026_v63  ;;  %v3594_v4 = vadd.f32 %v3590_v31, %v7020_v15  ;;  %v3595_v3 = vadd.f32 %v3591_v52, %v7029_v22  ;;  %v3596_v47 = vadd.f32 %v3592_v9, %v7023_v18 }
 0xafc   :  { %v3601_v42 = vcombine.low %v3593_v55, %v3594_v4  ;;  %v3602_v19 = vcombine.low %v3595_v3, %v3596_v47 }
 0xafe   :  { %3605 = vst [vmem:[#allocation5] sm:$0xff] %v3601_v42  ;;  %3606 = vst [vmem:[#allocation5 + $0x8] sm:$0xff] %v3602_v19 }
 0xaff   :  { %4653 = shalt.err (!%p4650_p12)
}
 0xb00   :  { %s4654_s17 = scalar_lea.hbm %s7092_s3, 256 }
 0xb01   :  { %p4655_p13 = scmp.ne.s32.totalorder %s7092_s3, %s4654_s17  ;;  %p4658_p0 = scmp.lt.u32.totalorder %s4654_s17, %s7092_s3 }
 0xb03   :  { %p4660_p1 = pnand %p4658_p0, %p4655_p13 }
 0xb05   :  { %4663 = shalt.err (!%p4660_p1)
}
 0xb06   :  { %s4674_s22 = smov 128   ;;  %s4675_s23 = smov 8  }
 0xb07   :  { %3618 = dma.vmem_to_hbm [thread:$0]  %s3613_s13, 256, %s7092_s3, [#allocation4], %s4674_s22, %s4674_s22, %s4675_s23  }
 0xb08   :  { %4666 = dma.done.wait [#allocation4], 256  }
 0xb09   :  { %4667 = vsyncadd [#allocation4], 4294967040 }
 0xb0a   :  { %3622 = vsyncpa [#allocation3], 1 }
 0xb0b   :  { %3623 = vsyncpa [#allocation4], 1 }

</bundles_post_ra>
